<compile_context>
chip_gen: v6e
topology: v6e:2x2x1
jax: 0.10.0
libtpu: 0.0.40
codegen_flags: <defaults>
</compile_context>

<pallas_src>
import functools

import jax
import jax.numpy as jnp
from jax.experimental import pallas as pl
from jax.experimental.pallas import tpu as pltpu

# ----- sizes (consistent with Controller(f, g, n, m, n_xi, l)) -----
N_PLANT = 4    # n   : plant / controller-internal state dim (x_ctl)
M       = 2    # m   : measurement & control dim (PsiU is PsiU(m, m, n_xi, l))
N_XI    = 8    # n_xi: REN state dim
L       = 8    # l   : REN nonlinearity size
OUTPUT_AMPLIFICATION = 20.0
CHUNK   = 8    # controller steps per grid iteration (unrolled in-kernel)

# lane offsets in the streamed input rows / packed output rows
Y_LANE, U_LANE       = 0, 2          # input row: y at 0..1, external u at 2..3
XI0_LANE, XC0_LANE   = 8, 16         # init state (row 0 of chunk 0 only)
UOUT_LANE, XC_LANE, EXI_LANE = 0, 2, 6   # output row: u | x_ctl | E_xi

# weight-slab block row offsets; every block is one (8,128) f32 tile
(_A, _B, _C, _YD, _EINV, _C1S, _D12S, _FT, _B2T, _C2T, _D22T,
 _I8S, _D11T, _B1T, _D21T, _SUBD, _XI0SEL, _XC0SEL) = (8 * i for i in range(18))
W_ROWS = 18 * 8


# ------------------------------------------------------------------ kernel ----
def _controller_chunk_kernel(chunk, yu_ref, w_ref, o_ref, state_sc):
    """One grid step == `chunk` consecutive Controller.forward steps.

    Layout conventions (no transpose/reshape ever needed):
      * column vectors live along sublanes of lane 0 : shape (8, 1)
      * row    vectors live along lanes of sublane 0 : shape (1, 128)
      * rmat(row, W_pad)  : row -> col    y[o] = sum_k x[k] * W[o, k]
      * cmat(col, WT_pad) : col -> row    same math, W stored transposed
    All lane placements (u@0..1, x_ctl@2..5, E_xi@6..13, eps/c@0..7) are baked
    into the packed weight blocks, so output rows are assembled by addition.
    """
    f32 = jnp.float32

    def blk(off):                      # one (8,128) weight tile
        return w_ref[off:off + 8, :]

    def rmat(x_row, w_pad):            # (1,128) x (8,128) -> (8,1)
        return jnp.sum(x_row * w_pad, axis=-1, keepdims=True)

    def cmat(x_col, wt_pad):           # (8,1) x (8,128) -> (1,128)
        return jnp.sum(x_col * wt_pad, axis=0, keepdims=True)

    a_b, b_b, c_b, yd_b, einv_b = blk(_A), blk(_B), blk(_C), blk(_YD), blk(_EINV)
    c1s_b, d12s_b, ft_b, b2t_b = blk(_C1S), blk(_D12S), blk(_FT), blk(_B2T)
    c2t_b, d22t_b, i8s_b = blk(_C2T), blk(_D22T), blk(_I8S)
    d11t_b, b1t_b, d21t_b, subd_b = blk(_D11T), blk(_B1T), blk(_D21T), blk(_SUBD)

    # chunk 0: unpack xi0 / x_ctl0 from spare lanes of the first streamed row
    @pl.when(pl.program_id(0) == 0)
    def _():
        row0 = yu_ref[0:1, :]
        state_sc[0:8, 0:1] = rmat(row0, blk(_XI0SEL))                # xi0 column
        state_sc[8:9, :] = cmat(rmat(row0, blk(_XC0SEL)), i8s_b)     # x_ctl0 @ lanes 2..5

    xi_col   = state_sc[0:8, 0:1]      # REN state xi           (column, sublanes 0..7)
    xctl_row = state_sc[8:9, :]        # controller plant state (row, lanes 2..5)

    for s in range(chunk):             # unrolled; the recursion is strictly serial
        in_row = yu_ref[s:s + 1, :]    # y at lanes 0..1, external u at lanes 2..3

        # ---- PsiY:  x_ctl_ = A x_ctl + B u ;  w = y - (C x_ctl + D u) ----
        xctl_new_col = rmat(xctl_row, a_b) + rmat(in_row, b_b)
        xctl_new_row = cmat(xctl_new_col, i8s_b)                     # row @ lanes 2..5
        w_col = rmat(in_row, yd_b) - rmat(xctl_row, c_b)             # YD: y - D u

        # ---- PsiU epsilon recursion (1/Lambda pre-folded into C1/D11/D12) ----
        c_row = cmat(xi_col, c1s_b) + cmat(w_col, d12s_b)            # lanes 0..7

        d11_acc = jnp.zeros((1, 128), f32)    # running (D11 eps)/Lambda  (row)
        b1_acc  = jnp.zeros((1, 128), f32)    # running  B1  eps          (row, lanes 6..13)
        d21_acc = jnp.zeros((1, 128), f32)    # running  D21 eps          (row, lanes 0..1)

        e = jnp.tanh(c_row[:, 0:1])           # eps_0
        partial = c_row[:, 1:2]               # base_1 minus the eps_0 term
        for j in range(L):
            # off-chain accumulator MACs: a full iteration of slack vs. the e-chain
            b1_acc  = b1_acc + e * b1t_b[j:j + 1, :]
            d21_acc = d21_acc + e * d21t_b[j:j + 1, :]
            if j + 1 < L:
                # on-chain: (1,1) mul + add + tanh only
                e_next = jnp.tanh(partial + e * subd_b[j:j + 1, 0:1])
                if j + 2 < L:
                    d11_acc = d11_acc + e * d11t_b[j:j + 1, :]
                    partial = c_row[:, j + 2:j + 3] + d11_acc[:, j + 2:j + 3]
                e = e_next

        # ---- PsiU state / output maps ----
        e_xi_row = cmat(xi_col, ft_b) + b1_acc + cmat(w_col, b2t_b)  # E xi_, lanes 6..13
        xi_new_col = rmat(e_xi_row, einv_b)                          # xi_ = E^{-1} (E xi_)
        u_row = OUTPUT_AMPLIFICATION * (
            cmat(xi_col, c2t_b) + d21_acc + cmat(w_col, d22t_b))     # lanes 0..1

        # packed lane-dense output row: [u | x_ctl_{t+1} | E_xi_{t+1}] (disjoint lanes)
        o_ref[s:s + 1, :] = u_row + xctl_new_row + e_xi_row

        xi_col, xctl_row = xi_new_col, xctl_new_row

    # carry state to the next chunk (requires sequential "arbitrary" grid order)
    state_sc[0:8, 0:1] = xi_col
    state_sc[8:9, :]   = xctl_row


# --------------------------------------------------------------- setup glue ---
def make_params(key, n=N_PLANT, m=M, n_xi=N_XI, l=L, std=1.0):
    """Mirrors PsiU.__init__/set_model_param plus simple linear f,g for PsiY."""
    ks = jax.random.split(key, 11)
    X   = jax.random.normal(ks[0], (2 * n_xi + l, 2 * n_xi + l), jnp.float32) * std
    Y   = jax.random.normal(ks[1], (n_xi, n_xi), jnp.float32) * std
    B2  = jax.random.normal(ks[2], (n_xi, m), jnp.float32) * std
    C2  = jax.random.normal(ks[3], (m, n_xi), jnp.float32) * std
    D21 = jax.random.normal(ks[4], (m, l), jnp.float32) * std
    D22 = jax.random.normal(ks[5], (m, m), jnp.float32) * std
    D12 = jax.random.normal(ks[6], (l, m), jnp.float32) * std
    # linear plant maps for f, g (user-supplied callables in the torch code)
    A = jax.random.normal(ks[7], (n, n), jnp.float32) * 0.1
    B = jax.random.normal(ks[8], (n, m), jnp.float32) * 0.1
    C = jax.random.normal(ks[9], (m, n), jnp.float32) * 0.1
    D = jax.random.normal(ks[10], (m, m), jnp.float32) * 0.1

    epsilon = 1e-3
    H = X.T @ X + epsilon * jnp.eye(2 * n_xi + l, dtype=jnp.float32)
    H11 = H[:n_xi, :n_xi]
    H21 = H[n_xi:n_xi + l, :n_xi]
    H22 = H[n_xi:n_xi + l, n_xi:n_xi + l]
    H31 = H[n_xi + l:, :n_xi]
    H32 = H[n_xi + l:, n_xi:n_xi + l]
    H33 = H[n_xi + l:, n_xi + l:]
    F_mat  = H31
    B1     = H32
    E      = 0.5 * (H11 + H33 + Y - Y.T)
    Lambda = 0.5 * jnp.diag(H22)
    D11    = -jnp.tril(H22, k=-1)
    C1     = -H21
    E_inv  = jnp.linalg.inv(E)   # TODO(synk): dense inversion stays outside the kernel

    return dict(A=A, B=B, C=C, D=D, C1=C1, D11=D11, D12=D12, Lambda=Lambda,
                F=F_mat, B1=B1, B2=B2, E_inv=E_inv, C2=C2, D21=D21, D22=D22)


def pack_weights(p):
    """One lane-dense (144,128) slab; 1/Lambda folded into C1/D11/D12; all lane
    offsets (input/output packing) baked into the blocks."""
    f32 = jnp.float32
    lam = p["Lambda"][:, None]
    c1s, d11s, d12s = p["C1"] / lam, p["D11"] / lam, p["D12"] / lam

    def z():
        return jnp.zeros((8, 128), f32)

    rxi, rnp = jnp.arange(N_XI), jnp.arange(N_PLANT)
    blocks = [None] * 18
    blocks[_A // 8]    = z().at[:N_PLANT, XC_LANE:XC_LANE + N_PLANT].set(p["A"])
    blocks[_B // 8]    = z().at[:N_PLANT, U_LANE:U_LANE + M].set(p["B"])
    blocks[_C // 8]    = z().at[:M, XC_LANE:XC_LANE + N_PLANT].set(p["C"])
    blocks[_YD // 8]   = (z().at[:M, Y_LANE:Y_LANE + M].set(jnp.eye(M, dtype=f32))
                             .at[:M, U_LANE:U_LANE + M].set(-p["D"]))
    blocks[_EINV // 8] = z().at[:N_XI, EXI_LANE:EXI_LANE + N_XI].set(p["E_inv"])
    blocks[_C1S // 8]  = z().at[:N_XI, :L].set(c1s.T)     # [k,i] = C1[i,k]/Lam[i]
    blocks[_D12S // 8] = z().at[:M, :L].set(d12s.T)
    blocks[_FT // 8]   = z().at[:N_XI, EXI_LANE:EXI_LANE + N_XI].set(p["F"].T)
    blocks[_B2T // 8]  = z().at[:M, EXI_LANE:EXI_LANE + N_XI].set(p["B2"].T)
    blocks[_C2T // 8]  = z().at[:N_XI, UOUT_LANE:UOUT_LANE + M].set(p["C2"].T)
    blocks[_D22T // 8] = z().at[:M, UOUT_LANE:UOUT_LANE + M].set(p["D22"].T)
    blocks[_I8S // 8]  = z().at[rnp, XC_LANE + rnp].set(1.0)   # col->row flip @ 2..5
    blocks[_D11T // 8] = z().at[:L, :L].set(d11s.T)            # [j,i] = D11[i,j]/Lam[i]
    blocks[_B1T // 8]  = z().at[:L, EXI_LANE:EXI_LANE + N_XI].set(p["B1"].T)
    blocks[_D21T // 8] = z().at[:L, UOUT_LANE:UOUT_LANE + M].set(p["D21"].T)
    blocks[_SUBD // 8] = z().at[jnp.arange(L - 1), 0].set(
        jnp.diagonal(d11s, offset=-1))                          # D11[j+1,j]/Lam[j+1]
    blocks[_XI0SEL // 8] = z().at[rxi, XI0_LANE + rxi].set(1.0)
    blocks[_XC0SEL // 8] = z().at[rnp, XC0_LANE + rnp].set(1.0)

    assert all(b is not None for b in blocks)
    slab = jnp.concatenate(blocks, axis=0)
    assert slab.shape == (W_ROWS, 128)
    return slab


# ------------------------------------------------------------------ wrapper ---
def controller_rollout(y_seq, u_seq, xi0, xctl0, params, chunk=CHUNK):
    """Run T consecutive Controller.forward steps fused in one pallas_call.

    Step t: (u_t, xi_{t+1}, x_ctl_{t+1}) = Controller.forward(t, y_t, xi_t,
                                                              (., u_t, x_ctl_t))
    with xi / x_ctl carried inside the kernel across all steps/chunks.
    """
    T = y_seq.shape[0]
    n_chunks = pl.cdiv(T, chunk)
    t_pad = n_chunks * chunk

    # per-step streamed row: y at lanes 0..1, external u at lanes 2..3;
    # row 0 additionally carries xi0 (lanes 8..15) and x_ctl0 (lanes 16..19)
    yu = jnp.zeros((t_pad, 128), jnp.float32)
    yu = yu.at[:T, Y_LANE:Y_LANE + M].set(y_seq.astype(jnp.float32))
    yu = yu.at[:T, U_LANE:U_LANE + M].set(u_seq.astype(jnp.float32))
    yu = yu.at[0, XI0_LANE:XI0_LANE + N_XI].set(xi0.astype(jnp.float32))
    yu = yu.at[0, XC0_LANE:XC0_LANE + N_PLANT].set(xctl0.astype(jnp.float32))

    wslab = pack_weights(params)

    out = pl.pallas_call(
        functools.partial(_controller_chunk_kernel, chunk),
        out_shape=jax.ShapeDtypeStruct((t_pad, 128), jnp.float32),
        grid=(n_chunks,),
        in_specs=[
            pl.BlockSpec((chunk, 128), lambda c: (c, 0)),      # streamed y/u rows
            pl.BlockSpec((W_ROWS, 128), lambda c: (0, 0)),     # weight slab (resident)
        ],
        out_specs=pl.BlockSpec((chunk, 128), lambda c: (c, 0)),
        scratch_shapes=[pltpu.VMEM((16, 128), jnp.float32)],   # carried (xi, x_ctl)
        # Strictly serial recursion: this axis must stay "arbitrary" (never
        # "parallel"), otherwise the scratch carry across chunks breaks.
        compiler_params=pltpu.CompilerParams(
            dimension_semantics=("arbitrary",)),
    )(yu, wslab)

    u_all    = out[:T, UOUT_LANE:UOUT_LANE + M]
    xctl_all = out[:T, XC_LANE:XC_LANE + N_PLANT]
    exi_all  = out[:T, EXI_LANE:EXI_LANE + N_XI]
    xi_all   = exi_all @ params["E_inv"].T      # xi_ = E^{-1} E_xi (wrapper-side)
    return u_all, xi_all, xctl_all


def controller_forward(t, y_, xi, omega, params):
    """Single-step Controller.forward (original module interface); t unused
    (f,g are LTI, PsiU ignores t, use_sp=False)."""
    del t
    _y_om, u_om, x_ctl = omega
    u_all, xi_all, xctl_all = controller_rollout(
        y_[None, :], u_om[None, :], xi, x_ctl, params)
    return u_all[0], xi_all[0], xctl_all[0]


# ---------------------------------------------------------------- reference ---
def controller_step_ref(y_, xi, omega, p):
    """Pure-JAX literal transcription of the torch forward (one step)."""
    _y_om, u_om, x_ctl = omega
    x_ctl_ = p["A"] @ x_ctl + p["B"] @ u_om
    psi_y  = p["C"] @ x_ctl + p["D"] @ u_om
    w = y_ - psi_y
    eps = jnp.zeros(L, jnp.float32)
    for i in range(L):
        v = p["C1"][i] @ xi + p["D11"][i] @ eps + p["D12"][i] @ w
        eps = eps.at[i].add(jnp.tanh(v / p["Lambda"][i]))
    E_xi = p["F"] @ xi + p["B1"] @ eps + p["B2"] @ w
    xi_  = p["E_inv"] @ E_xi
    u    = p["C2"] @ xi + p["D21"] @ eps + p["D22"] @ w
    return u * OUTPUT_AMPLIFICATION, xi_, x_ctl_


def controller_rollout_ref(y_seq, u_seq, xi0, xctl0, p):
    xi, x_ctl = xi0, xctl0
    us, xis, xcs = [], [], []
    for t in range(y_seq.shape[0]):
        u_, xi, x_ctl = controller_step_ref(y_seq[t], xi, (None, u_seq[t], x_ctl), p)
        us.append(u_); xis.append(xi); xcs.append(x_ctl)
    return jnp.stack(us), jnp.stack(xis), jnp.stack(xcs)


# --------------------------------------------------------------------- main ---
if __name__ == "__main__":
    key = jax.random.PRNGKey(0)
    k_par, k_y, k_u, k_xi, k_x = jax.random.split(key, 5)

    params = make_params(k_par)

    T = 8
    y_seq = jax.random.normal(k_y, (T, M), jnp.float32)
    u_seq = jax.random.normal(k_u, (T, M), jnp.float32)
    xi0   = jax.random.normal(k_xi, (N_XI,), jnp.float32)
    xctl0 = jax.random.normal(k_x, (N_PLANT,), jnp.float32)

    # fused rollout: all T steps in a single grid iteration of one pallas_call
    u_all, xi_all, xctl_all = controller_rollout(y_seq, u_seq, xi0, xctl0, params)
    jax.block_until_ready((u_all, xi_all, xctl_all))

    u_ref, xi_ref, xctl_ref = controller_rollout_ref(y_seq, u_seq, xi0, xctl0, params)

    assert u_all.shape == (T, M) and xi_all.shape == (T, N_XI) and xctl_all.shape == (T, N_PLANT)

    def check(a, b, name, tol=1e-3):
        err = float(jnp.max(jnp.abs(a - b)) / (1.0 + jnp.max(jnp.abs(b))))
        assert err < tol, f"{name}: scaled max err {err}"

    check(u_all, u_ref, "u")
    check(xi_all, xi_ref, "xi")
    check(xctl_all, xctl_ref, "x_ctl")

    # single-step interface (matches Controller.forward signature/semantics)
    u1, xi1, xc1 = controller_forward(
        0, y_seq[0], xi0, (jnp.zeros((M,), jnp.float32), u_seq[0], xctl0), params)
    jax.block_until_ready((u1, xi1, xc1))
    u1r, xi1r, xc1r = controller_step_ref(y_seq[0], xi0, (None, u_seq[0], xctl0), params)
    check(u1, u1r, "u_step")
    check(xi1, xi1r, "xi_step")
    check(xc1, xc1r, "x_ctl_step")

    print("KERNEL_OK")
</pallas_src>

<mosaic_0001>
module attributes {stable_mosaic.version = 11 : i64} {
  func.func @_controller_chunk_kernel(%arg0: i32, %arg1: memref<8x128xf32, #tpu.memory_space<vmem>>, %arg2: memref<144x128xf32, #tpu.memory_space<vmem>>, %arg3: memref<8x128xf32, #tpu.memory_space<vmem>>, %arg4: memref<16x128xf32, #tpu.memory_space<vmem>>) attributes {dimension_semantics = [#tpu.dimension_semantics<arbitrary>], iteration_bounds = array<i64: 1>, scalar_prefetch = 0 : i64, scratch_operands = 1 : i64, tpu.core_type = #tpu.core_type<tc>, window_params = [{transform_indices = @transform_0, window_bounds = array<i64: 8, 128>}, {pipeline_mode = #tpu.pipeline_mode<synchronous>, transform_indices = @transform_1, window_bounds = array<i64: 144, 128>}, {transform_indices = @transform_2, window_bounds = array<i64: 8, 128>}]} {
    %c0 = arith.constant 0 : index
    %c0_0 = arith.constant 0 : index
    %0 = vector.load %arg2[%c0, %c0_0] : memref<144x128xf32, #tpu.memory_space<vmem>>, vector<8x128xf32>
    %c8 = arith.constant 8 : index
    %c0_1 = arith.constant 0 : index
    %1 = vector.load %arg2[%c8, %c0_1] : memref<144x128xf32, #tpu.memory_space<vmem>>, vector<8x128xf32>
    %c16 = arith.constant 16 : index
    %c0_2 = arith.constant 0 : index
    %2 = vector.load %arg2[%c16, %c0_2] : memref<144x128xf32, #tpu.memory_space<vmem>>, vector<8x128xf32>
    %c24 = arith.constant 24 : index
    %c0_3 = arith.constant 0 : index
    %3 = vector.load %arg2[%c24, %c0_3] : memref<144x128xf32, #tpu.memory_space<vmem>>, vector<8x128xf32>
    %c32 = arith.constant 32 : index
    %c0_4 = arith.constant 0 : index
    %4 = vector.load %arg2[%c32, %c0_4] : memref<144x128xf32, #tpu.memory_space<vmem>>, vector<8x128xf32>
    %c40 = arith.constant 40 : index
    %c0_5 = arith.constant 0 : index
    %5 = vector.load %arg2[%c40, %c0_5] : memref<144x128xf32, #tpu.memory_space<vmem>>, vector<8x128xf32>
    %c48 = arith.constant 48 : index
    %c0_6 = arith.constant 0 : index
    %6 = vector.load %arg2[%c48, %c0_6] : memref<144x128xf32, #tpu.memory_space<vmem>>, vector<8x128xf32>
    %c56 = arith.constant 56 : index
    %c0_7 = arith.constant 0 : index
    %7 = vector.load %arg2[%c56, %c0_7] : memref<144x128xf32, #tpu.memory_space<vmem>>, vector<8x128xf32>
    %c64 = arith.constant 64 : index
    %c0_8 = arith.constant 0 : index
    %8 = vector.load %arg2[%c64, %c0_8] : memref<144x128xf32, #tpu.memory_space<vmem>>, vector<8x128xf32>
    %c72 = arith.constant 72 : index
    %c0_9 = arith.constant 0 : index
    %9 = vector.load %arg2[%c72, %c0_9] : memref<144x128xf32, #tpu.memory_space<vmem>>, vector<8x128xf32>
    %c80 = arith.constant 80 : index
    %c0_10 = arith.constant 0 : index
    %10 = vector.load %arg2[%c80, %c0_10] : memref<144x128xf32, #tpu.memory_space<vmem>>, vector<8x128xf32>
    %c88 = arith.constant 88 : index
    %c0_11 = arith.constant 0 : index
    %11 = vector.load %arg2[%c88, %c0_11] : memref<144x128xf32, #tpu.memory_space<vmem>>, vector<8x128xf32>
    %c96 = arith.constant 96 : index
    %c0_12 = arith.constant 0 : index
    %12 = vector.load %arg2[%c96, %c0_12] : memref<144x128xf32, #tpu.memory_space<vmem>>, vector<8x128xf32>
    %c104 = arith.constant 104 : index
    %c0_13 = arith.constant 0 : index
    %13 = vector.load %arg2[%c104, %c0_13] : memref<144x128xf32, #tpu.memory_space<vmem>>, vector<8x128xf32>
    %c112 = arith.constant 112 : index
    %c0_14 = arith.constant 0 : index
    %14 = vector.load %arg2[%c112, %c0_14] : memref<144x128xf32, #tpu.memory_space<vmem>>, vector<8x128xf32>
    %c120 = arith.constant 120 : index
    %c0_15 = arith.constant 0 : index
    %15 = vector.load %arg2[%c120, %c0_15] : memref<144x128xf32, #tpu.memory_space<vmem>>, vector<8x128xf32>
    %c0_i32 = arith.constant 0 : i32
    %16 = arith.cmpi eq, %arg0, %c0_i32 : i32
    %17 = arith.extui %16 : i1 to i32
    %c0_i32_16 = arith.constant 0 : i32
    %18 = arith.cmpi ne, %17, %c0_i32_16 : i32
    scf.if %18 {
      %c0_177 = arith.constant 0 : index
      %c0_178 = arith.constant 0 : index
      %1631 = vector.load %arg1[%c0_177, %c0_178] : memref<8x128xf32, #tpu.memory_space<vmem>>, vector<1x128xf32>
      %c128 = arith.constant 128 : index
      %c0_179 = arith.constant 0 : index
      %1632 = vector.load %arg2[%c128, %c0_179] : memref<144x128xf32, #tpu.memory_space<vmem>>, vector<8x128xf32>
      %1633 = vector.broadcast %1631 : vector<1x128xf32> to vector<8x128xf32>
      %1634 = arith.mulf %1633, %1632 : vector<8x128xf32>
      %cst_180 = arith.constant dense<0.000000e+00> : vector<8xf32>
      %1635 = vector.multi_reduction <add>, %1634, %cst_180 [1] : vector<8x128xf32> to vector<8xf32>
      %1636 = vector.shape_cast %1635 : vector<8xf32> to vector<8x1xf32>
      %c0_181 = arith.constant 0 : index
      %c0_182 = arith.constant 0 : index
      %1637 = vector.load %arg4[%c0_181, %c0_182] : memref<16x128xf32, #tpu.memory_space<vmem>>, vector<8x1xf32>
      tpu.vector_store %arg4[%c0_181, %c0_182], %1636 {strides = array<i32>} : memref<16x128xf32, #tpu.memory_space<vmem>>, vector<8x1xf32>,
      %c136 = arith.constant 136 : index
      %c0_183 = arith.constant 0 : index
      %1638 = vector.load %arg2[%c136, %c0_183] : memref<144x128xf32, #tpu.memory_space<vmem>>, vector<8x128xf32>
      %1639 = vector.broadcast %1631 : vector<1x128xf32> to vector<8x128xf32>
      %1640 = arith.mulf %1639, %1638 : vector<8x128xf32>
      %cst_184 = arith.constant dense<0.000000e+00> : vector<8xf32>
      %1641 = vector.multi_reduction <add>, %1640, %cst_184 [1] : vector<8x128xf32> to vector<8xf32>
      %1642 = vector.shape_cast %1641 : vector<8xf32> to vector<8x1xf32>
      %1643 = vector.broadcast %1642 : vector<8x1xf32> to vector<8x128xf32>
      %1644 = arith.mulf %1643, %11 : vector<8x128xf32>
      %cst_185 = arith.constant dense<0.000000e+00> : vector<128xf32>
      %1645 = vector.multi_reduction <add>, %1644, %cst_185 [0] : vector<8x128xf32> to vector<128xf32>
      %1646 = vector.shape_cast %1645 : vector<128xf32> to vector<1x128xf32>
      %c8_186 = arith.constant 8 : index
      %c0_187 = arith.constant 0 : index
      %1647 = vector.load %arg4[%c8_186, %c0_187] : memref<16x128xf32, #tpu.memory_space<vmem>>, vector<1x128xf32>
      tpu.vector_store %arg4[%c8_186, %c0_187], %1646 {strides = array<i32>} : memref<16x128xf32, #tpu.memory_space<vmem>>, vector<1x128xf32>,
    } else {
    }
    %c0_17 = arith.constant 0 : index
    %c0_18 = arith.constant 0 : index
    %19 = vector.load %arg4[%c0_17, %c0_18] : memref<16x128xf32, #tpu.memory_space<vmem>>, vector<8x1xf32>
    %c8_19 = arith.constant 8 : index
    %c0_20 = arith.constant 0 : index
    %20 = vector.load %arg4[%c8_19, %c0_20] : memref<16x128xf32, #tpu.memory_space<vmem>>, vector<1x128xf32>
    %c0_21 = arith.constant 0 : index
    %c0_22 = arith.constant 0 : index
    %21 = vector.load %arg1[%c0_21, %c0_22] : memref<8x128xf32, #tpu.memory_space<vmem>>, vector<1x128xf32>
    %22 = vector.broadcast %20 : vector<1x128xf32> to vector<8x128xf32>
    %23 = arith.mulf %22, %0 : vector<8x128xf32>
    %cst = arith.constant dense<0.000000e+00> : vector<8xf32>
    %24 = vector.multi_reduction <add>, %23, %cst [1] : vector<8x128xf32> to vector<8xf32>
    %25 = vector.shape_cast %24 : vector<8xf32> to vector<8x1xf32>
    %26 = vector.broadcast %21 : vector<1x128xf32> to vector<8x128xf32>
    %27 = arith.mulf %26, %1 : vector<8x128xf32>
    %cst_23 = arith.constant dense<0.000000e+00> : vector<8xf32>
    %28 = vector.multi_reduction <add>, %27, %cst_23 [1] : vector<8x128xf32> to vector<8xf32>
    %29 = vector.shape_cast %28 : vector<8xf32> to vector<8x1xf32>
    %30 = arith.addf %25, %29 : vector<8x1xf32>
    %31 = vector.broadcast %30 : vector<8x1xf32> to vector<8x128xf32>
    %32 = arith.mulf %31, %11 : vector<8x128xf32>
    %cst_24 = arith.constant dense<0.000000e+00> : vector<128xf32>
    %33 = vector.multi_reduction <add>, %32, %cst_24 [0] : vector<8x128xf32> to vector<128xf32>
    %34 = vector.shape_cast %33 : vector<128xf32> to vector<1x128xf32>
    %35 = vector.broadcast %21 : vector<1x128xf32> to vector<8x128xf32>
    %36 = arith.mulf %35, %3 : vector<8x128xf32>
    %cst_25 = arith.constant dense<0.000000e+00> : vector<8xf32>
    %37 = vector.multi_reduction <add>, %36, %cst_25 [1] : vector<8x128xf32> to vector<8xf32>
    %38 = vector.shape_cast %37 : vector<8xf32> to vector<8x1xf32>
    %39 = vector.broadcast %20 : vector<1x128xf32> to vector<8x128xf32>
    %40 = arith.mulf %39, %2 : vector<8x128xf32>
    %cst_26 = arith.constant dense<0.000000e+00> : vector<8xf32>
    %41 = vector.multi_reduction <add>, %40, %cst_26 [1] : vector<8x128xf32> to vector<8xf32>
    %42 = vector.shape_cast %41 : vector<8xf32> to vector<8x1xf32>
    %43 = arith.subf %38, %42 : vector<8x1xf32>
    %44 = vector.broadcast %19 : vector<8x1xf32> to vector<8x128xf32>
    %45 = arith.mulf %44, %5 : vector<8x128xf32>
    %cst_27 = arith.constant dense<0.000000e+00> : vector<128xf32>
    %46 = vector.multi_reduction <add>, %45, %cst_27 [0] : vector<8x128xf32> to vector<128xf32>
    %47 = vector.shape_cast %46 : vector<128xf32> to vector<1x128xf32>
    %48 = vector.broadcast %43 : vector<8x1xf32> to vector<8x128xf32>
    %49 = arith.mulf %48, %6 : vector<8x128xf32>
    %cst_28 = arith.constant dense<0.000000e+00> : vector<128xf32>
    %50 = vector.multi_reduction <add>, %49, %cst_28 [0] : vector<8x128xf32> to vector<128xf32>
    %51 = vector.shape_cast %50 : vector<128xf32> to vector<1x128xf32>
    %52 = arith.addf %47, %51 : vector<1x128xf32>
    %cst_29 = arith.constant 0.000000e+00 : f32
    %53 = vector.broadcast %cst_29 : f32 to vector<1x128xf32>
    %cst_30 = arith.constant 0.000000e+00 : f32
    %54 = vector.broadcast %cst_30 : f32 to vector<1x128xf32>
    %cst_31 = arith.constant 0.000000e+00 : f32
    %55 = vector.broadcast %cst_31 : f32 to vector<1x128xf32>
    %56 = vector.extract_strided_slice %52 {offsets = [0, 0], sizes = [1, 1], strides = [1, 1]} : vector<1x128xf32> to vector<1x1xf32>
    %57 = math.tanh %56 : vector<1x1xf32>
    %58 = vector.extract_strided_slice %52 {offsets = [0, 1], sizes = [1, 1], strides = [1, 1]} : vector<1x128xf32> to vector<1x1xf32>
    %59 = vector.extract_strided_slice %13 {offsets = [0, 0], sizes = [1, 128], strides = [1, 1]} : vector<8x128xf32> to vector<1x128xf32>
    %60 = vector.broadcast %57 : vector<1x1xf32> to vector<1x128xf32>
    %61 = arith.mulf %60, %59 : vector<1x128xf32>
    %62 = arith.addf %54, %61 : vector<1x128xf32>
    %63 = vector.extract_strided_slice %14 {offsets = [0, 0], sizes = [1, 128], strides = [1, 1]} : vector<8x128xf32> to vector<1x128xf32>
    %64 = vector.broadcast %57 : vector<1x1xf32> to vector<1x128xf32>
    %65 = arith.mulf %64, %63 : vector<1x128xf32>
    %66 = arith.addf %55, %65 : vector<1x128xf32>
    %67 = vector.extract_strided_slice %15 {offsets = [0, 0], sizes = [1, 1], strides = [1, 1]} : vector<8x128xf32> to vector<1x1xf32>
    %68 = arith.mulf %57, %67 : vector<1x1xf32>
    %69 = arith.addf %58, %68 : vector<1x1xf32>
    %70 = math.tanh %69 : vector<1x1xf32>
    %71 = vector.extract_strided_slice %12 {offsets = [0, 0], sizes = [1, 128], strides = [1, 1]} : vector<8x128xf32> to vector<1x128xf32>
    %72 = vector.broadcast %57 : vector<1x1xf32> to vector<1x128xf32>
    %73 = arith.mulf %72, %71 : vector<1x128xf32>
    %74 = arith.addf %53, %73 : vector<1x128xf32>
    %75 = vector.extract_strided_slice %52 {offsets = [0, 2], sizes = [1, 1], strides = [1, 1]} : vector<1x128xf32> to vector<1x1xf32>
    %76 = vector.extract_strided_slice %74 {offsets = [0, 2], sizes = [1, 1], strides = [1, 1]} : vector<1x128xf32> to vector<1x1xf32>
    %77 = arith.addf %75, %76 : vector<1x1xf32>
    %78 = vector.extract_strided_slice %13 {offsets = [1, 0], sizes = [1, 128], strides = [1, 1]} : vector<8x128xf32> to vector<1x128xf32>
    %79 = vector.broadcast %70 : vector<1x1xf32> to vector<1x128xf32>
    %80 = arith.mulf %79, %78 : vector<1x128xf32>
    %81 = arith.addf %62, %80 : vector<1x128xf32>
    %82 = vector.extract_strided_slice %14 {offsets = [1, 0], sizes = [1, 128], strides = [1, 1]} : vector<8x128xf32> to vector<1x128xf32>
    %83 = vector.broadcast %70 : vector<1x1xf32> to vector<1x128xf32>
    %84 = arith.mulf %83, %82 : vector<1x128xf32>
    %85 = arith.addf %66, %84 : vector<1x128xf32>
    %86 = vector.extract_strided_slice %15 {offsets = [1, 0], sizes = [1, 1], strides = [1, 1]} : vector<8x128xf32> to vector<1x1xf32>
    %87 = arith.mulf %70, %86 : vector<1x1xf32>
    %88 = arith.addf %77, %87 : vector<1x1xf32>
    %89 = math.tanh %88 : vector<1x1xf32>
    %90 = vector.extract_strided_slice %12 {offsets = [1, 0], sizes = [1, 128], strides = [1, 1]} : vector<8x128xf32> to vector<1x128xf32>
    %91 = vector.broadcast %70 : vector<1x1xf32> to vector<1x128xf32>
    %92 = arith.mulf %91, %90 : vector<1x128xf32>
    %93 = arith.addf %74, %92 : vector<1x128xf32>
    %94 = vector.extract_strided_slice %52 {offsets = [0, 3], sizes = [1, 1], strides = [1, 1]} : vector<1x128xf32> to vector<1x1xf32>
    %95 = vector.extract_strided_slice %93 {offsets = [0, 3], sizes = [1, 1], strides = [1, 1]} : vector<1x128xf32> to vector<1x1xf32>
    %96 = arith.addf %94, %95 : vector<1x1xf32>
    %97 = vector.extract_strided_slice %13 {offsets = [2, 0], sizes = [1, 128], strides = [1, 1]} : vector<8x128xf32> to vector<1x128xf32>
    %98 = vector.broadcast %89 : vector<1x1xf32> to vector<1x128xf32>
    %99 = arith.mulf %98, %97 : vector<1x128xf32>
    %100 = arith.addf %81, %99 : vector<1x128xf32>
    %101 = vector.extract_strided_slice %14 {offsets = [2, 0], sizes = [1, 128], strides = [1, 1]} : vector<8x128xf32> to vector<1x128xf32>
    %102 = vector.broadcast %89 : vector<1x1xf32> to vector<1x128xf32>
    %103 = arith.mulf %102, %101 : vector<1x128xf32>
    %104 = arith.addf %85, %103 : vector<1x128xf32>
    %105 = vector.extract_strided_slice %15 {offsets = [2, 0], sizes = [1, 1], strides = [1, 1]} : vector<8x128xf32> to vector<1x1xf32>
    %106 = arith.mulf %89, %105 : vector<1x1xf32>
    %107 = arith.addf %96, %106 : vector<1x1xf32>
    %108 = math.tanh %107 : vector<1x1xf32>
    %109 = vector.extract_strided_slice %12 {offsets = [2, 0], sizes = [1, 128], strides = [1, 1]} : vector<8x128xf32> to vector<1x128xf32>
    %110 = vector.broadcast %89 : vector<1x1xf32> to vector<1x128xf32>
    %111 = arith.mulf %110, %109 : vector<1x128xf32>
    %112 = arith.addf %93, %111 : vector<1x128xf32>
    %113 = vector.extract_strided_slice %52 {offsets = [0, 4], sizes = [1, 1], strides = [1, 1]} : vector<1x128xf32> to vector<1x1xf32>
    %114 = vector.extract_strided_slice %112 {offsets = [0, 4], sizes = [1, 1], strides = [1, 1]} : vector<1x128xf32> to vector<1x1xf32>
    %115 = arith.addf %113, %114 : vector<1x1xf32>
    %116 = vector.extract_strided_slice %13 {offsets = [3, 0], sizes = [1, 128], strides = [1, 1]} : vector<8x128xf32> to vector<1x128xf32>
    %117 = vector.broadcast %108 : vector<1x1xf32> to vector<1x128xf32>
    %118 = arith.mulf %117, %116 : vector<1x128xf32>
    %119 = arith.addf %100, %118 : vector<1x128xf32>
    %120 = vector.extract_strided_slice %14 {offsets = [3, 0], sizes = [1, 128], strides = [1, 1]} : vector<8x128xf32> to vector<1x128xf32>
    %121 = vector.broadcast %108 : vector<1x1xf32> to vector<1x128xf32>
    %122 = arith.mulf %121, %120 : vector<1x128xf32>
    %123 = arith.addf %104, %122 : vector<1x128xf32>
    %124 = vector.extract_strided_slice %15 {offsets = [3, 0], sizes = [1, 1], strides = [1, 1]} : vector<8x128xf32> to vector<1x1xf32>
    %125 = arith.mulf %108, %124 : vector<1x1xf32>
    %126 = arith.addf %115, %125 : vector<1x1xf32>
    %127 = math.tanh %126 : vector<1x1xf32>
    %128 = vector.extract_strided_slice %12 {offsets = [3, 0], sizes = [1, 128], strides = [1, 1]} : vector<8x128xf32> to vector<1x128xf32>
    %129 = vector.broadcast %108 : vector<1x1xf32> to vector<1x128xf32>
    %130 = arith.mulf %129, %128 : vector<1x128xf32>
    %131 = arith.addf %112, %130 : vector<1x128xf32>
    %132 = vector.extract_strided_slice %52 {offsets = [0, 5], sizes = [1, 1], strides = [1, 1]} : vector<1x128xf32> to vector<1x1xf32>
    %133 = vector.extract_strided_slice %131 {offsets = [0, 5], sizes = [1, 1], strides = [1, 1]} : vector<1x128xf32> to vector<1x1xf32>
    %134 = arith.addf %132, %133 : vector<1x1xf32>
    %135 = vector.extract_strided_slice %13 {offsets = [4, 0], sizes = [1, 128], strides = [1, 1]} : vector<8x128xf32> to vector<1x128xf32>
    %136 = vector.broadcast %127 : vector<1x1xf32> to vector<1x128xf32>
    %137 = arith.mulf %136, %135 : vector<1x128xf32>
    %138 = arith.addf %119, %137 : vector<1x128xf32>
    %139 = vector.extract_strided_slice %14 {offsets = [4, 0], sizes = [1, 128], strides = [1, 1]} : vector<8x128xf32> to vector<1x128xf32>
    %140 = vector.broadcast %127 : vector<1x1xf32> to vector<1x128xf32>
    %141 = arith.mulf %140, %139 : vector<1x128xf32>
    %142 = arith.addf %123, %141 : vector<1x128xf32>
    %143 = vector.extract_strided_slice %15 {offsets = [4, 0], sizes = [1, 1], strides = [1, 1]} : vector<8x128xf32> to vector<1x1xf32>
    %144 = arith.mulf %127, %143 : vector<1x1xf32>
    %145 = arith.addf %134, %144 : vector<1x1xf32>
    %146 = math.tanh %145 : vector<1x1xf32>
    %147 = vector.extract_strided_slice %12 {offsets = [4, 0], sizes = [1, 128], strides = [1, 1]} : vector<8x128xf32> to vector<1x128xf32>
    %148 = vector.broadcast %127 : vector<1x1xf32> to vector<1x128xf32>
    %149 = arith.mulf %148, %147 : vector<1x128xf32>
    %150 = arith.addf %131, %149 : vector<1x128xf32>
    %151 = vector.extract_strided_slice %52 {offsets = [0, 6], sizes = [1, 1], strides = [1, 1]} : vector<1x128xf32> to vector<1x1xf32>
    %152 = vector.extract_strided_slice %150 {offsets = [0, 6], sizes = [1, 1], strides = [1, 1]} : vector<1x128xf32> to vector<1x1xf32>
    %153 = arith.addf %151, %152 : vector<1x1xf32>
    %154 = vector.extract_strided_slice %13 {offsets = [5, 0], sizes = [1, 128], strides = [1, 1]} : vector<8x128xf32> to vector<1x128xf32>
    %155 = vector.broadcast %146 : vector<1x1xf32> to vector<1x128xf32>
    %156 = arith.mulf %155, %154 : vector<1x128xf32>
    %157 = arith.addf %138, %156 : vector<1x128xf32>
    %158 = vector.extract_strided_slice %14 {offsets = [5, 0], sizes = [1, 128], strides = [1, 1]} : vector<8x128xf32> to vector<1x128xf32>
    %159 = vector.broadcast %146 : vector<1x1xf32> to vector<1x128xf32>
    %160 = arith.mulf %159, %158 : vector<1x128xf32>
    %161 = arith.addf %142, %160 : vector<1x128xf32>
    %162 = vector.extract_strided_slice %15 {offsets = [5, 0], sizes = [1, 1], strides = [1, 1]} : vector<8x128xf32> to vector<1x1xf32>
    %163 = arith.mulf %146, %162 : vector<1x1xf32>
    %164 = arith.addf %153, %163 : vector<1x1xf32>
    %165 = math.tanh %164 : vector<1x1xf32>
    %166 = vector.extract_strided_slice %12 {offsets = [5, 0], sizes = [1, 128], strides = [1, 1]} : vector<8x128xf32> to vector<1x128xf32>
    %167 = vector.broadcast %146 : vector<1x1xf32> to vector<1x128xf32>
    %168 = arith.mulf %167, %166 : vector<1x128xf32>
    %169 = arith.addf %150, %168 : vector<1x128xf32>
    %170 = vector.extract_strided_slice %52 {offsets = [0, 7], sizes = [1, 1], strides = [1, 1]} : vector<1x128xf32> to vector<1x1xf32>
    %171 = vector.extract_strided_slice %169 {offsets = [0, 7], sizes = [1, 1], strides = [1, 1]} : vector<1x128xf32> to vector<1x1xf32>
    %172 = arith.addf %170, %171 : vector<1x1xf32>
    %173 = vector.extract_strided_slice %13 {offsets = [6, 0], sizes = [1, 128], strides = [1, 1]} : vector<8x128xf32> to vector<1x128xf32>
    %174 = vector.broadcast %165 : vector<1x1xf32> to vector<1x128xf32>
    %175 = arith.mulf %174, %173 : vector<1x128xf32>
    %176 = arith.addf %157, %175 : vector<1x128xf32>
    %177 = vector.extract_strided_slice %14 {offsets = [6, 0], sizes = [1, 128], strides = [1, 1]} : vector<8x128xf32> to vector<1x128xf32>
    %178 = vector.broadcast %165 : vector<1x1xf32> to vector<1x128xf32>
    %179 = arith.mulf %178, %177 : vector<1x128xf32>
    %180 = arith.addf %161, %179 : vector<1x128xf32>
    %181 = vector.extract_strided_slice %15 {offsets = [6, 0], sizes = [1, 1], strides = [1, 1]} : vector<8x128xf32> to vector<1x1xf32>
    %182 = arith.mulf %165, %181 : vector<1x1xf32>
    %183 = arith.addf %172, %182 : vector<1x1xf32>
    %184 = math.tanh %183 : vector<1x1xf32>
    %185 = vector.extract_strided_slice %13 {offsets = [7, 0], sizes = [1, 128], strides = [1, 1]} : vector<8x128xf32> to vector<1x128xf32>
    %186 = vector.broadcast %184 : vector<1x1xf32> to vector<1x128xf32>
    %187 = arith.mulf %186, %185 : vector<1x128xf32>
    %188 = arith.addf %176, %187 : vector<1x128xf32>
    %189 = vector.extract_strided_slice %14 {offsets = [7, 0], sizes = [1, 128], strides = [1, 1]} : vector<8x128xf32> to vector<1x128xf32>
    %190 = vector.broadcast %184 : vector<1x1xf32> to vector<1x128xf32>
    %191 = arith.mulf %190, %189 : vector<1x128xf32>
    %192 = arith.addf %180, %191 : vector<1x128xf32>
    %193 = vector.broadcast %19 : vector<8x1xf32> to vector<8x128xf32>
    %194 = arith.mulf %193, %7 : vector<8x128xf32>
    %cst_32 = arith.constant dense<0.000000e+00> : vector<128xf32>
    %195 = vector.multi_reduction <add>, %194, %cst_32 [0] : vector<8x128xf32> to vector<128xf32>
    %196 = vector.shape_cast %195 : vector<128xf32> to vector<1x128xf32>
    %197 = arith.addf %196, %188 : vector<1x128xf32>
    %198 = vector.broadcast %43 : vector<8x1xf32> to vector<8x128xf32>
    %199 = arith.mulf %198, %8 : vector<8x128xf32>
    %cst_33 = arith.constant dense<0.000000e+00> : vector<128xf32>
    %200 = vector.multi_reduction <add>, %199, %cst_33 [0] : vector<8x128xf32> to vector<128xf32>
    %201 = vector.shape_cast %200 : vector<128xf32> to vector<1x128xf32>
    %202 = arith.addf %197, %201 : vector<1x128xf32>
    %203 = vector.broadcast %202 : vector<1x128xf32> to vector<8x128xf32>
    %204 = arith.mulf %203, %4 : vector<8x128xf32>
    %cst_34 = arith.constant dense<0.000000e+00> : vector<8xf32>
    %205 = vector.multi_reduction <add>, %204, %cst_34 [1] : vector<8x128xf32> to vector<8xf32>
    %206 = vector.shape_cast %205 : vector<8xf32> to vector<8x1xf32>
    %207 = vector.broadcast %19 : vector<8x1xf32> to vector<8x128xf32>
    %208 = arith.mulf %207, %9 : vector<8x128xf32>
    %cst_35 = arith.constant dense<0.000000e+00> : vector<128xf32>
    %209 = vector.multi_reduction <add>, %208, %cst_35 [0] : vector<8x128xf32> to vector<128xf32>
    %210 = vector.shape_cast %209 : vector<128xf32> to vector<1x128xf32>
    %211 = arith.addf %210, %192 : vector<1x128xf32>
    %212 = vector.broadcast %43 : vector<8x1xf32> to vector<8x128xf32>
    %213 = arith.mulf %212, %10 : vector<8x128xf32>
    %cst_36 = arith.constant dense<0.000000e+00> : vector<128xf32>
    %214 = vector.multi_reduction <add>, %213, %cst_36 [0] : vector<8x128xf32> to vector<128xf32>
    %215 = vector.shape_cast %214 : vector<128xf32> to vector<1x128xf32>
    %216 = arith.addf %211, %215 : vector<1x128xf32>
    %cst_37 = arith.constant 2.000000e+01 : f32
    %217 = vector.broadcast %cst_37 : f32 to vector<1x128xf32>
    %218 = arith.mulf %217, %216 : vector<1x128xf32>
    %219 = arith.addf %218, %34 : vector<1x128xf32>
    %220 = arith.addf %219, %202 : vector<1x128xf32>
    %c0_38 = arith.constant 0 : index
    %c0_39 = arith.constant 0 : index
    %221 = vector.load %arg3[%c0_38, %c0_39] : memref<8x128xf32, #tpu.memory_space<vmem>>, vector<1x128xf32>
    tpu.vector_store %arg3[%c0_38, %c0_39], %220 {strides = array<i32>} : memref<8x128xf32, #tpu.memory_space<vmem>>, vector<1x128xf32>,
    %c1 = arith.constant 1 : index
    %c0_40 = arith.constant 0 : index
    %222 = vector.load %arg1[%c1, %c0_40] : memref<8x128xf32, #tpu.memory_space<vmem>>, vector<1x128xf32>
    %223 = vector.broadcast %34 : vector<1x128xf32> to vector<8x128xf32>
    %224 = arith.mulf %223, %0 : vector<8x128xf32>
    %cst_41 = arith.constant dense<0.000000e+00> : vector<8xf32>
    %225 = vector.multi_reduction <add>, %224, %cst_41 [1] : vector<8x128xf32> to vector<8xf32>
    %226 = vector.shape_cast %225 : vector<8xf32> to vector<8x1xf32>
    %227 = vector.broadcast %222 : vector<1x128xf32> to vector<8x128xf32>
    %228 = arith.mulf %227, %1 : vector<8x128xf32>
    %cst_42 = arith.constant dense<0.000000e+00> : vector<8xf32>
    %229 = vector.multi_reduction <add>, %228, %cst_42 [1] : vector<8x128xf32> to vector<8xf32>
    %230 = vector.shape_cast %229 : vector<8xf32> to vector<8x1xf32>
    %231 = arith.addf %226, %230 : vector<8x1xf32>
    %232 = vector.broadcast %231 : vector<8x1xf32> to vector<8x128xf32>
    %233 = arith.mulf %232, %11 : vector<8x128xf32>
    %cst_43 = arith.constant dense<0.000000e+00> : vector<128xf32>
    %234 = vector.multi_reduction <add>, %233, %cst_43 [0] : vector<8x128xf32> to vector<128xf32>
    %235 = vector.shape_cast %234 : vector<128xf32> to vector<1x128xf32>
    %236 = vector.broadcast %222 : vector<1x128xf32> to vector<8x128xf32>
    %237 = arith.mulf %236, %3 : vector<8x128xf32>
    %cst_44 = arith.constant dense<0.000000e+00> : vector<8xf32>
    %238 = vector.multi_reduction <add>, %237, %cst_44 [1] : vector<8x128xf32> to vector<8xf32>
    %239 = vector.shape_cast %238 : vector<8xf32> to vector<8x1xf32>
    %240 = vector.broadcast %34 : vector<1x128xf32> to vector<8x128xf32>
    %241 = arith.mulf %240, %2 : vector<8x128xf32>
    %cst_45 = arith.constant dense<0.000000e+00> : vector<8xf32>
    %242 = vector.multi_reduction <add>, %241, %cst_45 [1] : vector<8x128xf32> to vector<8xf32>
    %243 = vector.shape_cast %242 : vector<8xf32> to vector<8x1xf32>
    %244 = arith.subf %239, %243 : vector<8x1xf32>
    %245 = vector.broadcast %206 : vector<8x1xf32> to vector<8x128xf32>
    %246 = arith.mulf %245, %5 : vector<8x128xf32>
    %cst_46 = arith.constant dense<0.000000e+00> : vector<128xf32>
    %247 = vector.multi_reduction <add>, %246, %cst_46 [0] : vector<8x128xf32> to vector<128xf32>
    %248 = vector.shape_cast %247 : vector<128xf32> to vector<1x128xf32>
    %249 = vector.broadcast %244 : vector<8x1xf32> to vector<8x128xf32>
    %250 = arith.mulf %249, %6 : vector<8x128xf32>
    %cst_47 = arith.constant dense<0.000000e+00> : vector<128xf32>
    %251 = vector.multi_reduction <add>, %250, %cst_47 [0] : vector<8x128xf32> to vector<128xf32>
    %252 = vector.shape_cast %251 : vector<128xf32> to vector<1x128xf32>
    %253 = arith.addf %248, %252 : vector<1x128xf32>
    %cst_48 = arith.constant 0.000000e+00 : f32
    %254 = vector.broadcast %cst_48 : f32 to vector<1x128xf32>
    %cst_49 = arith.constant 0.000000e+00 : f32
    %255 = vector.broadcast %cst_49 : f32 to vector<1x128xf32>
    %cst_50 = arith.constant 0.000000e+00 : f32
    %256 = vector.broadcast %cst_50 : f32 to vector<1x128xf32>
    %257 = vector.extract_strided_slice %253 {offsets = [0, 0], sizes = [1, 1], strides = [1, 1]} : vector<1x128xf32> to vector<1x1xf32>
    %258 = math.tanh %257 : vector<1x1xf32>
    %259 = vector.extract_strided_slice %253 {offsets = [0, 1], sizes = [1, 1], strides = [1, 1]} : vector<1x128xf32> to vector<1x1xf32>
    %260 = vector.extract_strided_slice %13 {offsets = [0, 0], sizes = [1, 128], strides = [1, 1]} : vector<8x128xf32> to vector<1x128xf32>
    %261 = vector.broadcast %258 : vector<1x1xf32> to vector<1x128xf32>
    %262 = arith.mulf %261, %260 : vector<1x128xf32>
    %263 = arith.addf %255, %262 : vector<1x128xf32>
    %264 = vector.extract_strided_slice %14 {offsets = [0, 0], sizes = [1, 128], strides = [1, 1]} : vector<8x128xf32> to vector<1x128xf32>
    %265 = vector.broadcast %258 : vector<1x1xf32> to vector<1x128xf32>
    %266 = arith.mulf %265, %264 : vector<1x128xf32>
    %267 = arith.addf %256, %266 : vector<1x128xf32>
    %268 = vector.extract_strided_slice %15 {offsets = [0, 0], sizes = [1, 1], strides = [1, 1]} : vector<8x128xf32> to vector<1x1xf32>
    %269 = arith.mulf %258, %268 : vector<1x1xf32>
    %270 = arith.addf %259, %269 : vector<1x1xf32>
    %271 = math.tanh %270 : vector<1x1xf32>
    %272 = vector.extract_strided_slice %12 {offsets = [0, 0], sizes = [1, 128], strides = [1, 1]} : vector<8x128xf32> to vector<1x128xf32>
    %273 = vector.broadcast %258 : vector<1x1xf32> to vector<1x128xf32>
    %274 = arith.mulf %273, %272 : vector<1x128xf32>
    %275 = arith.addf %254, %274 : vector<1x128xf32>
    %276 = vector.extract_strided_slice %253 {offsets = [0, 2], sizes = [1, 1], strides = [1, 1]} : vector<1x128xf32> to vector<1x1xf32>
    %277 = vector.extract_strided_slice %275 {offsets = [0, 2], sizes = [1, 1], strides = [1, 1]} : vector<1x128xf32> to vector<1x1xf32>
    %278 = arith.addf %276, %277 : vector<1x1xf32>
    %279 = vector.extract_strided_slice %13 {offsets = [1, 0], sizes = [1, 128], strides = [1, 1]} : vector<8x128xf32> to vector<1x128xf32>
    %280 = vector.broadcast %271 : vector<1x1xf32> to vector<1x128xf32>
    %281 = arith.mulf %280, %279 : vector<1x128xf32>
    %282 = arith.addf %263, %281 : vector<1x128xf32>
    %283 = vector.extract_strided_slice %14 {offsets = [1, 0], sizes = [1, 128], strides = [1, 1]} : vector<8x128xf32> to vector<1x128xf32>
    %284 = vector.broadcast %271 : vector<1x1xf32> to vector<1x128xf32>
    %285 = arith.mulf %284, %283 : vector<1x128xf32>
    %286 = arith.addf %267, %285 : vector<1x128xf32>
    %287 = vector.extract_strided_slice %15 {offsets = [1, 0], sizes = [1, 1], strides = [1, 1]} : vector<8x128xf32> to vector<1x1xf32>
    %288 = arith.mulf %271, %287 : vector<1x1xf32>
    %289 = arith.addf %278, %288 : vector<1x1xf32>
    %290 = math.tanh %289 : vector<1x1xf32>
    %291 = vector.extract_strided_slice %12 {offsets = [1, 0], sizes = [1, 128], strides = [1, 1]} : vector<8x128xf32> to vector<1x128xf32>
    %292 = vector.broadcast %271 : vector<1x1xf32> to vector<1x128xf32>
    %293 = arith.mulf %292, %291 : vector<1x128xf32>
    %294 = arith.addf %275, %293 : vector<1x128xf32>
    %295 = vector.extract_strided_slice %253 {offsets = [0, 3], sizes = [1, 1], strides = [1, 1]} : vector<1x128xf32> to vector<1x1xf32>
    %296 = vector.extract_strided_slice %294 {offsets = [0, 3], sizes = [1, 1], strides = [1, 1]} : vector<1x128xf32> to vector<1x1xf32>
    %297 = arith.addf %295, %296 : vector<1x1xf32>
    %298 = vector.extract_strided_slice %13 {offsets = [2, 0], sizes = [1, 128], strides = [1, 1]} : vector<8x128xf32> to vector<1x128xf32>
    %299 = vector.broadcast %290 : vector<1x1xf32> to vector<1x128xf32>
    %300 = arith.mulf %299, %298 : vector<1x128xf32>
    %301 = arith.addf %282, %300 : vector<1x128xf32>
    %302 = vector.extract_strided_slice %14 {offsets = [2, 0], sizes = [1, 128], strides = [1, 1]} : vector<8x128xf32> to vector<1x128xf32>
    %303 = vector.broadcast %290 : vector<1x1xf32> to vector<1x128xf32>
    %304 = arith.mulf %303, %302 : vector<1x128xf32>
    %305 = arith.addf %286, %304 : vector<1x128xf32>
    %306 = vector.extract_strided_slice %15 {offsets = [2, 0], sizes = [1, 1], strides = [1, 1]} : vector<8x128xf32> to vector<1x1xf32>
    %307 = arith.mulf %290, %306 : vector<1x1xf32>
    %308 = arith.addf %297, %307 : vector<1x1xf32>
    %309 = math.tanh %308 : vector<1x1xf32>
    %310 = vector.extract_strided_slice %12 {offsets = [2, 0], sizes = [1, 128], strides = [1, 1]} : vector<8x128xf32> to vector<1x128xf32>
    %311 = vector.broadcast %290 : vector<1x1xf32> to vector<1x128xf32>
    %312 = arith.mulf %311, %310 : vector<1x128xf32>
    %313 = arith.addf %294, %312 : vector<1x128xf32>
    %314 = vector.extract_strided_slice %253 {offsets = [0, 4], sizes = [1, 1], strides = [1, 1]} : vector<1x128xf32> to vector<1x1xf32>
    %315 = vector.extract_strided_slice %313 {offsets = [0, 4], sizes = [1, 1], strides = [1, 1]} : vector<1x128xf32> to vector<1x1xf32>
    %316 = arith.addf %314, %315 : vector<1x1xf32>
    %317 = vector.extract_strided_slice %13 {offsets = [3, 0], sizes = [1, 128], strides = [1, 1]} : vector<8x128xf32> to vector<1x128xf32>
    %318 = vector.broadcast %309 : vector<1x1xf32> to vector<1x128xf32>
    %319 = arith.mulf %318, %317 : vector<1x128xf32>
    %320 = arith.addf %301, %319 : vector<1x128xf32>
    %321 = vector.extract_strided_slice %14 {offsets = [3, 0], sizes = [1, 128], strides = [1, 1]} : vector<8x128xf32> to vector<1x128xf32>
    %322 = vector.broadcast %309 : vector<1x1xf32> to vector<1x128xf32>
    %323 = arith.mulf %322, %321 : vector<1x128xf32>
    %324 = arith.addf %305, %323 : vector<1x128xf32>
    %325 = vector.extract_strided_slice %15 {offsets = [3, 0], sizes = [1, 1], strides = [1, 1]} : vector<8x128xf32> to vector<1x1xf32>
    %326 = arith.mulf %309, %325 : vector<1x1xf32>
    %327 = arith.addf %316, %326 : vector<1x1xf32>
    %328 = math.tanh %327 : vector<1x1xf32>
    %329 = vector.extract_strided_slice %12 {offsets = [3, 0], sizes = [1, 128], strides = [1, 1]} : vector<8x128xf32> to vector<1x128xf32>
    %330 = vector.broadcast %309 : vector<1x1xf32> to vector<1x128xf32>
    %331 = arith.mulf %330, %329 : vector<1x128xf32>
    %332 = arith.addf %313, %331 : vector<1x128xf32>
    %333 = vector.extract_strided_slice %253 {offsets = [0, 5], sizes = [1, 1], strides = [1, 1]} : vector<1x128xf32> to vector<1x1xf32>
    %334 = vector.extract_strided_slice %332 {offsets = [0, 5], sizes = [1, 1], strides = [1, 1]} : vector<1x128xf32> to vector<1x1xf32>
    %335 = arith.addf %333, %334 : vector<1x1xf32>
    %336 = vector.extract_strided_slice %13 {offsets = [4, 0], sizes = [1, 128], strides = [1, 1]} : vector<8x128xf32> to vector<1x128xf32>
    %337 = vector.broadcast %328 : vector<1x1xf32> to vector<1x128xf32>
    %338 = arith.mulf %337, %336 : vector<1x128xf32>
    %339 = arith.addf %320, %338 : vector<1x128xf32>
    %340 = vector.extract_strided_slice %14 {offsets = [4, 0], sizes = [1, 128], strides = [1, 1]} : vector<8x128xf32> to vector<1x128xf32>
    %341 = vector.broadcast %328 : vector<1x1xf32> to vector<1x128xf32>
    %342 = arith.mulf %341, %340 : vector<1x128xf32>
    %343 = arith.addf %324, %342 : vector<1x128xf32>
    %344 = vector.extract_strided_slice %15 {offsets = [4, 0], sizes = [1, 1], strides = [1, 1]} : vector<8x128xf32> to vector<1x1xf32>
    %345 = arith.mulf %328, %344 : vector<1x1xf32>
    %346 = arith.addf %335, %345 : vector<1x1xf32>
    %347 = math.tanh %346 : vector<1x1xf32>
    %348 = vector.extract_strided_slice %12 {offsets = [4, 0], sizes = [1, 128], strides = [1, 1]} : vector<8x128xf32> to vector<1x128xf32>
    %349 = vector.broadcast %328 : vector<1x1xf32> to vector<1x128xf32>
    %350 = arith.mulf %349, %348 : vector<1x128xf32>
    %351 = arith.addf %332, %350 : vector<1x128xf32>
    %352 = vector.extract_strided_slice %253 {offsets = [0, 6], sizes = [1, 1], strides = [1, 1]} : vector<1x128xf32> to vector<1x1xf32>
    %353 = vector.extract_strided_slice %351 {offsets = [0, 6], sizes = [1, 1], strides = [1, 1]} : vector<1x128xf32> to vector<1x1xf32>
    %354 = arith.addf %352, %353 : vector<1x1xf32>
    %355 = vector.extract_strided_slice %13 {offsets = [5, 0], sizes = [1, 128], strides = [1, 1]} : vector<8x128xf32> to vector<1x128xf32>
    %356 = vector.broadcast %347 : vector<1x1xf32> to vector<1x128xf32>
    %357 = arith.mulf %356, %355 : vector<1x128xf32>
    %358 = arith.addf %339, %357 : vector<1x128xf32>
    %359 = vector.extract_strided_slice %14 {offsets = [5, 0], sizes = [1, 128], strides = [1, 1]} : vector<8x128xf32> to vector<1x128xf32>
    %360 = vector.broadcast %347 : vector<1x1xf32> to vector<1x128xf32>
    %361 = arith.mulf %360, %359 : vector<1x128xf32>
    %362 = arith.addf %343, %361 : vector<1x128xf32>
    %363 = vector.extract_strided_slice %15 {offsets = [5, 0], sizes = [1, 1], strides = [1, 1]} : vector<8x128xf32> to vector<1x1xf32>
    %364 = arith.mulf %347, %363 : vector<1x1xf32>
    %365 = arith.addf %354, %364 : vector<1x1xf32>
    %366 = math.tanh %365 : vector<1x1xf32>
    %367 = vector.extract_strided_slice %12 {offsets = [5, 0], sizes = [1, 128], strides = [1, 1]} : vector<8x128xf32> to vector<1x128xf32>
    %368 = vector.broadcast %347 : vector<1x1xf32> to vector<1x128xf32>
    %369 = arith.mulf %368, %367 : vector<1x128xf32>
    %370 = arith.addf %351, %369 : vector<1x128xf32>
    %371 = vector.extract_strided_slice %253 {offsets = [0, 7], sizes = [1, 1], strides = [1, 1]} : vector<1x128xf32> to vector<1x1xf32>
    %372 = vector.extract_strided_slice %370 {offsets = [0, 7], sizes = [1, 1], strides = [1, 1]} : vector<1x128xf32> to vector<1x1xf32>
    %373 = arith.addf %371, %372 : vector<1x1xf32>
    %374 = vector.extract_strided_slice %13 {offsets = [6, 0], sizes = [1, 128], strides = [1, 1]} : vector<8x128xf32> to vector<1x128xf32>
    %375 = vector.broadcast %366 : vector<1x1xf32> to vector<1x128xf32>
    %376 = arith.mulf %375, %374 : vector<1x128xf32>
    %377 = arith.addf %358, %376 : vector<1x128xf32>
    %378 = vector.extract_strided_slice %14 {offsets = [6, 0], sizes = [1, 128], strides = [1, 1]} : vector<8x128xf32> to vector<1x128xf32>
    %379 = vector.broadcast %366 : vector<1x1xf32> to vector<1x128xf32>
    %380 = arith.mulf %379, %378 : vector<1x128xf32>
    %381 = arith.addf %362, %380 : vector<1x128xf32>
    %382 = vector.extract_strided_slice %15 {offsets = [6, 0], sizes = [1, 1], strides = [1, 1]} : vector<8x128xf32> to vector<1x1xf32>
    %383 = arith.mulf %366, %382 : vector<1x1xf32>
    %384 = arith.addf %373, %383 : vector<1x1xf32>
    %385 = math.tanh %384 : vector<1x1xf32>
    %386 = vector.extract_strided_slice %13 {offsets = [7, 0], sizes = [1, 128], strides = [1, 1]} : vector<8x128xf32> to vector<1x128xf32>
    %387 = vector.broadcast %385 : vector<1x1xf32> to vector<1x128xf32>
    %388 = arith.mulf %387, %386 : vector<1x128xf32>
    %389 = arith.addf %377, %388 : vector<1x128xf32>
    %390 = vector.extract_strided_slice %14 {offsets = [7, 0], sizes = [1, 128], strides = [1, 1]} : vector<8x128xf32> to vector<1x128xf32>
    %391 = vector.broadcast %385 : vector<1x1xf32> to vector<1x128xf32>
    %392 = arith.mulf %391, %390 : vector<1x128xf32>
    %393 = arith.addf %381, %392 : vector<1x128xf32>
    %394 = vector.broadcast %206 : vector<8x1xf32> to vector<8x128xf32>
    %395 = arith.mulf %394, %7 : vector<8x128xf32>
    %cst_51 = arith.constant dense<0.000000e+00> : vector<128xf32>
    %396 = vector.multi_reduction <add>, %395, %cst_51 [0] : vector<8x128xf32> to vector<128xf32>
    %397 = vector.shape_cast %396 : vector<128xf32> to vector<1x128xf32>
    %398 = arith.addf %397, %389 : vector<1x128xf32>
    %399 = vector.broadcast %244 : vector<8x1xf32> to vector<8x128xf32>
    %400 = arith.mulf %399, %8 : vector<8x128xf32>
    %cst_52 = arith.constant dense<0.000000e+00> : vector<128xf32>
    %401 = vector.multi_reduction <add>, %400, %cst_52 [0] : vector<8x128xf32> to vector<128xf32>
    %402 = vector.shape_cast %401 : vector<128xf32> to vector<1x128xf32>
    %403 = arith.addf %398, %402 : vector<1x128xf32>
    %404 = vector.broadcast %403 : vector<1x128xf32> to vector<8x128xf32>
    %405 = arith.mulf %404, %4 : vector<8x128xf32>
    %cst_53 = arith.constant dense<0.000000e+00> : vector<8xf32>
    %406 = vector.multi_reduction <add>, %405, %cst_53 [1] : vector<8x128xf32> to vector<8xf32>
    %407 = vector.shape_cast %406 : vector<8xf32> to vector<8x1xf32>
    %408 = vector.broadcast %206 : vector<8x1xf32> to vector<8x128xf32>
    %409 = arith.mulf %408, %9 : vector<8x128xf32>
    %cst_54 = arith.constant dense<0.000000e+00> : vector<128xf32>
    %410 = vector.multi_reduction <add>, %409, %cst_54 [0] : vector<8x128xf32> to vector<128xf32>
    %411 = vector.shape_cast %410 : vector<128xf32> to vector<1x128xf32>
    %412 = arith.addf %411, %393 : vector<1x128xf32>
    %413 = vector.broadcast %244 : vector<8x1xf32> to vector<8x128xf32>
    %414 = arith.mulf %413, %10 : vector<8x128xf32>
    %cst_55 = arith.constant dense<0.000000e+00> : vector<128xf32>
    %415 = vector.multi_reduction <add>, %414, %cst_55 [0] : vector<8x128xf32> to vector<128xf32>
    %416 = vector.shape_cast %415 : vector<128xf32> to vector<1x128xf32>
    %417 = arith.addf %412, %416 : vector<1x128xf32>
    %cst_56 = arith.constant 2.000000e+01 : f32
    %418 = vector.broadcast %cst_56 : f32 to vector<1x128xf32>
    %419 = arith.mulf %418, %417 : vector<1x128xf32>
    %420 = arith.addf %419, %235 : vector<1x128xf32>
    %421 = arith.addf %420, %403 : vector<1x128xf32>
    %c1_57 = arith.constant 1 : index
    %c0_58 = arith.constant 0 : index
    %422 = vector.load %arg3[%c1_57, %c0_58] : memref<8x128xf32, #tpu.memory_space<vmem>>, vector<1x128xf32>
    tpu.vector_store %arg3[%c1_57, %c0_58], %421 {strides = array<i32>} : memref<8x128xf32, #tpu.memory_space<vmem>>, vector<1x128xf32>,
    %c2 = arith.constant 2 : index
    %c0_59 = arith.constant 0 : index
    %423 = vector.load %arg1[%c2, %c0_59] : memref<8x128xf32, #tpu.memory_space<vmem>>, vector<1x128xf32>
    %424 = vector.broadcast %235 : vector<1x128xf32> to vector<8x128xf32>
    %425 = arith.mulf %424, %0 : vector<8x128xf32>
    %cst_60 = arith.constant dense<0.000000e+00> : vector<8xf32>
    %426 = vector.multi_reduction <add>, %425, %cst_60 [1] : vector<8x128xf32> to vector<8xf32>
    %427 = vector.shape_cast %426 : vector<8xf32> to vector<8x1xf32>
    %428 = vector.broadcast %423 : vector<1x128xf32> to vector<8x128xf32>
    %429 = arith.mulf %428, %1 : vector<8x128xf32>
    %cst_61 = arith.constant dense<0.000000e+00> : vector<8xf32>
    %430 = vector.multi_reduction <add>, %429, %cst_61 [1] : vector<8x128xf32> to vector<8xf32>
    %431 = vector.shape_cast %430 : vector<8xf32> to vector<8x1xf32>
    %432 = arith.addf %427, %431 : vector<8x1xf32>
    %433 = vector.broadcast %432 : vector<8x1xf32> to vector<8x128xf32>
    %434 = arith.mulf %433, %11 : vector<8x128xf32>
    %cst_62 = arith.constant dense<0.000000e+00> : vector<128xf32>
    %435 = vector.multi_reduction <add>, %434, %cst_62 [0] : vector<8x128xf32> to vector<128xf32>
    %436 = vector.shape_cast %435 : vector<128xf32> to vector<1x128xf32>
    %437 = vector.broadcast %423 : vector<1x128xf32> to vector<8x128xf32>
    %438 = arith.mulf %437, %3 : vector<8x128xf32>
    %cst_63 = arith.constant dense<0.000000e+00> : vector<8xf32>
    %439 = vector.multi_reduction <add>, %438, %cst_63 [1] : vector<8x128xf32> to vector<8xf32>
    %440 = vector.shape_cast %439 : vector<8xf32> to vector<8x1xf32>
    %441 = vector.broadcast %235 : vector<1x128xf32> to vector<8x128xf32>
    %442 = arith.mulf %441, %2 : vector<8x128xf32>
    %cst_64 = arith.constant dense<0.000000e+00> : vector<8xf32>
    %443 = vector.multi_reduction <add>, %442, %cst_64 [1] : vector<8x128xf32> to vector<8xf32>
    %444 = vector.shape_cast %443 : vector<8xf32> to vector<8x1xf32>
    %445 = arith.subf %440, %444 : vector<8x1xf32>
    %446 = vector.broadcast %407 : vector<8x1xf32> to vector<8x128xf32>
    %447 = arith.mulf %446, %5 : vector<8x128xf32>
    %cst_65 = arith.constant dense<0.000000e+00> : vector<128xf32>
    %448 = vector.multi_reduction <add>, %447, %cst_65 [0] : vector<8x128xf32> to vector<128xf32>
    %449 = vector.shape_cast %448 : vector<128xf32> to vector<1x128xf32>
    %450 = vector.broadcast %445 : vector<8x1xf32> to vector<8x128xf32>
    %451 = arith.mulf %450, %6 : vector<8x128xf32>
    %cst_66 = arith.constant dense<0.000000e+00> : vector<128xf32>
    %452 = vector.multi_reduction <add>, %451, %cst_66 [0] : vector<8x128xf32> to vector<128xf32>
    %453 = vector.shape_cast %452 : vector<128xf32> to vector<1x128xf32>
    %454 = arith.addf %449, %453 : vector<1x128xf32>
    %cst_67 = arith.constant 0.000000e+00 : f32
    %455 = vector.broadcast %cst_67 : f32 to vector<1x128xf32>
    %cst_68 = arith.constant 0.000000e+00 : f32
    %456 = vector.broadcast %cst_68 : f32 to vector<1x128xf32>
    %cst_69 = arith.constant 0.000000e+00 : f32
    %457 = vector.broadcast %cst_69 : f32 to vector<1x128xf32>
    %458 = vector.extract_strided_slice %454 {offsets = [0, 0], sizes = [1, 1], strides = [1, 1]} : vector<1x128xf32> to vector<1x1xf32>
    %459 = math.tanh %458 : vector<1x1xf32>
    %460 = vector.extract_strided_slice %454 {offsets = [0, 1], sizes = [1, 1], strides = [1, 1]} : vector<1x128xf32> to vector<1x1xf32>
    %461 = vector.extract_strided_slice %13 {offsets = [0, 0], sizes = [1, 128], strides = [1, 1]} : vector<8x128xf32> to vector<1x128xf32>
    %462 = vector.broadcast %459 : vector<1x1xf32> to vector<1x128xf32>
    %463 = arith.mulf %462, %461 : vector<1x128xf32>
    %464 = arith.addf %456, %463 : vector<1x128xf32>
    %465 = vector.extract_strided_slice %14 {offsets = [0, 0], sizes = [1, 128], strides = [1, 1]} : vector<8x128xf32> to vector<1x128xf32>
    %466 = vector.broadcast %459 : vector<1x1xf32> to vector<1x128xf32>
    %467 = arith.mulf %466, %465 : vector<1x128xf32>
    %468 = arith.addf %457, %467 : vector<1x128xf32>
    %469 = vector.extract_strided_slice %15 {offsets = [0, 0], sizes = [1, 1], strides = [1, 1]} : vector<8x128xf32> to vector<1x1xf32>
    %470 = arith.mulf %459, %469 : vector<1x1xf32>
    %471 = arith.addf %460, %470 : vector<1x1xf32>
    %472 = math.tanh %471 : vector<1x1xf32>
    %473 = vector.extract_strided_slice %12 {offsets = [0, 0], sizes = [1, 128], strides = [1, 1]} : vector<8x128xf32> to vector<1x128xf32>
    %474 = vector.broadcast %459 : vector<1x1xf32> to vector<1x128xf32>
    %475 = arith.mulf %474, %473 : vector<1x128xf32>
    %476 = arith.addf %455, %475 : vector<1x128xf32>
    %477 = vector.extract_strided_slice %454 {offsets = [0, 2], sizes = [1, 1], strides = [1, 1]} : vector<1x128xf32> to vector<1x1xf32>
    %478 = vector.extract_strided_slice %476 {offsets = [0, 2], sizes = [1, 1], strides = [1, 1]} : vector<1x128xf32> to vector<1x1xf32>
    %479 = arith.addf %477, %478 : vector<1x1xf32>
    %480 = vector.extract_strided_slice %13 {offsets = [1, 0], sizes = [1, 128], strides = [1, 1]} : vector<8x128xf32> to vector<1x128xf32>
    %481 = vector.broadcast %472 : vector<1x1xf32> to vector<1x128xf32>
    %482 = arith.mulf %481, %480 : vector<1x128xf32>
    %483 = arith.addf %464, %482 : vector<1x128xf32>
    %484 = vector.extract_strided_slice %14 {offsets = [1, 0], sizes = [1, 128], strides = [1, 1]} : vector<8x128xf32> to vector<1x128xf32>
    %485 = vector.broadcast %472 : vector<1x1xf32> to vector<1x128xf32>
    %486 = arith.mulf %485, %484 : vector<1x128xf32>
    %487 = arith.addf %468, %486 : vector<1x128xf32>
    %488 = vector.extract_strided_slice %15 {offsets = [1, 0], sizes = [1, 1], strides = [1, 1]} : vector<8x128xf32> to vector<1x1xf32>
    %489 = arith.mulf %472, %488 : vector<1x1xf32>
    %490 = arith.addf %479, %489 : vector<1x1xf32>
    %491 = math.tanh %490 : vector<1x1xf32>
    %492 = vector.extract_strided_slice %12 {offsets = [1, 0], sizes = [1, 128], strides = [1, 1]} : vector<8x128xf32> to vector<1x128xf32>
    %493 = vector.broadcast %472 : vector<1x1xf32> to vector<1x128xf32>
    %494 = arith.mulf %493, %492 : vector<1x128xf32>
    %495 = arith.addf %476, %494 : vector<1x128xf32>
    %496 = vector.extract_strided_slice %454 {offsets = [0, 3], sizes = [1, 1], strides = [1, 1]} : vector<1x128xf32> to vector<1x1xf32>
    %497 = vector.extract_strided_slice %495 {offsets = [0, 3], sizes = [1, 1], strides = [1, 1]} : vector<1x128xf32> to vector<1x1xf32>
    %498 = arith.addf %496, %497 : vector<1x1xf32>
    %499 = vector.extract_strided_slice %13 {offsets = [2, 0], sizes = [1, 128], strides = [1, 1]} : vector<8x128xf32> to vector<1x128xf32>
    %500 = vector.broadcast %491 : vector<1x1xf32> to vector<1x128xf32>
    %501 = arith.mulf %500, %499 : vector<1x128xf32>
    %502 = arith.addf %483, %501 : vector<1x128xf32>
    %503 = vector.extract_strided_slice %14 {offsets = [2, 0], sizes = [1, 128], strides = [1, 1]} : vector<8x128xf32> to vector<1x128xf32>
    %504 = vector.broadcast %491 : vector<1x1xf32> to vector<1x128xf32>
    %505 = arith.mulf %504, %503 : vector<1x128xf32>
    %506 = arith.addf %487, %505 : vector<1x128xf32>
    %507 = vector.extract_strided_slice %15 {offsets = [2, 0], sizes = [1, 1], strides = [1, 1]} : vector<8x128xf32> to vector<1x1xf32>
    %508 = arith.mulf %491, %507 : vector<1x1xf32>
    %509 = arith.addf %498, %508 : vector<1x1xf32>
    %510 = math.tanh %509 : vector<1x1xf32>
    %511 = vector.extract_strided_slice %12 {offsets = [2, 0], sizes = [1, 128], strides = [1, 1]} : vector<8x128xf32> to vector<1x128xf32>
    %512 = vector.broadcast %491 : vector<1x1xf32> to vector<1x128xf32>
    %513 = arith.mulf %512, %511 : vector<1x128xf32>
    %514 = arith.addf %495, %513 : vector<1x128xf32>
    %515 = vector.extract_strided_slice %454 {offsets = [0, 4], sizes = [1, 1], strides = [1, 1]} : vector<1x128xf32> to vector<1x1xf32>
    %516 = vector.extract_strided_slice %514 {offsets = [0, 4], sizes = [1, 1], strides = [1, 1]} : vector<1x128xf32> to vector<1x1xf32>
    %517 = arith.addf %515, %516 : vector<1x1xf32>
    %518 = vector.extract_strided_slice %13 {offsets = [3, 0], sizes = [1, 128], strides = [1, 1]} : vector<8x128xf32> to vector<1x128xf32>
    %519 = vector.broadcast %510 : vector<1x1xf32> to vector<1x128xf32>
    %520 = arith.mulf %519, %518 : vector<1x128xf32>
    %521 = arith.addf %502, %520 : vector<1x128xf32>
    %522 = vector.extract_strided_slice %14 {offsets = [3, 0], sizes = [1, 128], strides = [1, 1]} : vector<8x128xf32> to vector<1x128xf32>
    %523 = vector.broadcast %510 : vector<1x1xf32> to vector<1x128xf32>
    %524 = arith.mulf %523, %522 : vector<1x128xf32>
    %525 = arith.addf %506, %524 : vector<1x128xf32>
    %526 = vector.extract_strided_slice %15 {offsets = [3, 0], sizes = [1, 1], strides = [1, 1]} : vector<8x128xf32> to vector<1x1xf32>
    %527 = arith.mulf %510, %526 : vector<1x1xf32>
    %528 = arith.addf %517, %527 : vector<1x1xf32>
    %529 = math.tanh %528 : vector<1x1xf32>
    %530 = vector.extract_strided_slice %12 {offsets = [3, 0], sizes = [1, 128], strides = [1, 1]} : vector<8x128xf32> to vector<1x128xf32>
    %531 = vector.broadcast %510 : vector<1x1xf32> to vector<1x128xf32>
    %532 = arith.mulf %531, %530 : vector<1x128xf32>
    %533 = arith.addf %514, %532 : vector<1x128xf32>
    %534 = vector.extract_strided_slice %454 {offsets = [0, 5], sizes = [1, 1], strides = [1, 1]} : vector<1x128xf32> to vector<1x1xf32>
    %535 = vector.extract_strided_slice %533 {offsets = [0, 5], sizes = [1, 1], strides = [1, 1]} : vector<1x128xf32> to vector<1x1xf32>
    %536 = arith.addf %534, %535 : vector<1x1xf32>
    %537 = vector.extract_strided_slice %13 {offsets = [4, 0], sizes = [1, 128], strides = [1, 1]} : vector<8x128xf32> to vector<1x128xf32>
    %538 = vector.broadcast %529 : vector<1x1xf32> to vector<1x128xf32>
    %539 = arith.mulf %538, %537 : vector<1x128xf32>
    %540 = arith.addf %521, %539 : vector<1x128xf32>
    %541 = vector.extract_strided_slice %14 {offsets = [4, 0], sizes = [1, 128], strides = [1, 1]} : vector<8x128xf32> to vector<1x128xf32>
    %542 = vector.broadcast %529 : vector<1x1xf32> to vector<1x128xf32>
    %543 = arith.mulf %542, %541 : vector<1x128xf32>
    %544 = arith.addf %525, %543 : vector<1x128xf32>
    %545 = vector.extract_strided_slice %15 {offsets = [4, 0], sizes = [1, 1], strides = [1, 1]} : vector<8x128xf32> to vector<1x1xf32>
    %546 = arith.mulf %529, %545 : vector<1x1xf32>
    %547 = arith.addf %536, %546 : vector<1x1xf32>
    %548 = math.tanh %547 : vector<1x1xf32>
    %549 = vector.extract_strided_slice %12 {offsets = [4, 0], sizes = [1, 128], strides = [1, 1]} : vector<8x128xf32> to vector<1x128xf32>
    %550 = vector.broadcast %529 : vector<1x1xf32> to vector<1x128xf32>
    %551 = arith.mulf %550, %549 : vector<1x128xf32>
    %552 = arith.addf %533, %551 : vector<1x128xf32>
    %553 = vector.extract_strided_slice %454 {offsets = [0, 6], sizes = [1, 1], strides = [1, 1]} : vector<1x128xf32> to vector<1x1xf32>
    %554 = vector.extract_strided_slice %552 {offsets = [0, 6], sizes = [1, 1], strides = [1, 1]} : vector<1x128xf32> to vector<1x1xf32>
    %555 = arith.addf %553, %554 : vector<1x1xf32>
    %556 = vector.extract_strided_slice %13 {offsets = [5, 0], sizes = [1, 128], strides = [1, 1]} : vector<8x128xf32> to vector<1x128xf32>
    %557 = vector.broadcast %548 : vector<1x1xf32> to vector<1x128xf32>
    %558 = arith.mulf %557, %556 : vector<1x128xf32>
    %559 = arith.addf %540, %558 : vector<1x128xf32>
    %560 = vector.extract_strided_slice %14 {offsets = [5, 0], sizes = [1, 128], strides = [1, 1]} : vector<8x128xf32> to vector<1x128xf32>
    %561 = vector.broadcast %548 : vector<1x1xf32> to vector<1x128xf32>
    %562 = arith.mulf %561, %560 : vector<1x128xf32>
    %563 = arith.addf %544, %562 : vector<1x128xf32>
    %564 = vector.extract_strided_slice %15 {offsets = [5, 0], sizes = [1, 1], strides = [1, 1]} : vector<8x128xf32> to vector<1x1xf32>
    %565 = arith.mulf %548, %564 : vector<1x1xf32>
    %566 = arith.addf %555, %565 : vector<1x1xf32>
    %567 = math.tanh %566 : vector<1x1xf32>
    %568 = vector.extract_strided_slice %12 {offsets = [5, 0], sizes = [1, 128], strides = [1, 1]} : vector<8x128xf32> to vector<1x128xf32>
    %569 = vector.broadcast %548 : vector<1x1xf32> to vector<1x128xf32>
    %570 = arith.mulf %569, %568 : vector<1x128xf32>
    %571 = arith.addf %552, %570 : vector<1x128xf32>
    %572 = vector.extract_strided_slice %454 {offsets = [0, 7], sizes = [1, 1], strides = [1, 1]} : vector<1x128xf32> to vector<1x1xf32>
    %573 = vector.extract_strided_slice %571 {offsets = [0, 7], sizes = [1, 1], strides = [1, 1]} : vector<1x128xf32> to vector<1x1xf32>
    %574 = arith.addf %572, %573 : vector<1x1xf32>
    %575 = vector.extract_strided_slice %13 {offsets = [6, 0], sizes = [1, 128], strides = [1, 1]} : vector<8x128xf32> to vector<1x128xf32>
    %576 = vector.broadcast %567 : vector<1x1xf32> to vector<1x128xf32>
    %577 = arith.mulf %576, %575 : vector<1x128xf32>
    %578 = arith.addf %559, %577 : vector<1x128xf32>
    %579 = vector.extract_strided_slice %14 {offsets = [6, 0], sizes = [1, 128], strides = [1, 1]} : vector<8x128xf32> to vector<1x128xf32>
    %580 = vector.broadcast %567 : vector<1x1xf32> to vector<1x128xf32>
    %581 = arith.mulf %580, %579 : vector<1x128xf32>
    %582 = arith.addf %563, %581 : vector<1x128xf32>
    %583 = vector.extract_strided_slice %15 {offsets = [6, 0], sizes = [1, 1], strides = [1, 1]} : vector<8x128xf32> to vector<1x1xf32>
    %584 = arith.mulf %567, %583 : vector<1x1xf32>
    %585 = arith.addf %574, %584 : vector<1x1xf32>
    %586 = math.tanh %585 : vector<1x1xf32>
    %587 = vector.extract_strided_slice %13 {offsets = [7, 0], sizes = [1, 128], strides = [1, 1]} : vector<8x128xf32> to vector<1x128xf32>
    %588 = vector.broadcast %586 : vector<1x1xf32> to vector<1x128xf32>
    %589 = arith.mulf %588, %587 : vector<1x128xf32>
    %590 = arith.addf %578, %589 : vector<1x128xf32>
    %591 = vector.extract_strided_slice %14 {offsets = [7, 0], sizes = [1, 128], strides = [1, 1]} : vector<8x128xf32> to vector<1x128xf32>
    %592 = vector.broadcast %586 : vector<1x1xf32> to vector<1x128xf32>
    %593 = arith.mulf %592, %591 : vector<1x128xf32>
    %594 = arith.addf %582, %593 : vector<1x128xf32>
    %595 = vector.broadcast %407 : vector<8x1xf32> to vector<8x128xf32>
    %596 = arith.mulf %595, %7 : vector<8x128xf32>
    %cst_70 = arith.constant dense<0.000000e+00> : vector<128xf32>
    %597 = vector.multi_reduction <add>, %596, %cst_70 [0] : vector<8x128xf32> to vector<128xf32>
    %598 = vector.shape_cast %597 : vector<128xf32> to vector<1x128xf32>
    %599 = arith.addf %598, %590 : vector<1x128xf32>
    %600 = vector.broadcast %445 : vector<8x1xf32> to vector<8x128xf32>
    %601 = arith.mulf %600, %8 : vector<8x128xf32>
    %cst_71 = arith.constant dense<0.000000e+00> : vector<128xf32>
    %602 = vector.multi_reduction <add>, %601, %cst_71 [0] : vector<8x128xf32> to vector<128xf32>
    %603 = vector.shape_cast %602 : vector<128xf32> to vector<1x128xf32>
    %604 = arith.addf %599, %603 : vector<1x128xf32>
    %605 = vector.broadcast %604 : vector<1x128xf32> to vector<8x128xf32>
    %606 = arith.mulf %605, %4 : vector<8x128xf32>
    %cst_72 = arith.constant dense<0.000000e+00> : vector<8xf32>
    %607 = vector.multi_reduction <add>, %606, %cst_72 [1] : vector<8x128xf32> to vector<8xf32>
    %608 = vector.shape_cast %607 : vector<8xf32> to vector<8x1xf32>
    %609 = vector.broadcast %407 : vector<8x1xf32> to vector<8x128xf32>
    %610 = arith.mulf %609, %9 : vector<8x128xf32>
    %cst_73 = arith.constant dense<0.000000e+00> : vector<128xf32>
    %611 = vector.multi_reduction <add>, %610, %cst_73 [0] : vector<8x128xf32> to vector<128xf32>
    %612 = vector.shape_cast %611 : vector<128xf32> to vector<1x128xf32>
    %613 = arith.addf %612, %594 : vector<1x128xf32>
    %614 = vector.broadcast %445 : vector<8x1xf32> to vector<8x128xf32>
    %615 = arith.mulf %614, %10 : vector<8x128xf32>
    %cst_74 = arith.constant dense<0.000000e+00> : vector<128xf32>
    %616 = vector.multi_reduction <add>, %615, %cst_74 [0] : vector<8x128xf32> to vector<128xf32>
    %617 = vector.shape_cast %616 : vector<128xf32> to vector<1x128xf32>
    %618 = arith.addf %613, %617 : vector<1x128xf32>
    %cst_75 = arith.constant 2.000000e+01 : f32
    %619 = vector.broadcast %cst_75 : f32 to vector<1x128xf32>
    %620 = arith.mulf %619, %618 : vector<1x128xf32>
    %621 = arith.addf %620, %436 : vector<1x128xf32>
    %622 = arith.addf %621, %604 : vector<1x128xf32>
    %c2_76 = arith.constant 2 : index
    %c0_77 = arith.constant 0 : index
    %623 = vector.load %arg3[%c2_76, %c0_77] : memref<8x128xf32, #tpu.memory_space<vmem>>, vector<1x128xf32>
    tpu.vector_store %arg3[%c2_76, %c0_77], %622 {strides = array<i32>} : memref<8x128xf32, #tpu.memory_space<vmem>>, vector<1x128xf32>,
    %c3 = arith.constant 3 : index
    %c0_78 = arith.constant 0 : index
    %624 = vector.load %arg1[%c3, %c0_78] : memref<8x128xf32, #tpu.memory_space<vmem>>, vector<1x128xf32>
    %625 = vector.broadcast %436 : vector<1x128xf32> to vector<8x128xf32>
    %626 = arith.mulf %625, %0 : vector<8x128xf32>
    %cst_79 = arith.constant dense<0.000000e+00> : vector<8xf32>
    %627 = vector.multi_reduction <add>, %626, %cst_79 [1] : vector<8x128xf32> to vector<8xf32>
    %628 = vector.shape_cast %627 : vector<8xf32> to vector<8x1xf32>
    %629 = vector.broadcast %624 : vector<1x128xf32> to vector<8x128xf32>
    %630 = arith.mulf %629, %1 : vector<8x128xf32>
    %cst_80 = arith.constant dense<0.000000e+00> : vector<8xf32>
    %631 = vector.multi_reduction <add>, %630, %cst_80 [1] : vector<8x128xf32> to vector<8xf32>
    %632 = vector.shape_cast %631 : vector<8xf32> to vector<8x1xf32>
    %633 = arith.addf %628, %632 : vector<8x1xf32>
    %634 = vector.broadcast %633 : vector<8x1xf32> to vector<8x128xf32>
    %635 = arith.mulf %634, %11 : vector<8x128xf32>
    %cst_81 = arith.constant dense<0.000000e+00> : vector<128xf32>
    %636 = vector.multi_reduction <add>, %635, %cst_81 [0] : vector<8x128xf32> to vector<128xf32>
    %637 = vector.shape_cast %636 : vector<128xf32> to vector<1x128xf32>
    %638 = vector.broadcast %624 : vector<1x128xf32> to vector<8x128xf32>
    %639 = arith.mulf %638, %3 : vector<8x128xf32>
    %cst_82 = arith.constant dense<0.000000e+00> : vector<8xf32>
    %640 = vector.multi_reduction <add>, %639, %cst_82 [1] : vector<8x128xf32> to vector<8xf32>
    %641 = vector.shape_cast %640 : vector<8xf32> to vector<8x1xf32>
    %642 = vector.broadcast %436 : vector<1x128xf32> to vector<8x128xf32>
    %643 = arith.mulf %642, %2 : vector<8x128xf32>
    %cst_83 = arith.constant dense<0.000000e+00> : vector<8xf32>
    %644 = vector.multi_reduction <add>, %643, %cst_83 [1] : vector<8x128xf32> to vector<8xf32>
    %645 = vector.shape_cast %644 : vector<8xf32> to vector<8x1xf32>
    %646 = arith.subf %641, %645 : vector<8x1xf32>
    %647 = vector.broadcast %608 : vector<8x1xf32> to vector<8x128xf32>
    %648 = arith.mulf %647, %5 : vector<8x128xf32>
    %cst_84 = arith.constant dense<0.000000e+00> : vector<128xf32>
    %649 = vector.multi_reduction <add>, %648, %cst_84 [0] : vector<8x128xf32> to vector<128xf32>
    %650 = vector.shape_cast %649 : vector<128xf32> to vector<1x128xf32>
    %651 = vector.broadcast %646 : vector<8x1xf32> to vector<8x128xf32>
    %652 = arith.mulf %651, %6 : vector<8x128xf32>
    %cst_85 = arith.constant dense<0.000000e+00> : vector<128xf32>
    %653 = vector.multi_reduction <add>, %652, %cst_85 [0] : vector<8x128xf32> to vector<128xf32>
    %654 = vector.shape_cast %653 : vector<128xf32> to vector<1x128xf32>
    %655 = arith.addf %650, %654 : vector<1x128xf32>
    %cst_86 = arith.constant 0.000000e+00 : f32
    %656 = vector.broadcast %cst_86 : f32 to vector<1x128xf32>
    %cst_87 = arith.constant 0.000000e+00 : f32
    %657 = vector.broadcast %cst_87 : f32 to vector<1x128xf32>
    %cst_88 = arith.constant 0.000000e+00 : f32
    %658 = vector.broadcast %cst_88 : f32 to vector<1x128xf32>
    %659 = vector.extract_strided_slice %655 {offsets = [0, 0], sizes = [1, 1], strides = [1, 1]} : vector<1x128xf32> to vector<1x1xf32>
    %660 = math.tanh %659 : vector<1x1xf32>
    %661 = vector.extract_strided_slice %655 {offsets = [0, 1], sizes = [1, 1], strides = [1, 1]} : vector<1x128xf32> to vector<1x1xf32>
    %662 = vector.extract_strided_slice %13 {offsets = [0, 0], sizes = [1, 128], strides = [1, 1]} : vector<8x128xf32> to vector<1x128xf32>
    %663 = vector.broadcast %660 : vector<1x1xf32> to vector<1x128xf32>
    %664 = arith.mulf %663, %662 : vector<1x128xf32>
    %665 = arith.addf %657, %664 : vector<1x128xf32>
    %666 = vector.extract_strided_slice %14 {offsets = [0, 0], sizes = [1, 128], strides = [1, 1]} : vector<8x128xf32> to vector<1x128xf32>
    %667 = vector.broadcast %660 : vector<1x1xf32> to vector<1x128xf32>
    %668 = arith.mulf %667, %666 : vector<1x128xf32>
    %669 = arith.addf %658, %668 : vector<1x128xf32>
    %670 = vector.extract_strided_slice %15 {offsets = [0, 0], sizes = [1, 1], strides = [1, 1]} : vector<8x128xf32> to vector<1x1xf32>
    %671 = arith.mulf %660, %670 : vector<1x1xf32>
    %672 = arith.addf %661, %671 : vector<1x1xf32>
    %673 = math.tanh %672 : vector<1x1xf32>
    %674 = vector.extract_strided_slice %12 {offsets = [0, 0], sizes = [1, 128], strides = [1, 1]} : vector<8x128xf32> to vector<1x128xf32>
    %675 = vector.broadcast %660 : vector<1x1xf32> to vector<1x128xf32>
    %676 = arith.mulf %675, %674 : vector<1x128xf32>
    %677 = arith.addf %656, %676 : vector<1x128xf32>
    %678 = vector.extract_strided_slice %655 {offsets = [0, 2], sizes = [1, 1], strides = [1, 1]} : vector<1x128xf32> to vector<1x1xf32>
    %679 = vector.extract_strided_slice %677 {offsets = [0, 2], sizes = [1, 1], strides = [1, 1]} : vector<1x128xf32> to vector<1x1xf32>
    %680 = arith.addf %678, %679 : vector<1x1xf32>
    %681 = vector.extract_strided_slice %13 {offsets = [1, 0], sizes = [1, 128], strides = [1, 1]} : vector<8x128xf32> to vector<1x128xf32>
    %682 = vector.broadcast %673 : vector<1x1xf32> to vector<1x128xf32>
    %683 = arith.mulf %682, %681 : vector<1x128xf32>
    %684 = arith.addf %665, %683 : vector<1x128xf32>
    %685 = vector.extract_strided_slice %14 {offsets = [1, 0], sizes = [1, 128], strides = [1, 1]} : vector<8x128xf32> to vector<1x128xf32>
    %686 = vector.broadcast %673 : vector<1x1xf32> to vector<1x128xf32>
    %687 = arith.mulf %686, %685 : vector<1x128xf32>
    %688 = arith.addf %669, %687 : vector<1x128xf32>
    %689 = vector.extract_strided_slice %15 {offsets = [1, 0], sizes = [1, 1], strides = [1, 1]} : vector<8x128xf32> to vector<1x1xf32>
    %690 = arith.mulf %673, %689 : vector<1x1xf32>
    %691 = arith.addf %680, %690 : vector<1x1xf32>
    %692 = math.tanh %691 : vector<1x1xf32>
    %693 = vector.extract_strided_slice %12 {offsets = [1, 0], sizes = [1, 128], strides = [1, 1]} : vector<8x128xf32> to vector<1x128xf32>
    %694 = vector.broadcast %673 : vector<1x1xf32> to vector<1x128xf32>
    %695 = arith.mulf %694, %693 : vector<1x128xf32>
    %696 = arith.addf %677, %695 : vector<1x128xf32>
    %697 = vector.extract_strided_slice %655 {offsets = [0, 3], sizes = [1, 1], strides = [1, 1]} : vector<1x128xf32> to vector<1x1xf32>
    %698 = vector.extract_strided_slice %696 {offsets = [0, 3], sizes = [1, 1], strides = [1, 1]} : vector<1x128xf32> to vector<1x1xf32>
    %699 = arith.addf %697, %698 : vector<1x1xf32>
    %700 = vector.extract_strided_slice %13 {offsets = [2, 0], sizes = [1, 128], strides = [1, 1]} : vector<8x128xf32> to vector<1x128xf32>
    %701 = vector.broadcast %692 : vector<1x1xf32> to vector<1x128xf32>
    %702 = arith.mulf %701, %700 : vector<1x128xf32>
    %703 = arith.addf %684, %702 : vector<1x128xf32>
    %704 = vector.extract_strided_slice %14 {offsets = [2, 0], sizes = [1, 128], strides = [1, 1]} : vector<8x128xf32> to vector<1x128xf32>
    %705 = vector.broadcast %692 : vector<1x1xf32> to vector<1x128xf32>
    %706 = arith.mulf %705, %704 : vector<1x128xf32>
    %707 = arith.addf %688, %706 : vector<1x128xf32>
    %708 = vector.extract_strided_slice %15 {offsets = [2, 0], sizes = [1, 1], strides = [1, 1]} : vector<8x128xf32> to vector<1x1xf32>
    %709 = arith.mulf %692, %708 : vector<1x1xf32>
    %710 = arith.addf %699, %709 : vector<1x1xf32>
    %711 = math.tanh %710 : vector<1x1xf32>
    %712 = vector.extract_strided_slice %12 {offsets = [2, 0], sizes = [1, 128], strides = [1, 1]} : vector<8x128xf32> to vector<1x128xf32>
    %713 = vector.broadcast %692 : vector<1x1xf32> to vector<1x128xf32>
    %714 = arith.mulf %713, %712 : vector<1x128xf32>
    %715 = arith.addf %696, %714 : vector<1x128xf32>
    %716 = vector.extract_strided_slice %655 {offsets = [0, 4], sizes = [1, 1], strides = [1, 1]} : vector<1x128xf32> to vector<1x1xf32>
    %717 = vector.extract_strided_slice %715 {offsets = [0, 4], sizes = [1, 1], strides = [1, 1]} : vector<1x128xf32> to vector<1x1xf32>
    %718 = arith.addf %716, %717 : vector<1x1xf32>
    %719 = vector.extract_strided_slice %13 {offsets = [3, 0], sizes = [1, 128], strides = [1, 1]} : vector<8x128xf32> to vector<1x128xf32>
    %720 = vector.broadcast %711 : vector<1x1xf32> to vector<1x128xf32>
    %721 = arith.mulf %720, %719 : vector<1x128xf32>
    %722 = arith.addf %703, %721 : vector<1x128xf32>
    %723 = vector.extract_strided_slice %14 {offsets = [3, 0], sizes = [1, 128], strides = [1, 1]} : vector<8x128xf32> to vector<1x128xf32>
    %724 = vector.broadcast %711 : vector<1x1xf32> to vector<1x128xf32>
    %725 = arith.mulf %724, %723 : vector<1x128xf32>
    %726 = arith.addf %707, %725 : vector<1x128xf32>
    %727 = vector.extract_strided_slice %15 {offsets = [3, 0], sizes = [1, 1], strides = [1, 1]} : vector<8x128xf32> to vector<1x1xf32>
    %728 = arith.mulf %711, %727 : vector<1x1xf32>
    %729 = arith.addf %718, %728 : vector<1x1xf32>
    %730 = math.tanh %729 : vector<1x1xf32>
    %731 = vector.extract_strided_slice %12 {offsets = [3, 0], sizes = [1, 128], strides = [1, 1]} : vector<8x128xf32> to vector<1x128xf32>
    %732 = vector.broadcast %711 : vector<1x1xf32> to vector<1x128xf32>
    %733 = arith.mulf %732, %731 : vector<1x128xf32>
    %734 = arith.addf %715, %733 : vector<1x128xf32>
    %735 = vector.extract_strided_slice %655 {offsets = [0, 5], sizes = [1, 1], strides = [1, 1]} : vector<1x128xf32> to vector<1x1xf32>
    %736 = vector.extract_strided_slice %734 {offsets = [0, 5], sizes = [1, 1], strides = [1, 1]} : vector<1x128xf32> to vector<1x1xf32>
    %737 = arith.addf %735, %736 : vector<1x1xf32>
    %738 = vector.extract_strided_slice %13 {offsets = [4, 0], sizes = [1, 128], strides = [1, 1]} : vector<8x128xf32> to vector<1x128xf32>
    %739 = vector.broadcast %730 : vector<1x1xf32> to vector<1x128xf32>
    %740 = arith.mulf %739, %738 : vector<1x128xf32>
    %741 = arith.addf %722, %740 : vector<1x128xf32>
    %742 = vector.extract_strided_slice %14 {offsets = [4, 0], sizes = [1, 128], strides = [1, 1]} : vector<8x128xf32> to vector<1x128xf32>
    %743 = vector.broadcast %730 : vector<1x1xf32> to vector<1x128xf32>
    %744 = arith.mulf %743, %742 : vector<1x128xf32>
    %745 = arith.addf %726, %744 : vector<1x128xf32>
    %746 = vector.extract_strided_slice %15 {offsets = [4, 0], sizes = [1, 1], strides = [1, 1]} : vector<8x128xf32> to vector<1x1xf32>
    %747 = arith.mulf %730, %746 : vector<1x1xf32>
    %748 = arith.addf %737, %747 : vector<1x1xf32>
    %749 = math.tanh %748 : vector<1x1xf32>
    %750 = vector.extract_strided_slice %12 {offsets = [4, 0], sizes = [1, 128], strides = [1, 1]} : vector<8x128xf32> to vector<1x128xf32>
    %751 = vector.broadcast %730 : vector<1x1xf32> to vector<1x128xf32>
    %752 = arith.mulf %751, %750 : vector<1x128xf32>
    %753 = arith.addf %734, %752 : vector<1x128xf32>
    %754 = vector.extract_strided_slice %655 {offsets = [0, 6], sizes = [1, 1], strides = [1, 1]} : vector<1x128xf32> to vector<1x1xf32>
    %755 = vector.extract_strided_slice %753 {offsets = [0, 6], sizes = [1, 1], strides = [1, 1]} : vector<1x128xf32> to vector<1x1xf32>
    %756 = arith.addf %754, %755 : vector<1x1xf32>
    %757 = vector.extract_strided_slice %13 {offsets = [5, 0], sizes = [1, 128], strides = [1, 1]} : vector<8x128xf32> to vector<1x128xf32>
    %758 = vector.broadcast %749 : vector<1x1xf32> to vector<1x128xf32>
    %759 = arith.mulf %758, %757 : vector<1x128xf32>
    %760 = arith.addf %741, %759 : vector<1x128xf32>
    %761 = vector.extract_strided_slice %14 {offsets = [5, 0], sizes = [1, 128], strides = [1, 1]} : vector<8x128xf32> to vector<1x128xf32>
    %762 = vector.broadcast %749 : vector<1x1xf32> to vector<1x128xf32>
    %763 = arith.mulf %762, %761 : vector<1x128xf32>
    %764 = arith.addf %745, %763 : vector<1x128xf32>
    %765 = vector.extract_strided_slice %15 {offsets = [5, 0], sizes = [1, 1], strides = [1, 1]} : vector<8x128xf32> to vector<1x1xf32>
    %766 = arith.mulf %749, %765 : vector<1x1xf32>
    %767 = arith.addf %756, %766 : vector<1x1xf32>
    %768 = math.tanh %767 : vector<1x1xf32>
    %769 = vector.extract_strided_slice %12 {offsets = [5, 0], sizes = [1, 128], strides = [1, 1]} : vector<8x128xf32> to vector<1x128xf32>
    %770 = vector.broadcast %749 : vector<1x1xf32> to vector<1x128xf32>
    %771 = arith.mulf %770, %769 : vector<1x128xf32>
    %772 = arith.addf %753, %771 : vector<1x128xf32>
    %773 = vector.extract_strided_slice %655 {offsets = [0, 7], sizes = [1, 1], strides = [1, 1]} : vector<1x128xf32> to vector<1x1xf32>
    %774 = vector.extract_strided_slice %772 {offsets = [0, 7], sizes = [1, 1], strides = [1, 1]} : vector<1x128xf32> to vector<1x1xf32>
    %775 = arith.addf %773, %774 : vector<1x1xf32>
    %776 = vector.extract_strided_slice %13 {offsets = [6, 0], sizes = [1, 128], strides = [1, 1]} : vector<8x128xf32> to vector<1x128xf32>
    %777 = vector.broadcast %768 : vector<1x1xf32> to vector<1x128xf32>
    %778 = arith.mulf %777, %776 : vector<1x128xf32>
    %779 = arith.addf %760, %778 : vector<1x128xf32>
    %780 = vector.extract_strided_slice %14 {offsets = [6, 0], sizes = [1, 128], strides = [1, 1]} : vector<8x128xf32> to vector<1x128xf32>
    %781 = vector.broadcast %768 : vector<1x1xf32> to vector<1x128xf32>
    %782 = arith.mulf %781, %780 : vector<1x128xf32>
    %783 = arith.addf %764, %782 : vector<1x128xf32>
    %784 = vector.extract_strided_slice %15 {offsets = [6, 0], sizes = [1, 1], strides = [1, 1]} : vector<8x128xf32> to vector<1x1xf32>
    %785 = arith.mulf %768, %784 : vector<1x1xf32>
    %786 = arith.addf %775, %785 : vector<1x1xf32>
    %787 = math.tanh %786 : vector<1x1xf32>
    %788 = vector.extract_strided_slice %13 {offsets = [7, 0], sizes = [1, 128], strides = [1, 1]} : vector<8x128xf32> to vector<1x128xf32>
    %789 = vector.broadcast %787 : vector<1x1xf32> to vector<1x128xf32>
    %790 = arith.mulf %789, %788 : vector<1x128xf32>
    %791 = arith.addf %779, %790 : vector<1x128xf32>
    %792 = vector.extract_strided_slice %14 {offsets = [7, 0], sizes = [1, 128], strides = [1, 1]} : vector<8x128xf32> to vector<1x128xf32>
    %793 = vector.broadcast %787 : vector<1x1xf32> to vector<1x128xf32>
    %794 = arith.mulf %793, %792 : vector<1x128xf32>
    %795 = arith.addf %783, %794 : vector<1x128xf32>
    %796 = vector.broadcast %608 : vector<8x1xf32> to vector<8x128xf32>
    %797 = arith.mulf %796, %7 : vector<8x128xf32>
    %cst_89 = arith.constant dense<0.000000e+00> : vector<128xf32>
    %798 = vector.multi_reduction <add>, %797, %cst_89 [0] : vector<8x128xf32> to vector<128xf32>
    %799 = vector.shape_cast %798 : vector<128xf32> to vector<1x128xf32>
    %800 = arith.addf %799, %791 : vector<1x128xf32>
    %801 = vector.broadcast %646 : vector<8x1xf32> to vector<8x128xf32>
    %802 = arith.mulf %801, %8 : vector<8x128xf32>
    %cst_90 = arith.constant dense<0.000000e+00> : vector<128xf32>
    %803 = vector.multi_reduction <add>, %802, %cst_90 [0] : vector<8x128xf32> to vector<128xf32>
    %804 = vector.shape_cast %803 : vector<128xf32> to vector<1x128xf32>
    %805 = arith.addf %800, %804 : vector<1x128xf32>
    %806 = vector.broadcast %805 : vector<1x128xf32> to vector<8x128xf32>
    %807 = arith.mulf %806, %4 : vector<8x128xf32>
    %cst_91 = arith.constant dense<0.000000e+00> : vector<8xf32>
    %808 = vector.multi_reduction <add>, %807, %cst_91 [1] : vector<8x128xf32> to vector<8xf32>
    %809 = vector.shape_cast %808 : vector<8xf32> to vector<8x1xf32>
    %810 = vector.broadcast %608 : vector<8x1xf32> to vector<8x128xf32>
    %811 = arith.mulf %810, %9 : vector<8x128xf32>
    %cst_92 = arith.constant dense<0.000000e+00> : vector<128xf32>
    %812 = vector.multi_reduction <add>, %811, %cst_92 [0] : vector<8x128xf32> to vector<128xf32>
    %813 = vector.shape_cast %812 : vector<128xf32> to vector<1x128xf32>
    %814 = arith.addf %813, %795 : vector<1x128xf32>
    %815 = vector.broadcast %646 : vector<8x1xf32> to vector<8x128xf32>
    %816 = arith.mulf %815, %10 : vector<8x128xf32>
    %cst_93 = arith.constant dense<0.000000e+00> : vector<128xf32>
    %817 = vector.multi_reduction <add>, %816, %cst_93 [0] : vector<8x128xf32> to vector<128xf32>
    %818 = vector.shape_cast %817 : vector<128xf32> to vector<1x128xf32>
    %819 = arith.addf %814, %818 : vector<1x128xf32>
    %cst_94 = arith.constant 2.000000e+01 : f32
    %820 = vector.broadcast %cst_94 : f32 to vector<1x128xf32>
    %821 = arith.mulf %820, %819 : vector<1x128xf32>
    %822 = arith.addf %821, %637 : vector<1x128xf32>
    %823 = arith.addf %822, %805 : vector<1x128xf32>
    %c3_95 = arith.constant 3 : index
    %c0_96 = arith.constant 0 : index
    %824 = vector.load %arg3[%c3_95, %c0_96] : memref<8x128xf32, #tpu.memory_space<vmem>>, vector<1x128xf32>
    tpu.vector_store %arg3[%c3_95, %c0_96], %823 {strides = array<i32>} : memref<8x128xf32, #tpu.memory_space<vmem>>, vector<1x128xf32>,
    %c4 = arith.constant 4 : index
    %c0_97 = arith.constant 0 : index
    %825 = vector.load %arg1[%c4, %c0_97] : memref<8x128xf32, #tpu.memory_space<vmem>>, vector<1x128xf32>
    %826 = vector.broadcast %637 : vector<1x128xf32> to vector<8x128xf32>
    %827 = arith.mulf %826, %0 : vector<8x128xf32>
    %cst_98 = arith.constant dense<0.000000e+00> : vector<8xf32>
    %828 = vector.multi_reduction <add>, %827, %cst_98 [1] : vector<8x128xf32> to vector<8xf32>
    %829 = vector.shape_cast %828 : vector<8xf32> to vector<8x1xf32>
    %830 = vector.broadcast %825 : vector<1x128xf32> to vector<8x128xf32>
    %831 = arith.mulf %830, %1 : vector<8x128xf32>
    %cst_99 = arith.constant dense<0.000000e+00> : vector<8xf32>
    %832 = vector.multi_reduction <add>, %831, %cst_99 [1] : vector<8x128xf32> to vector<8xf32>
    %833 = vector.shape_cast %832 : vector<8xf32> to vector<8x1xf32>
    %834 = arith.addf %829, %833 : vector<8x1xf32>
    %835 = vector.broadcast %834 : vector<8x1xf32> to vector<8x128xf32>
    %836 = arith.mulf %835, %11 : vector<8x128xf32>
    %cst_100 = arith.constant dense<0.000000e+00> : vector<128xf32>
    %837 = vector.multi_reduction <add>, %836, %cst_100 [0] : vector<8x128xf32> to vector<128xf32>
    %838 = vector.shape_cast %837 : vector<128xf32> to vector<1x128xf32>
    %839 = vector.broadcast %825 : vector<1x128xf32> to vector<8x128xf32>
    %840 = arith.mulf %839, %3 : vector<8x128xf32>
    %cst_101 = arith.constant dense<0.000000e+00> : vector<8xf32>
    %841 = vector.multi_reduction <add>, %840, %cst_101 [1] : vector<8x128xf32> to vector<8xf32>
    %842 = vector.shape_cast %841 : vector<8xf32> to vector<8x1xf32>
    %843 = vector.broadcast %637 : vector<1x128xf32> to vector<8x128xf32>
    %844 = arith.mulf %843, %2 : vector<8x128xf32>
    %cst_102 = arith.constant dense<0.000000e+00> : vector<8xf32>
    %845 = vector.multi_reduction <add>, %844, %cst_102 [1] : vector<8x128xf32> to vector<8xf32>
    %846 = vector.shape_cast %845 : vector<8xf32> to vector<8x1xf32>
    %847 = arith.subf %842, %846 : vector<8x1xf32>
    %848 = vector.broadcast %809 : vector<8x1xf32> to vector<8x128xf32>
    %849 = arith.mulf %848, %5 : vector<8x128xf32>
    %cst_103 = arith.constant dense<0.000000e+00> : vector<128xf32>
    %850 = vector.multi_reduction <add>, %849, %cst_103 [0] : vector<8x128xf32> to vector<128xf32>
    %851 = vector.shape_cast %850 : vector<128xf32> to vector<1x128xf32>
    %852 = vector.broadcast %847 : vector<8x1xf32> to vector<8x128xf32>
    %853 = arith.mulf %852, %6 : vector<8x128xf32>
    %cst_104 = arith.constant dense<0.000000e+00> : vector<128xf32>
    %854 = vector.multi_reduction <add>, %853, %cst_104 [0] : vector<8x128xf32> to vector<128xf32>
    %855 = vector.shape_cast %854 : vector<128xf32> to vector<1x128xf32>
    %856 = arith.addf %851, %855 : vector<1x128xf32>
    %cst_105 = arith.constant 0.000000e+00 : f32
    %857 = vector.broadcast %cst_105 : f32 to vector<1x128xf32>
    %cst_106 = arith.constant 0.000000e+00 : f32
    %858 = vector.broadcast %cst_106 : f32 to vector<1x128xf32>
    %cst_107 = arith.constant 0.000000e+00 : f32
    %859 = vector.broadcast %cst_107 : f32 to vector<1x128xf32>
    %860 = vector.extract_strided_slice %856 {offsets = [0, 0], sizes = [1, 1], strides = [1, 1]} : vector<1x128xf32> to vector<1x1xf32>
    %861 = math.tanh %860 : vector<1x1xf32>
    %862 = vector.extract_strided_slice %856 {offsets = [0, 1], sizes = [1, 1], strides = [1, 1]} : vector<1x128xf32> to vector<1x1xf32>
    %863 = vector.extract_strided_slice %13 {offsets = [0, 0], sizes = [1, 128], strides = [1, 1]} : vector<8x128xf32> to vector<1x128xf32>
    %864 = vector.broadcast %861 : vector<1x1xf32> to vector<1x128xf32>
    %865 = arith.mulf %864, %863 : vector<1x128xf32>
    %866 = arith.addf %858, %865 : vector<1x128xf32>
    %867 = vector.extract_strided_slice %14 {offsets = [0, 0], sizes = [1, 128], strides = [1, 1]} : vector<8x128xf32> to vector<1x128xf32>
    %868 = vector.broadcast %861 : vector<1x1xf32> to vector<1x128xf32>
    %869 = arith.mulf %868, %867 : vector<1x128xf32>
    %870 = arith.addf %859, %869 : vector<1x128xf32>
    %871 = vector.extract_strided_slice %15 {offsets = [0, 0], sizes = [1, 1], strides = [1, 1]} : vector<8x128xf32> to vector<1x1xf32>
    %872 = arith.mulf %861, %871 : vector<1x1xf32>
    %873 = arith.addf %862, %872 : vector<1x1xf32>
    %874 = math.tanh %873 : vector<1x1xf32>
    %875 = vector.extract_strided_slice %12 {offsets = [0, 0], sizes = [1, 128], strides = [1, 1]} : vector<8x128xf32> to vector<1x128xf32>
    %876 = vector.broadcast %861 : vector<1x1xf32> to vector<1x128xf32>
    %877 = arith.mulf %876, %875 : vector<1x128xf32>
    %878 = arith.addf %857, %877 : vector<1x128xf32>
    %879 = vector.extract_strided_slice %856 {offsets = [0, 2], sizes = [1, 1], strides = [1, 1]} : vector<1x128xf32> to vector<1x1xf32>
    %880 = vector.extract_strided_slice %878 {offsets = [0, 2], sizes = [1, 1], strides = [1, 1]} : vector<1x128xf32> to vector<1x1xf32>
    %881 = arith.addf %879, %880 : vector<1x1xf32>
    %882 = vector.extract_strided_slice %13 {offsets = [1, 0], sizes = [1, 128], strides = [1, 1]} : vector<8x128xf32> to vector<1x128xf32>
    %883 = vector.broadcast %874 : vector<1x1xf32> to vector<1x128xf32>
    %884 = arith.mulf %883, %882 : vector<1x128xf32>
    %885 = arith.addf %866, %884 : vector<1x128xf32>
    %886 = vector.extract_strided_slice %14 {offsets = [1, 0], sizes = [1, 128], strides = [1, 1]} : vector<8x128xf32> to vector<1x128xf32>
    %887 = vector.broadcast %874 : vector<1x1xf32> to vector<1x128xf32>
    %888 = arith.mulf %887, %886 : vector<1x128xf32>
    %889 = arith.addf %870, %888 : vector<1x128xf32>
    %890 = vector.extract_strided_slice %15 {offsets = [1, 0], sizes = [1, 1], strides = [1, 1]} : vector<8x128xf32> to vector<1x1xf32>
    %891 = arith.mulf %874, %890 : vector<1x1xf32>
    %892 = arith.addf %881, %891 : vector<1x1xf32>
    %893 = math.tanh %892 : vector<1x1xf32>
    %894 = vector.extract_strided_slice %12 {offsets = [1, 0], sizes = [1, 128], strides = [1, 1]} : vector<8x128xf32> to vector<1x128xf32>
    %895 = vector.broadcast %874 : vector<1x1xf32> to vector<1x128xf32>
    %896 = arith.mulf %895, %894 : vector<1x128xf32>
    %897 = arith.addf %878, %896 : vector<1x128xf32>
    %898 = vector.extract_strided_slice %856 {offsets = [0, 3], sizes = [1, 1], strides = [1, 1]} : vector<1x128xf32> to vector<1x1xf32>
    %899 = vector.extract_strided_slice %897 {offsets = [0, 3], sizes = [1, 1], strides = [1, 1]} : vector<1x128xf32> to vector<1x1xf32>
    %900 = arith.addf %898, %899 : vector<1x1xf32>
    %901 = vector.extract_strided_slice %13 {offsets = [2, 0], sizes = [1, 128], strides = [1, 1]} : vector<8x128xf32> to vector<1x128xf32>
    %902 = vector.broadcast %893 : vector<1x1xf32> to vector<1x128xf32>
    %903 = arith.mulf %902, %901 : vector<1x128xf32>
    %904 = arith.addf %885, %903 : vector<1x128xf32>
    %905 = vector.extract_strided_slice %14 {offsets = [2, 0], sizes = [1, 128], strides = [1, 1]} : vector<8x128xf32> to vector<1x128xf32>
    %906 = vector.broadcast %893 : vector<1x1xf32> to vector<1x128xf32>
    %907 = arith.mulf %906, %905 : vector<1x128xf32>
    %908 = arith.addf %889, %907 : vector<1x128xf32>
    %909 = vector.extract_strided_slice %15 {offsets = [2, 0], sizes = [1, 1], strides = [1, 1]} : vector<8x128xf32> to vector<1x1xf32>
    %910 = arith.mulf %893, %909 : vector<1x1xf32>
    %911 = arith.addf %900, %910 : vector<1x1xf32>
    %912 = math.tanh %911 : vector<1x1xf32>
    %913 = vector.extract_strided_slice %12 {offsets = [2, 0], sizes = [1, 128], strides = [1, 1]} : vector<8x128xf32> to vector<1x128xf32>
    %914 = vector.broadcast %893 : vector<1x1xf32> to vector<1x128xf32>
    %915 = arith.mulf %914, %913 : vector<1x128xf32>
    %916 = arith.addf %897, %915 : vector<1x128xf32>
    %917 = vector.extract_strided_slice %856 {offsets = [0, 4], sizes = [1, 1], strides = [1, 1]} : vector<1x128xf32> to vector<1x1xf32>
    %918 = vector.extract_strided_slice %916 {offsets = [0, 4], sizes = [1, 1], strides = [1, 1]} : vector<1x128xf32> to vector<1x1xf32>
    %919 = arith.addf %917, %918 : vector<1x1xf32>
    %920 = vector.extract_strided_slice %13 {offsets = [3, 0], sizes = [1, 128], strides = [1, 1]} : vector<8x128xf32> to vector<1x128xf32>
    %921 = vector.broadcast %912 : vector<1x1xf32> to vector<1x128xf32>
    %922 = arith.mulf %921, %920 : vector<1x128xf32>
    %923 = arith.addf %904, %922 : vector<1x128xf32>
    %924 = vector.extract_strided_slice %14 {offsets = [3, 0], sizes = [1, 128], strides = [1, 1]} : vector<8x128xf32> to vector<1x128xf32>
    %925 = vector.broadcast %912 : vector<1x1xf32> to vector<1x128xf32>
    %926 = arith.mulf %925, %924 : vector<1x128xf32>
    %927 = arith.addf %908, %926 : vector<1x128xf32>
    %928 = vector.extract_strided_slice %15 {offsets = [3, 0], sizes = [1, 1], strides = [1, 1]} : vector<8x128xf32> to vector<1x1xf32>
    %929 = arith.mulf %912, %928 : vector<1x1xf32>
    %930 = arith.addf %919, %929 : vector<1x1xf32>
    %931 = math.tanh %930 : vector<1x1xf32>
    %932 = vector.extract_strided_slice %12 {offsets = [3, 0], sizes = [1, 128], strides = [1, 1]} : vector<8x128xf32> to vector<1x128xf32>
    %933 = vector.broadcast %912 : vector<1x1xf32> to vector<1x128xf32>
    %934 = arith.mulf %933, %932 : vector<1x128xf32>
    %935 = arith.addf %916, %934 : vector<1x128xf32>
    %936 = vector.extract_strided_slice %856 {offsets = [0, 5], sizes = [1, 1], strides = [1, 1]} : vector<1x128xf32> to vector<1x1xf32>
    %937 = vector.extract_strided_slice %935 {offsets = [0, 5], sizes = [1, 1], strides = [1, 1]} : vector<1x128xf32> to vector<1x1xf32>
    %938 = arith.addf %936, %937 : vector<1x1xf32>
    %939 = vector.extract_strided_slice %13 {offsets = [4, 0], sizes = [1, 128], strides = [1, 1]} : vector<8x128xf32> to vector<1x128xf32>
    %940 = vector.broadcast %931 : vector<1x1xf32> to vector<1x128xf32>
    %941 = arith.mulf %940, %939 : vector<1x128xf32>
    %942 = arith.addf %923, %941 : vector<1x128xf32>
    %943 = vector.extract_strided_slice %14 {offsets = [4, 0], sizes = [1, 128], strides = [1, 1]} : vector<8x128xf32> to vector<1x128xf32>
    %944 = vector.broadcast %931 : vector<1x1xf32> to vector<1x128xf32>
    %945 = arith.mulf %944, %943 : vector<1x128xf32>
    %946 = arith.addf %927, %945 : vector<1x128xf32>
    %947 = vector.extract_strided_slice %15 {offsets = [4, 0], sizes = [1, 1], strides = [1, 1]} : vector<8x128xf32> to vector<1x1xf32>
    %948 = arith.mulf %931, %947 : vector<1x1xf32>
    %949 = arith.addf %938, %948 : vector<1x1xf32>
    %950 = math.tanh %949 : vector<1x1xf32>
    %951 = vector.extract_strided_slice %12 {offsets = [4, 0], sizes = [1, 128], strides = [1, 1]} : vector<8x128xf32> to vector<1x128xf32>
    %952 = vector.broadcast %931 : vector<1x1xf32> to vector<1x128xf32>
    %953 = arith.mulf %952, %951 : vector<1x128xf32>
    %954 = arith.addf %935, %953 : vector<1x128xf32>
    %955 = vector.extract_strided_slice %856 {offsets = [0, 6], sizes = [1, 1], strides = [1, 1]} : vector<1x128xf32> to vector<1x1xf32>
    %956 = vector.extract_strided_slice %954 {offsets = [0, 6], sizes = [1, 1], strides = [1, 1]} : vector<1x128xf32> to vector<1x1xf32>
    %957 = arith.addf %955, %956 : vector<1x1xf32>
    %958 = vector.extract_strided_slice %13 {offsets = [5, 0], sizes = [1, 128], strides = [1, 1]} : vector<8x128xf32> to vector<1x128xf32>
    %959 = vector.broadcast %950 : vector<1x1xf32> to vector<1x128xf32>
    %960 = arith.mulf %959, %958 : vector<1x128xf32>
    %961 = arith.addf %942, %960 : vector<1x128xf32>
    %962 = vector.extract_strided_slice %14 {offsets = [5, 0], sizes = [1, 128], strides = [1, 1]} : vector<8x128xf32> to vector<1x128xf32>
    %963 = vector.broadcast %950 : vector<1x1xf32> to vector<1x128xf32>
    %964 = arith.mulf %963, %962 : vector<1x128xf32>
    %965 = arith.addf %946, %964 : vector<1x128xf32>
    %966 = vector.extract_strided_slice %15 {offsets = [5, 0], sizes = [1, 1], strides = [1, 1]} : vector<8x128xf32> to vector<1x1xf32>
    %967 = arith.mulf %950, %966 : vector<1x1xf32>
    %968 = arith.addf %957, %967 : vector<1x1xf32>
    %969 = math.tanh %968 : vector<1x1xf32>
    %970 = vector.extract_strided_slice %12 {offsets = [5, 0], sizes = [1, 128], strides = [1, 1]} : vector<8x128xf32> to vector<1x128xf32>
    %971 = vector.broadcast %950 : vector<1x1xf32> to vector<1x128xf32>
    %972 = arith.mulf %971, %970 : vector<1x128xf32>
    %973 = arith.addf %954, %972 : vector<1x128xf32>
    %974 = vector.extract_strided_slice %856 {offsets = [0, 7], sizes = [1, 1], strides = [1, 1]} : vector<1x128xf32> to vector<1x1xf32>
    %975 = vector.extract_strided_slice %973 {offsets = [0, 7], sizes = [1, 1], strides = [1, 1]} : vector<1x128xf32> to vector<1x1xf32>
    %976 = arith.addf %974, %975 : vector<1x1xf32>
    %977 = vector.extract_strided_slice %13 {offsets = [6, 0], sizes = [1, 128], strides = [1, 1]} : vector<8x128xf32> to vector<1x128xf32>
    %978 = vector.broadcast %969 : vector<1x1xf32> to vector<1x128xf32>
    %979 = arith.mulf %978, %977 : vector<1x128xf32>
    %980 = arith.addf %961, %979 : vector<1x128xf32>
    %981 = vector.extract_strided_slice %14 {offsets = [6, 0], sizes = [1, 128], strides = [1, 1]} : vector<8x128xf32> to vector<1x128xf32>
    %982 = vector.broadcast %969 : vector<1x1xf32> to vector<1x128xf32>
    %983 = arith.mulf %982, %981 : vector<1x128xf32>
    %984 = arith.addf %965, %983 : vector<1x128xf32>
    %985 = vector.extract_strided_slice %15 {offsets = [6, 0], sizes = [1, 1], strides = [1, 1]} : vector<8x128xf32> to vector<1x1xf32>
    %986 = arith.mulf %969, %985 : vector<1x1xf32>
    %987 = arith.addf %976, %986 : vector<1x1xf32>
    %988 = math.tanh %987 : vector<1x1xf32>
    %989 = vector.extract_strided_slice %13 {offsets = [7, 0], sizes = [1, 128], strides = [1, 1]} : vector<8x128xf32> to vector<1x128xf32>
    %990 = vector.broadcast %988 : vector<1x1xf32> to vector<1x128xf32>
    %991 = arith.mulf %990, %989 : vector<1x128xf32>
    %992 = arith.addf %980, %991 : vector<1x128xf32>
    %993 = vector.extract_strided_slice %14 {offsets = [7, 0], sizes = [1, 128], strides = [1, 1]} : vector<8x128xf32> to vector<1x128xf32>
    %994 = vector.broadcast %988 : vector<1x1xf32> to vector<1x128xf32>
    %995 = arith.mulf %994, %993 : vector<1x128xf32>
    %996 = arith.addf %984, %995 : vector<1x128xf32>
    %997 = vector.broadcast %809 : vector<8x1xf32> to vector<8x128xf32>
    %998 = arith.mulf %997, %7 : vector<8x128xf32>
    %cst_108 = arith.constant dense<0.000000e+00> : vector<128xf32>
    %999 = vector.multi_reduction <add>, %998, %cst_108 [0] : vector<8x128xf32> to vector<128xf32>
    %1000 = vector.shape_cast %999 : vector<128xf32> to vector<1x128xf32>
    %1001 = arith.addf %1000, %992 : vector<1x128xf32>
    %1002 = vector.broadcast %847 : vector<8x1xf32> to vector<8x128xf32>
    %1003 = arith.mulf %1002, %8 : vector<8x128xf32>
    %cst_109 = arith.constant dense<0.000000e+00> : vector<128xf32>
    %1004 = vector.multi_reduction <add>, %1003, %cst_109 [0] : vector<8x128xf32> to vector<128xf32>
    %1005 = vector.shape_cast %1004 : vector<128xf32> to vector<1x128xf32>
    %1006 = arith.addf %1001, %1005 : vector<1x128xf32>
    %1007 = vector.broadcast %1006 : vector<1x128xf32> to vector<8x128xf32>
    %1008 = arith.mulf %1007, %4 : vector<8x128xf32>
    %cst_110 = arith.constant dense<0.000000e+00> : vector<8xf32>
    %1009 = vector.multi_reduction <add>, %1008, %cst_110 [1] : vector<8x128xf32> to vector<8xf32>
    %1010 = vector.shape_cast %1009 : vector<8xf32> to vector<8x1xf32>
    %1011 = vector.broadcast %809 : vector<8x1xf32> to vector<8x128xf32>
    %1012 = arith.mulf %1011, %9 : vector<8x128xf32>
    %cst_111 = arith.constant dense<0.000000e+00> : vector<128xf32>
    %1013 = vector.multi_reduction <add>, %1012, %cst_111 [0] : vector<8x128xf32> to vector<128xf32>
    %1014 = vector.shape_cast %1013 : vector<128xf32> to vector<1x128xf32>
    %1015 = arith.addf %1014, %996 : vector<1x128xf32>
    %1016 = vector.broadcast %847 : vector<8x1xf32> to vector<8x128xf32>
    %1017 = arith.mulf %1016, %10 : vector<8x128xf32>
    %cst_112 = arith.constant dense<0.000000e+00> : vector<128xf32>
    %1018 = vector.multi_reduction <add>, %1017, %cst_112 [0] : vector<8x128xf32> to vector<128xf32>
    %1019 = vector.shape_cast %1018 : vector<128xf32> to vector<1x128xf32>
    %1020 = arith.addf %1015, %1019 : vector<1x128xf32>
    %cst_113 = arith.constant 2.000000e+01 : f32
    %1021 = vector.broadcast %cst_113 : f32 to vector<1x128xf32>
    %1022 = arith.mulf %1021, %1020 : vector<1x128xf32>
    %1023 = arith.addf %1022, %838 : vector<1x128xf32>
    %1024 = arith.addf %1023, %1006 : vector<1x128xf32>
    %c4_114 = arith.constant 4 : index
    %c0_115 = arith.constant 0 : index
    %1025 = vector.load %arg3[%c4_114, %c0_115] : memref<8x128xf32, #tpu.memory_space<vmem>>, vector<1x128xf32>
    tpu.vector_store %arg3[%c4_114, %c0_115], %1024 {strides = array<i32>} : memref<8x128xf32, #tpu.memory_space<vmem>>, vector<1x128xf32>,
    %c5 = arith.constant 5 : index
    %c0_116 = arith.constant 0 : index
    %1026 = vector.load %arg1[%c5, %c0_116] : memref<8x128xf32, #tpu.memory_space<vmem>>, vector<1x128xf32>
    %1027 = vector.broadcast %838 : vector<1x128xf32> to vector<8x128xf32>
    %1028 = arith.mulf %1027, %0 : vector<8x128xf32>
    %cst_117 = arith.constant dense<0.000000e+00> : vector<8xf32>
    %1029 = vector.multi_reduction <add>, %1028, %cst_117 [1] : vector<8x128xf32> to vector<8xf32>
    %1030 = vector.shape_cast %1029 : vector<8xf32> to vector<8x1xf32>
    %1031 = vector.broadcast %1026 : vector<1x128xf32> to vector<8x128xf32>
    %1032 = arith.mulf %1031, %1 : vector<8x128xf32>
    %cst_118 = arith.constant dense<0.000000e+00> : vector<8xf32>
    %1033 = vector.multi_reduction <add>, %1032, %cst_118 [1] : vector<8x128xf32> to vector<8xf32>
    %1034 = vector.shape_cast %1033 : vector<8xf32> to vector<8x1xf32>
    %1035 = arith.addf %1030, %1034 : vector<8x1xf32>
    %1036 = vector.broadcast %1035 : vector<8x1xf32> to vector<8x128xf32>
    %1037 = arith.mulf %1036, %11 : vector<8x128xf32>
    %cst_119 = arith.constant dense<0.000000e+00> : vector<128xf32>
    %1038 = vector.multi_reduction <add>, %1037, %cst_119 [0] : vector<8x128xf32> to vector<128xf32>
    %1039 = vector.shape_cast %1038 : vector<128xf32> to vector<1x128xf32>
    %1040 = vector.broadcast %1026 : vector<1x128xf32> to vector<8x128xf32>
    %1041 = arith.mulf %1040, %3 : vector<8x128xf32>
    %cst_120 = arith.constant dense<0.000000e+00> : vector<8xf32>
    %1042 = vector.multi_reduction <add>, %1041, %cst_120 [1] : vector<8x128xf32> to vector<8xf32>
    %1043 = vector.shape_cast %1042 : vector<8xf32> to vector<8x1xf32>
    %1044 = vector.broadcast %838 : vector<1x128xf32> to vector<8x128xf32>
    %1045 = arith.mulf %1044, %2 : vector<8x128xf32>
    %cst_121 = arith.constant dense<0.000000e+00> : vector<8xf32>
    %1046 = vector.multi_reduction <add>, %1045, %cst_121 [1] : vector<8x128xf32> to vector<8xf32>
    %1047 = vector.shape_cast %1046 : vector<8xf32> to vector<8x1xf32>
    %1048 = arith.subf %1043, %1047 : vector<8x1xf32>
    %1049 = vector.broadcast %1010 : vector<8x1xf32> to vector<8x128xf32>
    %1050 = arith.mulf %1049, %5 : vector<8x128xf32>
    %cst_122 = arith.constant dense<0.000000e+00> : vector<128xf32>
    %1051 = vector.multi_reduction <add>, %1050, %cst_122 [0] : vector<8x128xf32> to vector<128xf32>
    %1052 = vector.shape_cast %1051 : vector<128xf32> to vector<1x128xf32>
    %1053 = vector.broadcast %1048 : vector<8x1xf32> to vector<8x128xf32>
    %1054 = arith.mulf %1053, %6 : vector<8x128xf32>
    %cst_123 = arith.constant dense<0.000000e+00> : vector<128xf32>
    %1055 = vector.multi_reduction <add>, %1054, %cst_123 [0] : vector<8x128xf32> to vector<128xf32>
    %1056 = vector.shape_cast %1055 : vector<128xf32> to vector<1x128xf32>
    %1057 = arith.addf %1052, %1056 : vector<1x128xf32>
    %cst_124 = arith.constant 0.000000e+00 : f32
    %1058 = vector.broadcast %cst_124 : f32 to vector<1x128xf32>
    %cst_125 = arith.constant 0.000000e+00 : f32
    %1059 = vector.broadcast %cst_125 : f32 to vector<1x128xf32>
    %cst_126 = arith.constant 0.000000e+00 : f32
    %1060 = vector.broadcast %cst_126 : f32 to vector<1x128xf32>
    %1061 = vector.extract_strided_slice %1057 {offsets = [0, 0], sizes = [1, 1], strides = [1, 1]} : vector<1x128xf32> to vector<1x1xf32>
    %1062 = math.tanh %1061 : vector<1x1xf32>
    %1063 = vector.extract_strided_slice %1057 {offsets = [0, 1], sizes = [1, 1], strides = [1, 1]} : vector<1x128xf32> to vector<1x1xf32>
    %1064 = vector.extract_strided_slice %13 {offsets = [0, 0], sizes = [1, 128], strides = [1, 1]} : vector<8x128xf32> to vector<1x128xf32>
    %1065 = vector.broadcast %1062 : vector<1x1xf32> to vector<1x128xf32>
    %1066 = arith.mulf %1065, %1064 : vector<1x128xf32>
    %1067 = arith.addf %1059, %1066 : vector<1x128xf32>
    %1068 = vector.extract_strided_slice %14 {offsets = [0, 0], sizes = [1, 128], strides = [1, 1]} : vector<8x128xf32> to vector<1x128xf32>
    %1069 = vector.broadcast %1062 : vector<1x1xf32> to vector<1x128xf32>
    %1070 = arith.mulf %1069, %1068 : vector<1x128xf32>
    %1071 = arith.addf %1060, %1070 : vector<1x128xf32>
    %1072 = vector.extract_strided_slice %15 {offsets = [0, 0], sizes = [1, 1], strides = [1, 1]} : vector<8x128xf32> to vector<1x1xf32>
    %1073 = arith.mulf %1062, %1072 : vector<1x1xf32>
    %1074 = arith.addf %1063, %1073 : vector<1x1xf32>
    %1075 = math.tanh %1074 : vector<1x1xf32>
    %1076 = vector.extract_strided_slice %12 {offsets = [0, 0], sizes = [1, 128], strides = [1, 1]} : vector<8x128xf32> to vector<1x128xf32>
    %1077 = vector.broadcast %1062 : vector<1x1xf32> to vector<1x128xf32>
    %1078 = arith.mulf %1077, %1076 : vector<1x128xf32>
    %1079 = arith.addf %1058, %1078 : vector<1x128xf32>
    %1080 = vector.extract_strided_slice %1057 {offsets = [0, 2], sizes = [1, 1], strides = [1, 1]} : vector<1x128xf32> to vector<1x1xf32>
    %1081 = vector.extract_strided_slice %1079 {offsets = [0, 2], sizes = [1, 1], strides = [1, 1]} : vector<1x128xf32> to vector<1x1xf32>
    %1082 = arith.addf %1080, %1081 : vector<1x1xf32>
    %1083 = vector.extract_strided_slice %13 {offsets = [1, 0], sizes = [1, 128], strides = [1, 1]} : vector<8x128xf32> to vector<1x128xf32>
    %1084 = vector.broadcast %1075 : vector<1x1xf32> to vector<1x128xf32>
    %1085 = arith.mulf %1084, %1083 : vector<1x128xf32>
    %1086 = arith.addf %1067, %1085 : vector<1x128xf32>
    %1087 = vector.extract_strided_slice %14 {offsets = [1, 0], sizes = [1, 128], strides = [1, 1]} : vector<8x128xf32> to vector<1x128xf32>
    %1088 = vector.broadcast %1075 : vector<1x1xf32> to vector<1x128xf32>
    %1089 = arith.mulf %1088, %1087 : vector<1x128xf32>
    %1090 = arith.addf %1071, %1089 : vector<1x128xf32>
    %1091 = vector.extract_strided_slice %15 {offsets = [1, 0], sizes = [1, 1], strides = [1, 1]} : vector<8x128xf32> to vector<1x1xf32>
    %1092 = arith.mulf %1075, %1091 : vector<1x1xf32>
    %1093 = arith.addf %1082, %1092 : vector<1x1xf32>
    %1094 = math.tanh %1093 : vector<1x1xf32>
    %1095 = vector.extract_strided_slice %12 {offsets = [1, 0], sizes = [1, 128], strides = [1, 1]} : vector<8x128xf32> to vector<1x128xf32>
    %1096 = vector.broadcast %1075 : vector<1x1xf32> to vector<1x128xf32>
    %1097 = arith.mulf %1096, %1095 : vector<1x128xf32>
    %1098 = arith.addf %1079, %1097 : vector<1x128xf32>
    %1099 = vector.extract_strided_slice %1057 {offsets = [0, 3], sizes = [1, 1], strides = [1, 1]} : vector<1x128xf32> to vector<1x1xf32>
    %1100 = vector.extract_strided_slice %1098 {offsets = [0, 3], sizes = [1, 1], strides = [1, 1]} : vector<1x128xf32> to vector<1x1xf32>
    %1101 = arith.addf %1099, %1100 : vector<1x1xf32>
    %1102 = vector.extract_strided_slice %13 {offsets = [2, 0], sizes = [1, 128], strides = [1, 1]} : vector<8x128xf32> to vector<1x128xf32>
    %1103 = vector.broadcast %1094 : vector<1x1xf32> to vector<1x128xf32>
    %1104 = arith.mulf %1103, %1102 : vector<1x128xf32>
    %1105 = arith.addf %1086, %1104 : vector<1x128xf32>
    %1106 = vector.extract_strided_slice %14 {offsets = [2, 0], sizes = [1, 128], strides = [1, 1]} : vector<8x128xf32> to vector<1x128xf32>
    %1107 = vector.broadcast %1094 : vector<1x1xf32> to vector<1x128xf32>
    %1108 = arith.mulf %1107, %1106 : vector<1x128xf32>
    %1109 = arith.addf %1090, %1108 : vector<1x128xf32>
    %1110 = vector.extract_strided_slice %15 {offsets = [2, 0], sizes = [1, 1], strides = [1, 1]} : vector<8x128xf32> to vector<1x1xf32>
    %1111 = arith.mulf %1094, %1110 : vector<1x1xf32>
    %1112 = arith.addf %1101, %1111 : vector<1x1xf32>
    %1113 = math.tanh %1112 : vector<1x1xf32>
    %1114 = vector.extract_strided_slice %12 {offsets = [2, 0], sizes = [1, 128], strides = [1, 1]} : vector<8x128xf32> to vector<1x128xf32>
    %1115 = vector.broadcast %1094 : vector<1x1xf32> to vector<1x128xf32>
    %1116 = arith.mulf %1115, %1114 : vector<1x128xf32>
    %1117 = arith.addf %1098, %1116 : vector<1x128xf32>
    %1118 = vector.extract_strided_slice %1057 {offsets = [0, 4], sizes = [1, 1], strides = [1, 1]} : vector<1x128xf32> to vector<1x1xf32>
    %1119 = vector.extract_strided_slice %1117 {offsets = [0, 4], sizes = [1, 1], strides = [1, 1]} : vector<1x128xf32> to vector<1x1xf32>
    %1120 = arith.addf %1118, %1119 : vector<1x1xf32>
    %1121 = vector.extract_strided_slice %13 {offsets = [3, 0], sizes = [1, 128], strides = [1, 1]} : vector<8x128xf32> to vector<1x128xf32>
    %1122 = vector.broadcast %1113 : vector<1x1xf32> to vector<1x128xf32>
    %1123 = arith.mulf %1122, %1121 : vector<1x128xf32>
    %1124 = arith.addf %1105, %1123 : vector<1x128xf32>
    %1125 = vector.extract_strided_slice %14 {offsets = [3, 0], sizes = [1, 128], strides = [1, 1]} : vector<8x128xf32> to vector<1x128xf32>
    %1126 = vector.broadcast %1113 : vector<1x1xf32> to vector<1x128xf32>
    %1127 = arith.mulf %1126, %1125 : vector<1x128xf32>
    %1128 = arith.addf %1109, %1127 : vector<1x128xf32>
    %1129 = vector.extract_strided_slice %15 {offsets = [3, 0], sizes = [1, 1], strides = [1, 1]} : vector<8x128xf32> to vector<1x1xf32>
    %1130 = arith.mulf %1113, %1129 : vector<1x1xf32>
    %1131 = arith.addf %1120, %1130 : vector<1x1xf32>
    %1132 = math.tanh %1131 : vector<1x1xf32>
    %1133 = vector.extract_strided_slice %12 {offsets = [3, 0], sizes = [1, 128], strides = [1, 1]} : vector<8x128xf32> to vector<1x128xf32>
    %1134 = vector.broadcast %1113 : vector<1x1xf32> to vector<1x128xf32>
    %1135 = arith.mulf %1134, %1133 : vector<1x128xf32>
    %1136 = arith.addf %1117, %1135 : vector<1x128xf32>
    %1137 = vector.extract_strided_slice %1057 {offsets = [0, 5], sizes = [1, 1], strides = [1, 1]} : vector<1x128xf32> to vector<1x1xf32>
    %1138 = vector.extract_strided_slice %1136 {offsets = [0, 5], sizes = [1, 1], strides = [1, 1]} : vector<1x128xf32> to vector<1x1xf32>
    %1139 = arith.addf %1137, %1138 : vector<1x1xf32>
    %1140 = vector.extract_strided_slice %13 {offsets = [4, 0], sizes = [1, 128], strides = [1, 1]} : vector<8x128xf32> to vector<1x128xf32>
    %1141 = vector.broadcast %1132 : vector<1x1xf32> to vector<1x128xf32>
    %1142 = arith.mulf %1141, %1140 : vector<1x128xf32>
    %1143 = arith.addf %1124, %1142 : vector<1x128xf32>
    %1144 = vector.extract_strided_slice %14 {offsets = [4, 0], sizes = [1, 128], strides = [1, 1]} : vector<8x128xf32> to vector<1x128xf32>
    %1145 = vector.broadcast %1132 : vector<1x1xf32> to vector<1x128xf32>
    %1146 = arith.mulf %1145, %1144 : vector<1x128xf32>
    %1147 = arith.addf %1128, %1146 : vector<1x128xf32>
    %1148 = vector.extract_strided_slice %15 {offsets = [4, 0], sizes = [1, 1], strides = [1, 1]} : vector<8x128xf32> to vector<1x1xf32>
    %1149 = arith.mulf %1132, %1148 : vector<1x1xf32>
    %1150 = arith.addf %1139, %1149 : vector<1x1xf32>
    %1151 = math.tanh %1150 : vector<1x1xf32>
    %1152 = vector.extract_strided_slice %12 {offsets = [4, 0], sizes = [1, 128], strides = [1, 1]} : vector<8x128xf32> to vector<1x128xf32>
    %1153 = vector.broadcast %1132 : vector<1x1xf32> to vector<1x128xf32>
    %1154 = arith.mulf %1153, %1152 : vector<1x128xf32>
    %1155 = arith.addf %1136, %1154 : vector<1x128xf32>
    %1156 = vector.extract_strided_slice %1057 {offsets = [0, 6], sizes = [1, 1], strides = [1, 1]} : vector<1x128xf32> to vector<1x1xf32>
    %1157 = vector.extract_strided_slice %1155 {offsets = [0, 6], sizes = [1, 1], strides = [1, 1]} : vector<1x128xf32> to vector<1x1xf32>
    %1158 = arith.addf %1156, %1157 : vector<1x1xf32>
    %1159 = vector.extract_strided_slice %13 {offsets = [5, 0], sizes = [1, 128], strides = [1, 1]} : vector<8x128xf32> to vector<1x128xf32>
    %1160 = vector.broadcast %1151 : vector<1x1xf32> to vector<1x128xf32>
    %1161 = arith.mulf %1160, %1159 : vector<1x128xf32>
    %1162 = arith.addf %1143, %1161 : vector<1x128xf32>
    %1163 = vector.extract_strided_slice %14 {offsets = [5, 0], sizes = [1, 128], strides = [1, 1]} : vector<8x128xf32> to vector<1x128xf32>
    %1164 = vector.broadcast %1151 : vector<1x1xf32> to vector<1x128xf32>
    %1165 = arith.mulf %1164, %1163 : vector<1x128xf32>
    %1166 = arith.addf %1147, %1165 : vector<1x128xf32>
    %1167 = vector.extract_strided_slice %15 {offsets = [5, 0], sizes = [1, 1], strides = [1, 1]} : vector<8x128xf32> to vector<1x1xf32>
    %1168 = arith.mulf %1151, %1167 : vector<1x1xf32>
    %1169 = arith.addf %1158, %1168 : vector<1x1xf32>
    %1170 = math.tanh %1169 : vector<1x1xf32>
    %1171 = vector.extract_strided_slice %12 {offsets = [5, 0], sizes = [1, 128], strides = [1, 1]} : vector<8x128xf32> to vector<1x128xf32>
    %1172 = vector.broadcast %1151 : vector<1x1xf32> to vector<1x128xf32>
    %1173 = arith.mulf %1172, %1171 : vector<1x128xf32>
    %1174 = arith.addf %1155, %1173 : vector<1x128xf32>
    %1175 = vector.extract_strided_slice %1057 {offsets = [0, 7], sizes = [1, 1], strides = [1, 1]} : vector<1x128xf32> to vector<1x1xf32>
    %1176 = vector.extract_strided_slice %1174 {offsets = [0, 7], sizes = [1, 1], strides = [1, 1]} : vector<1x128xf32> to vector<1x1xf32>
    %1177 = arith.addf %1175, %1176 : vector<1x1xf32>
    %1178 = vector.extract_strided_slice %13 {offsets = [6, 0], sizes = [1, 128], strides = [1, 1]} : vector<8x128xf32> to vector<1x128xf32>
    %1179 = vector.broadcast %1170 : vector<1x1xf32> to vector<1x128xf32>
    %1180 = arith.mulf %1179, %1178 : vector<1x128xf32>
    %1181 = arith.addf %1162, %1180 : vector<1x128xf32>
    %1182 = vector.extract_strided_slice %14 {offsets = [6, 0], sizes = [1, 128], strides = [1, 1]} : vector<8x128xf32> to vector<1x128xf32>
    %1183 = vector.broadcast %1170 : vector<1x1xf32> to vector<1x128xf32>
    %1184 = arith.mulf %1183, %1182 : vector<1x128xf32>
    %1185 = arith.addf %1166, %1184 : vector<1x128xf32>
    %1186 = vector.extract_strided_slice %15 {offsets = [6, 0], sizes = [1, 1], strides = [1, 1]} : vector<8x128xf32> to vector<1x1xf32>
    %1187 = arith.mulf %1170, %1186 : vector<1x1xf32>
    %1188 = arith.addf %1177, %1187 : vector<1x1xf32>
    %1189 = math.tanh %1188 : vector<1x1xf32>
    %1190 = vector.extract_strided_slice %13 {offsets = [7, 0], sizes = [1, 128], strides = [1, 1]} : vector<8x128xf32> to vector<1x128xf32>
    %1191 = vector.broadcast %1189 : vector<1x1xf32> to vector<1x128xf32>
    %1192 = arith.mulf %1191, %1190 : vector<1x128xf32>
    %1193 = arith.addf %1181, %1192 : vector<1x128xf32>
    %1194 = vector.extract_strided_slice %14 {offsets = [7, 0], sizes = [1, 128], strides = [1, 1]} : vector<8x128xf32> to vector<1x128xf32>
    %1195 = vector.broadcast %1189 : vector<1x1xf32> to vector<1x128xf32>
    %1196 = arith.mulf %1195, %1194 : vector<1x128xf32>
    %1197 = arith.addf %1185, %1196 : vector<1x128xf32>
    %1198 = vector.broadcast %1010 : vector<8x1xf32> to vector<8x128xf32>
    %1199 = arith.mulf %1198, %7 : vector<8x128xf32>
    %cst_127 = arith.constant dense<0.000000e+00> : vector<128xf32>
    %1200 = vector.multi_reduction <add>, %1199, %cst_127 [0] : vector<8x128xf32> to vector<128xf32>
    %1201 = vector.shape_cast %1200 : vector<128xf32> to vector<1x128xf32>
    %1202 = arith.addf %1201, %1193 : vector<1x128xf32>
    %1203 = vector.broadcast %1048 : vector<8x1xf32> to vector<8x128xf32>
    %1204 = arith.mulf %1203, %8 : vector<8x128xf32>
    %cst_128 = arith.constant dense<0.000000e+00> : vector<128xf32>
    %1205 = vector.multi_reduction <add>, %1204, %cst_128 [0] : vector<8x128xf32> to vector<128xf32>
    %1206 = vector.shape_cast %1205 : vector<128xf32> to vector<1x128xf32>
    %1207 = arith.addf %1202, %1206 : vector<1x128xf32>
    %1208 = vector.broadcast %1207 : vector<1x128xf32> to vector<8x128xf32>
    %1209 = arith.mulf %1208, %4 : vector<8x128xf32>
    %cst_129 = arith.constant dense<0.000000e+00> : vector<8xf32>
    %1210 = vector.multi_reduction <add>, %1209, %cst_129 [1] : vector<8x128xf32> to vector<8xf32>
    %1211 = vector.shape_cast %1210 : vector<8xf32> to vector<8x1xf32>
    %1212 = vector.broadcast %1010 : vector<8x1xf32> to vector<8x128xf32>
    %1213 = arith.mulf %1212, %9 : vector<8x128xf32>
    %cst_130 = arith.constant dense<0.000000e+00> : vector<128xf32>
    %1214 = vector.multi_reduction <add>, %1213, %cst_130 [0] : vector<8x128xf32> to vector<128xf32>
    %1215 = vector.shape_cast %1214 : vector<128xf32> to vector<1x128xf32>
    %1216 = arith.addf %1215, %1197 : vector<1x128xf32>
    %1217 = vector.broadcast %1048 : vector<8x1xf32> to vector<8x128xf32>
    %1218 = arith.mulf %1217, %10 : vector<8x128xf32>
    %cst_131 = arith.constant dense<0.000000e+00> : vector<128xf32>
    %1219 = vector.multi_reduction <add>, %1218, %cst_131 [0] : vector<8x128xf32> to vector<128xf32>
    %1220 = vector.shape_cast %1219 : vector<128xf32> to vector<1x128xf32>
    %1221 = arith.addf %1216, %1220 : vector<1x128xf32>
    %cst_132 = arith.constant 2.000000e+01 : f32
    %1222 = vector.broadcast %cst_132 : f32 to vector<1x128xf32>
    %1223 = arith.mulf %1222, %1221 : vector<1x128xf32>
    %1224 = arith.addf %1223, %1039 : vector<1x128xf32>
    %1225 = arith.addf %1224, %1207 : vector<1x128xf32>
    %c5_133 = arith.constant 5 : index
    %c0_134 = arith.constant 0 : index
    %1226 = vector.load %arg3[%c5_133, %c0_134] : memref<8x128xf32, #tpu.memory_space<vmem>>, vector<1x128xf32>
    tpu.vector_store %arg3[%c5_133, %c0_134], %1225 {strides = array<i32>} : memref<8x128xf32, #tpu.memory_space<vmem>>, vector<1x128xf32>,
    %c6 = arith.constant 6 : index
    %c0_135 = arith.constant 0 : index
    %1227 = vector.load %arg1[%c6, %c0_135] : memref<8x128xf32, #tpu.memory_space<vmem>>, vector<1x128xf32>
    %1228 = vector.broadcast %1039 : vector<1x128xf32> to vector<8x128xf32>
    %1229 = arith.mulf %1228, %0 : vector<8x128xf32>
    %cst_136 = arith.constant dense<0.000000e+00> : vector<8xf32>
    %1230 = vector.multi_reduction <add>, %1229, %cst_136 [1] : vector<8x128xf32> to vector<8xf32>
    %1231 = vector.shape_cast %1230 : vector<8xf32> to vector<8x1xf32>
    %1232 = vector.broadcast %1227 : vector<1x128xf32> to vector<8x128xf32>
    %1233 = arith.mulf %1232, %1 : vector<8x128xf32>
    %cst_137 = arith.constant dense<0.000000e+00> : vector<8xf32>
    %1234 = vector.multi_reduction <add>, %1233, %cst_137 [1] : vector<8x128xf32> to vector<8xf32>
    %1235 = vector.shape_cast %1234 : vector<8xf32> to vector<8x1xf32>
    %1236 = arith.addf %1231, %1235 : vector<8x1xf32>
    %1237 = vector.broadcast %1236 : vector<8x1xf32> to vector<8x128xf32>
    %1238 = arith.mulf %1237, %11 : vector<8x128xf32>
    %cst_138 = arith.constant dense<0.000000e+00> : vector<128xf32>
    %1239 = vector.multi_reduction <add>, %1238, %cst_138 [0] : vector<8x128xf32> to vector<128xf32>
    %1240 = vector.shape_cast %1239 : vector<128xf32> to vector<1x128xf32>
    %1241 = vector.broadcast %1227 : vector<1x128xf32> to vector<8x128xf32>
    %1242 = arith.mulf %1241, %3 : vector<8x128xf32>
    %cst_139 = arith.constant dense<0.000000e+00> : vector<8xf32>
    %1243 = vector.multi_reduction <add>, %1242, %cst_139 [1] : vector<8x128xf32> to vector<8xf32>
    %1244 = vector.shape_cast %1243 : vector<8xf32> to vector<8x1xf32>
    %1245 = vector.broadcast %1039 : vector<1x128xf32> to vector<8x128xf32>
    %1246 = arith.mulf %1245, %2 : vector<8x128xf32>
    %cst_140 = arith.constant dense<0.000000e+00> : vector<8xf32>
    %1247 = vector.multi_reduction <add>, %1246, %cst_140 [1] : vector<8x128xf32> to vector<8xf32>
    %1248 = vector.shape_cast %1247 : vector<8xf32> to vector<8x1xf32>
    %1249 = arith.subf %1244, %1248 : vector<8x1xf32>
    %1250 = vector.broadcast %1211 : vector<8x1xf32> to vector<8x128xf32>
    %1251 = arith.mulf %1250, %5 : vector<8x128xf32>
    %cst_141 = arith.constant dense<0.000000e+00> : vector<128xf32>
    %1252 = vector.multi_reduction <add>, %1251, %cst_141 [0] : vector<8x128xf32> to vector<128xf32>
    %1253 = vector.shape_cast %1252 : vector<128xf32> to vector<1x128xf32>
    %1254 = vector.broadcast %1249 : vector<8x1xf32> to vector<8x128xf32>
    %1255 = arith.mulf %1254, %6 : vector<8x128xf32>
    %cst_142 = arith.constant dense<0.000000e+00> : vector<128xf32>
    %1256 = vector.multi_reduction <add>, %1255, %cst_142 [0] : vector<8x128xf32> to vector<128xf32>
    %1257 = vector.shape_cast %1256 : vector<128xf32> to vector<1x128xf32>
    %1258 = arith.addf %1253, %1257 : vector<1x128xf32>
    %cst_143 = arith.constant 0.000000e+00 : f32
    %1259 = vector.broadcast %cst_143 : f32 to vector<1x128xf32>
    %cst_144 = arith.constant 0.000000e+00 : f32
    %1260 = vector.broadcast %cst_144 : f32 to vector<1x128xf32>
    %cst_145 = arith.constant 0.000000e+00 : f32
    %1261 = vector.broadcast %cst_145 : f32 to vector<1x128xf32>
    %1262 = vector.extract_strided_slice %1258 {offsets = [0, 0], sizes = [1, 1], strides = [1, 1]} : vector<1x128xf32> to vector<1x1xf32>
    %1263 = math.tanh %1262 : vector<1x1xf32>
    %1264 = vector.extract_strided_slice %1258 {offsets = [0, 1], sizes = [1, 1], strides = [1, 1]} : vector<1x128xf32> to vector<1x1xf32>
    %1265 = vector.extract_strided_slice %13 {offsets = [0, 0], sizes = [1, 128], strides = [1, 1]} : vector<8x128xf32> to vector<1x128xf32>
    %1266 = vector.broadcast %1263 : vector<1x1xf32> to vector<1x128xf32>
    %1267 = arith.mulf %1266, %1265 : vector<1x128xf32>
    %1268 = arith.addf %1260, %1267 : vector<1x128xf32>
    %1269 = vector.extract_strided_slice %14 {offsets = [0, 0], sizes = [1, 128], strides = [1, 1]} : vector<8x128xf32> to vector<1x128xf32>
    %1270 = vector.broadcast %1263 : vector<1x1xf32> to vector<1x128xf32>
    %1271 = arith.mulf %1270, %1269 : vector<1x128xf32>
    %1272 = arith.addf %1261, %1271 : vector<1x128xf32>
    %1273 = vector.extract_strided_slice %15 {offsets = [0, 0], sizes = [1, 1], strides = [1, 1]} : vector<8x128xf32> to vector<1x1xf32>
    %1274 = arith.mulf %1263, %1273 : vector<1x1xf32>
    %1275 = arith.addf %1264, %1274 : vector<1x1xf32>
    %1276 = math.tanh %1275 : vector<1x1xf32>
    %1277 = vector.extract_strided_slice %12 {offsets = [0, 0], sizes = [1, 128], strides = [1, 1]} : vector<8x128xf32> to vector<1x128xf32>
    %1278 = vector.broadcast %1263 : vector<1x1xf32> to vector<1x128xf32>
    %1279 = arith.mulf %1278, %1277 : vector<1x128xf32>
    %1280 = arith.addf %1259, %1279 : vector<1x128xf32>
    %1281 = vector.extract_strided_slice %1258 {offsets = [0, 2], sizes = [1, 1], strides = [1, 1]} : vector<1x128xf32> to vector<1x1xf32>
    %1282 = vector.extract_strided_slice %1280 {offsets = [0, 2], sizes = [1, 1], strides = [1, 1]} : vector<1x128xf32> to vector<1x1xf32>
    %1283 = arith.addf %1281, %1282 : vector<1x1xf32>
    %1284 = vector.extract_strided_slice %13 {offsets = [1, 0], sizes = [1, 128], strides = [1, 1]} : vector<8x128xf32> to vector<1x128xf32>
    %1285 = vector.broadcast %1276 : vector<1x1xf32> to vector<1x128xf32>
    %1286 = arith.mulf %1285, %1284 : vector<1x128xf32>
    %1287 = arith.addf %1268, %1286 : vector<1x128xf32>
    %1288 = vector.extract_strided_slice %14 {offsets = [1, 0], sizes = [1, 128], strides = [1, 1]} : vector<8x128xf32> to vector<1x128xf32>
    %1289 = vector.broadcast %1276 : vector<1x1xf32> to vector<1x128xf32>
    %1290 = arith.mulf %1289, %1288 : vector<1x128xf32>
    %1291 = arith.addf %1272, %1290 : vector<1x128xf32>
    %1292 = vector.extract_strided_slice %15 {offsets = [1, 0], sizes = [1, 1], strides = [1, 1]} : vector<8x128xf32> to vector<1x1xf32>
    %1293 = arith.mulf %1276, %1292 : vector<1x1xf32>
    %1294 = arith.addf %1283, %1293 : vector<1x1xf32>
    %1295 = math.tanh %1294 : vector<1x1xf32>
    %1296 = vector.extract_strided_slice %12 {offsets = [1, 0], sizes = [1, 128], strides = [1, 1]} : vector<8x128xf32> to vector<1x128xf32>
    %1297 = vector.broadcast %1276 : vector<1x1xf32> to vector<1x128xf32>
    %1298 = arith.mulf %1297, %1296 : vector<1x128xf32>
    %1299 = arith.addf %1280, %1298 : vector<1x128xf32>
    %1300 = vector.extract_strided_slice %1258 {offsets = [0, 3], sizes = [1, 1], strides = [1, 1]} : vector<1x128xf32> to vector<1x1xf32>
    %1301 = vector.extract_strided_slice %1299 {offsets = [0, 3], sizes = [1, 1], strides = [1, 1]} : vector<1x128xf32> to vector<1x1xf32>
    %1302 = arith.addf %1300, %1301 : vector<1x1xf32>
    %1303 = vector.extract_strided_slice %13 {offsets = [2, 0], sizes = [1, 128], strides = [1, 1]} : vector<8x128xf32> to vector<1x128xf32>
    %1304 = vector.broadcast %1295 : vector<1x1xf32> to vector<1x128xf32>
    %1305 = arith.mulf %1304, %1303 : vector<1x128xf32>
    %1306 = arith.addf %1287, %1305 : vector<1x128xf32>
    %1307 = vector.extract_strided_slice %14 {offsets = [2, 0], sizes = [1, 128], strides = [1, 1]} : vector<8x128xf32> to vector<1x128xf32>
    %1308 = vector.broadcast %1295 : vector<1x1xf32> to vector<1x128xf32>
    %1309 = arith.mulf %1308, %1307 : vector<1x128xf32>
    %1310 = arith.addf %1291, %1309 : vector<1x128xf32>
    %1311 = vector.extract_strided_slice %15 {offsets = [2, 0], sizes = [1, 1], strides = [1, 1]} : vector<8x128xf32> to vector<1x1xf32>
    %1312 = arith.mulf %1295, %1311 : vector<1x1xf32>
    %1313 = arith.addf %1302, %1312 : vector<1x1xf32>
    %1314 = math.tanh %1313 : vector<1x1xf32>
    %1315 = vector.extract_strided_slice %12 {offsets = [2, 0], sizes = [1, 128], strides = [1, 1]} : vector<8x128xf32> to vector<1x128xf32>
    %1316 = vector.broadcast %1295 : vector<1x1xf32> to vector<1x128xf32>
    %1317 = arith.mulf %1316, %1315 : vector<1x128xf32>
    %1318 = arith.addf %1299, %1317 : vector<1x128xf32>
    %1319 = vector.extract_strided_slice %1258 {offsets = [0, 4], sizes = [1, 1], strides = [1, 1]} : vector<1x128xf32> to vector<1x1xf32>
    %1320 = vector.extract_strided_slice %1318 {offsets = [0, 4], sizes = [1, 1], strides = [1, 1]} : vector<1x128xf32> to vector<1x1xf32>
    %1321 = arith.addf %1319, %1320 : vector<1x1xf32>
    %1322 = vector.extract_strided_slice %13 {offsets = [3, 0], sizes = [1, 128], strides = [1, 1]} : vector<8x128xf32> to vector<1x128xf32>
    %1323 = vector.broadcast %1314 : vector<1x1xf32> to vector<1x128xf32>
    %1324 = arith.mulf %1323, %1322 : vector<1x128xf32>
    %1325 = arith.addf %1306, %1324 : vector<1x128xf32>
    %1326 = vector.extract_strided_slice %14 {offsets = [3, 0], sizes = [1, 128], strides = [1, 1]} : vector<8x128xf32> to vector<1x128xf32>
    %1327 = vector.broadcast %1314 : vector<1x1xf32> to vector<1x128xf32>
    %1328 = arith.mulf %1327, %1326 : vector<1x128xf32>
    %1329 = arith.addf %1310, %1328 : vector<1x128xf32>
    %1330 = vector.extract_strided_slice %15 {offsets = [3, 0], sizes = [1, 1], strides = [1, 1]} : vector<8x128xf32> to vector<1x1xf32>
    %1331 = arith.mulf %1314, %1330 : vector<1x1xf32>
    %1332 = arith.addf %1321, %1331 : vector<1x1xf32>
    %1333 = math.tanh %1332 : vector<1x1xf32>
    %1334 = vector.extract_strided_slice %12 {offsets = [3, 0], sizes = [1, 128], strides = [1, 1]} : vector<8x128xf32> to vector<1x128xf32>
    %1335 = vector.broadcast %1314 : vector<1x1xf32> to vector<1x128xf32>
    %1336 = arith.mulf %1335, %1334 : vector<1x128xf32>
    %1337 = arith.addf %1318, %1336 : vector<1x128xf32>
    %1338 = vector.extract_strided_slice %1258 {offsets = [0, 5], sizes = [1, 1], strides = [1, 1]} : vector<1x128xf32> to vector<1x1xf32>
    %1339 = vector.extract_strided_slice %1337 {offsets = [0, 5], sizes = [1, 1], strides = [1, 1]} : vector<1x128xf32> to vector<1x1xf32>
    %1340 = arith.addf %1338, %1339 : vector<1x1xf32>
    %1341 = vector.extract_strided_slice %13 {offsets = [4, 0], sizes = [1, 128], strides = [1, 1]} : vector<8x128xf32> to vector<1x128xf32>
    %1342 = vector.broadcast %1333 : vector<1x1xf32> to vector<1x128xf32>
    %1343 = arith.mulf %1342, %1341 : vector<1x128xf32>
    %1344 = arith.addf %1325, %1343 : vector<1x128xf32>
    %1345 = vector.extract_strided_slice %14 {offsets = [4, 0], sizes = [1, 128], strides = [1, 1]} : vector<8x128xf32> to vector<1x128xf32>
    %1346 = vector.broadcast %1333 : vector<1x1xf32> to vector<1x128xf32>
    %1347 = arith.mulf %1346, %1345 : vector<1x128xf32>
    %1348 = arith.addf %1329, %1347 : vector<1x128xf32>
    %1349 = vector.extract_strided_slice %15 {offsets = [4, 0], sizes = [1, 1], strides = [1, 1]} : vector<8x128xf32> to vector<1x1xf32>
    %1350 = arith.mulf %1333, %1349 : vector<1x1xf32>
    %1351 = arith.addf %1340, %1350 : vector<1x1xf32>
    %1352 = math.tanh %1351 : vector<1x1xf32>
    %1353 = vector.extract_strided_slice %12 {offsets = [4, 0], sizes = [1, 128], strides = [1, 1]} : vector<8x128xf32> to vector<1x128xf32>
    %1354 = vector.broadcast %1333 : vector<1x1xf32> to vector<1x128xf32>
    %1355 = arith.mulf %1354, %1353 : vector<1x128xf32>
    %1356 = arith.addf %1337, %1355 : vector<1x128xf32>
    %1357 = vector.extract_strided_slice %1258 {offsets = [0, 6], sizes = [1, 1], strides = [1, 1]} : vector<1x128xf32> to vector<1x1xf32>
    %1358 = vector.extract_strided_slice %1356 {offsets = [0, 6], sizes = [1, 1], strides = [1, 1]} : vector<1x128xf32> to vector<1x1xf32>
    %1359 = arith.addf %1357, %1358 : vector<1x1xf32>
    %1360 = vector.extract_strided_slice %13 {offsets = [5, 0], sizes = [1, 128], strides = [1, 1]} : vector<8x128xf32> to vector<1x128xf32>
    %1361 = vector.broadcast %1352 : vector<1x1xf32> to vector<1x128xf32>
    %1362 = arith.mulf %1361, %1360 : vector<1x128xf32>
    %1363 = arith.addf %1344, %1362 : vector<1x128xf32>
    %1364 = vector.extract_strided_slice %14 {offsets = [5, 0], sizes = [1, 128], strides = [1, 1]} : vector<8x128xf32> to vector<1x128xf32>
    %1365 = vector.broadcast %1352 : vector<1x1xf32> to vector<1x128xf32>
    %1366 = arith.mulf %1365, %1364 : vector<1x128xf32>
    %1367 = arith.addf %1348, %1366 : vector<1x128xf32>
    %1368 = vector.extract_strided_slice %15 {offsets = [5, 0], sizes = [1, 1], strides = [1, 1]} : vector<8x128xf32> to vector<1x1xf32>
    %1369 = arith.mulf %1352, %1368 : vector<1x1xf32>
    %1370 = arith.addf %1359, %1369 : vector<1x1xf32>
    %1371 = math.tanh %1370 : vector<1x1xf32>
    %1372 = vector.extract_strided_slice %12 {offsets = [5, 0], sizes = [1, 128], strides = [1, 1]} : vector<8x128xf32> to vector<1x128xf32>
    %1373 = vector.broadcast %1352 : vector<1x1xf32> to vector<1x128xf32>
    %1374 = arith.mulf %1373, %1372 : vector<1x128xf32>
    %1375 = arith.addf %1356, %1374 : vector<1x128xf32>
    %1376 = vector.extract_strided_slice %1258 {offsets = [0, 7], sizes = [1, 1], strides = [1, 1]} : vector<1x128xf32> to vector<1x1xf32>
    %1377 = vector.extract_strided_slice %1375 {offsets = [0, 7], sizes = [1, 1], strides = [1, 1]} : vector<1x128xf32> to vector<1x1xf32>
    %1378 = arith.addf %1376, %1377 : vector<1x1xf32>
    %1379 = vector.extract_strided_slice %13 {offsets = [6, 0], sizes = [1, 128], strides = [1, 1]} : vector<8x128xf32> to vector<1x128xf32>
    %1380 = vector.broadcast %1371 : vector<1x1xf32> to vector<1x128xf32>
    %1381 = arith.mulf %1380, %1379 : vector<1x128xf32>
    %1382 = arith.addf %1363, %1381 : vector<1x128xf32>
    %1383 = vector.extract_strided_slice %14 {offsets = [6, 0], sizes = [1, 128], strides = [1, 1]} : vector<8x128xf32> to vector<1x128xf32>
    %1384 = vector.broadcast %1371 : vector<1x1xf32> to vector<1x128xf32>
    %1385 = arith.mulf %1384, %1383 : vector<1x128xf32>
    %1386 = arith.addf %1367, %1385 : vector<1x128xf32>
    %1387 = vector.extract_strided_slice %15 {offsets = [6, 0], sizes = [1, 1], strides = [1, 1]} : vector<8x128xf32> to vector<1x1xf32>
    %1388 = arith.mulf %1371, %1387 : vector<1x1xf32>
    %1389 = arith.addf %1378, %1388 : vector<1x1xf32>
    %1390 = math.tanh %1389 : vector<1x1xf32>
    %1391 = vector.extract_strided_slice %13 {offsets = [7, 0], sizes = [1, 128], strides = [1, 1]} : vector<8x128xf32> to vector<1x128xf32>
    %1392 = vector.broadcast %1390 : vector<1x1xf32> to vector<1x128xf32>
    %1393 = arith.mulf %1392, %1391 : vector<1x128xf32>
    %1394 = arith.addf %1382, %1393 : vector<1x128xf32>
    %1395 = vector.extract_strided_slice %14 {offsets = [7, 0], sizes = [1, 128], strides = [1, 1]} : vector<8x128xf32> to vector<1x128xf32>
    %1396 = vector.broadcast %1390 : vector<1x1xf32> to vector<1x128xf32>
    %1397 = arith.mulf %1396, %1395 : vector<1x128xf32>
    %1398 = arith.addf %1386, %1397 : vector<1x128xf32>
    %1399 = vector.broadcast %1211 : vector<8x1xf32> to vector<8x128xf32>
    %1400 = arith.mulf %1399, %7 : vector<8x128xf32>
    %cst_146 = arith.constant dense<0.000000e+00> : vector<128xf32>
    %1401 = vector.multi_reduction <add>, %1400, %cst_146 [0] : vector<8x128xf32> to vector<128xf32>
    %1402 = vector.shape_cast %1401 : vector<128xf32> to vector<1x128xf32>
    %1403 = arith.addf %1402, %1394 : vector<1x128xf32>
    %1404 = vector.broadcast %1249 : vector<8x1xf32> to vector<8x128xf32>
    %1405 = arith.mulf %1404, %8 : vector<8x128xf32>
    %cst_147 = arith.constant dense<0.000000e+00> : vector<128xf32>
    %1406 = vector.multi_reduction <add>, %1405, %cst_147 [0] : vector<8x128xf32> to vector<128xf32>
    %1407 = vector.shape_cast %1406 : vector<128xf32> to vector<1x128xf32>
    %1408 = arith.addf %1403, %1407 : vector<1x128xf32>
    %1409 = vector.broadcast %1408 : vector<1x128xf32> to vector<8x128xf32>
    %1410 = arith.mulf %1409, %4 : vector<8x128xf32>
    %cst_148 = arith.constant dense<0.000000e+00> : vector<8xf32>
    %1411 = vector.multi_reduction <add>, %1410, %cst_148 [1] : vector<8x128xf32> to vector<8xf32>
    %1412 = vector.shape_cast %1411 : vector<8xf32> to vector<8x1xf32>
    %1413 = vector.broadcast %1211 : vector<8x1xf32> to vector<8x128xf32>
    %1414 = arith.mulf %1413, %9 : vector<8x128xf32>
    %cst_149 = arith.constant dense<0.000000e+00> : vector<128xf32>
    %1415 = vector.multi_reduction <add>, %1414, %cst_149 [0] : vector<8x128xf32> to vector<128xf32>
    %1416 = vector.shape_cast %1415 : vector<128xf32> to vector<1x128xf32>
    %1417 = arith.addf %1416, %1398 : vector<1x128xf32>
    %1418 = vector.broadcast %1249 : vector<8x1xf32> to vector<8x128xf32>
    %1419 = arith.mulf %1418, %10 : vector<8x128xf32>
    %cst_150 = arith.constant dense<0.000000e+00> : vector<128xf32>
    %1420 = vector.multi_reduction <add>, %1419, %cst_150 [0] : vector<8x128xf32> to vector<128xf32>
    %1421 = vector.shape_cast %1420 : vector<128xf32> to vector<1x128xf32>
    %1422 = arith.addf %1417, %1421 : vector<1x128xf32>
    %cst_151 = arith.constant 2.000000e+01 : f32
    %1423 = vector.broadcast %cst_151 : f32 to vector<1x128xf32>
    %1424 = arith.mulf %1423, %1422 : vector<1x128xf32>
    %1425 = arith.addf %1424, %1240 : vector<1x128xf32>
    %1426 = arith.addf %1425, %1408 : vector<1x128xf32>
    %c6_152 = arith.constant 6 : index
    %c0_153 = arith.constant 0 : index
    %1427 = vector.load %arg3[%c6_152, %c0_153] : memref<8x128xf32, #tpu.memory_space<vmem>>, vector<1x128xf32>
    tpu.vector_store %arg3[%c6_152, %c0_153], %1426 {strides = array<i32>} : memref<8x128xf32, #tpu.memory_space<vmem>>, vector<1x128xf32>,
    %c7 = arith.constant 7 : index
    %c0_154 = arith.constant 0 : index
    %1428 = vector.load %arg1[%c7, %c0_154] : memref<8x128xf32, #tpu.memory_space<vmem>>, vector<1x128xf32>
    %1429 = vector.broadcast %1240 : vector<1x128xf32> to vector<8x128xf32>
    %1430 = arith.mulf %1429, %0 : vector<8x128xf32>
    %cst_155 = arith.constant dense<0.000000e+00> : vector<8xf32>
    %1431 = vector.multi_reduction <add>, %1430, %cst_155 [1] : vector<8x128xf32> to vector<8xf32>
    %1432 = vector.shape_cast %1431 : vector<8xf32> to vector<8x1xf32>
    %1433 = vector.broadcast %1428 : vector<1x128xf32> to vector<8x128xf32>
    %1434 = arith.mulf %1433, %1 : vector<8x128xf32>
    %cst_156 = arith.constant dense<0.000000e+00> : vector<8xf32>
    %1435 = vector.multi_reduction <add>, %1434, %cst_156 [1] : vector<8x128xf32> to vector<8xf32>
    %1436 = vector.shape_cast %1435 : vector<8xf32> to vector<8x1xf32>
    %1437 = arith.addf %1432, %1436 : vector<8x1xf32>
    %1438 = vector.broadcast %1437 : vector<8x1xf32> to vector<8x128xf32>
    %1439 = arith.mulf %1438, %11 : vector<8x128xf32>
    %cst_157 = arith.constant dense<0.000000e+00> : vector<128xf32>
    %1440 = vector.multi_reduction <add>, %1439, %cst_157 [0] : vector<8x128xf32> to vector<128xf32>
    %1441 = vector.shape_cast %1440 : vector<128xf32> to vector<1x128xf32>
    %1442 = vector.broadcast %1428 : vector<1x128xf32> to vector<8x128xf32>
    %1443 = arith.mulf %1442, %3 : vector<8x128xf32>
    %cst_158 = arith.constant dense<0.000000e+00> : vector<8xf32>
    %1444 = vector.multi_reduction <add>, %1443, %cst_158 [1] : vector<8x128xf32> to vector<8xf32>
    %1445 = vector.shape_cast %1444 : vector<8xf32> to vector<8x1xf32>
    %1446 = vector.broadcast %1240 : vector<1x128xf32> to vector<8x128xf32>
    %1447 = arith.mulf %1446, %2 : vector<8x128xf32>
    %cst_159 = arith.constant dense<0.000000e+00> : vector<8xf32>
    %1448 = vector.multi_reduction <add>, %1447, %cst_159 [1] : vector<8x128xf32> to vector<8xf32>
    %1449 = vector.shape_cast %1448 : vector<8xf32> to vector<8x1xf32>
    %1450 = arith.subf %1445, %1449 : vector<8x1xf32>
    %1451 = vector.broadcast %1412 : vector<8x1xf32> to vector<8x128xf32>
    %1452 = arith.mulf %1451, %5 : vector<8x128xf32>
    %cst_160 = arith.constant dense<0.000000e+00> : vector<128xf32>
    %1453 = vector.multi_reduction <add>, %1452, %cst_160 [0] : vector<8x128xf32> to vector<128xf32>
    %1454 = vector.shape_cast %1453 : vector<128xf32> to vector<1x128xf32>
    %1455 = vector.broadcast %1450 : vector<8x1xf32> to vector<8x128xf32>
    %1456 = arith.mulf %1455, %6 : vector<8x128xf32>
    %cst_161 = arith.constant dense<0.000000e+00> : vector<128xf32>
    %1457 = vector.multi_reduction <add>, %1456, %cst_161 [0] : vector<8x128xf32> to vector<128xf32>
    %1458 = vector.shape_cast %1457 : vector<128xf32> to vector<1x128xf32>
    %1459 = arith.addf %1454, %1458 : vector<1x128xf32>
    %cst_162 = arith.constant 0.000000e+00 : f32
    %1460 = vector.broadcast %cst_162 : f32 to vector<1x128xf32>
    %cst_163 = arith.constant 0.000000e+00 : f32
    %1461 = vector.broadcast %cst_163 : f32 to vector<1x128xf32>
    %cst_164 = arith.constant 0.000000e+00 : f32
    %1462 = vector.broadcast %cst_164 : f32 to vector<1x128xf32>
    %1463 = vector.extract_strided_slice %1459 {offsets = [0, 0], sizes = [1, 1], strides = [1, 1]} : vector<1x128xf32> to vector<1x1xf32>
    %1464 = math.tanh %1463 : vector<1x1xf32>
    %1465 = vector.extract_strided_slice %1459 {offsets = [0, 1], sizes = [1, 1], strides = [1, 1]} : vector<1x128xf32> to vector<1x1xf32>
    %1466 = vector.extract_strided_slice %13 {offsets = [0, 0], sizes = [1, 128], strides = [1, 1]} : vector<8x128xf32> to vector<1x128xf32>
    %1467 = vector.broadcast %1464 : vector<1x1xf32> to vector<1x128xf32>
    %1468 = arith.mulf %1467, %1466 : vector<1x128xf32>
    %1469 = arith.addf %1461, %1468 : vector<1x128xf32>
    %1470 = vector.extract_strided_slice %14 {offsets = [0, 0], sizes = [1, 128], strides = [1, 1]} : vector<8x128xf32> to vector<1x128xf32>
    %1471 = vector.broadcast %1464 : vector<1x1xf32> to vector<1x128xf32>
    %1472 = arith.mulf %1471, %1470 : vector<1x128xf32>
    %1473 = arith.addf %1462, %1472 : vector<1x128xf32>
    %1474 = vector.extract_strided_slice %15 {offsets = [0, 0], sizes = [1, 1], strides = [1, 1]} : vector<8x128xf32> to vector<1x1xf32>
    %1475 = arith.mulf %1464, %1474 : vector<1x1xf32>
    %1476 = arith.addf %1465, %1475 : vector<1x1xf32>
    %1477 = math.tanh %1476 : vector<1x1xf32>
    %1478 = vector.extract_strided_slice %12 {offsets = [0, 0], sizes = [1, 128], strides = [1, 1]} : vector<8x128xf32> to vector<1x128xf32>
    %1479 = vector.broadcast %1464 : vector<1x1xf32> to vector<1x128xf32>
    %1480 = arith.mulf %1479, %1478 : vector<1x128xf32>
    %1481 = arith.addf %1460, %1480 : vector<1x128xf32>
    %1482 = vector.extract_strided_slice %1459 {offsets = [0, 2], sizes = [1, 1], strides = [1, 1]} : vector<1x128xf32> to vector<1x1xf32>
    %1483 = vector.extract_strided_slice %1481 {offsets = [0, 2], sizes = [1, 1], strides = [1, 1]} : vector<1x128xf32> to vector<1x1xf32>
    %1484 = arith.addf %1482, %1483 : vector<1x1xf32>
    %1485 = vector.extract_strided_slice %13 {offsets = [1, 0], sizes = [1, 128], strides = [1, 1]} : vector<8x128xf32> to vector<1x128xf32>
    %1486 = vector.broadcast %1477 : vector<1x1xf32> to vector<1x128xf32>
    %1487 = arith.mulf %1486, %1485 : vector<1x128xf32>
    %1488 = arith.addf %1469, %1487 : vector<1x128xf32>
    %1489 = vector.extract_strided_slice %14 {offsets = [1, 0], sizes = [1, 128], strides = [1, 1]} : vector<8x128xf32> to vector<1x128xf32>
    %1490 = vector.broadcast %1477 : vector<1x1xf32> to vector<1x128xf32>
    %1491 = arith.mulf %1490, %1489 : vector<1x128xf32>
    %1492 = arith.addf %1473, %1491 : vector<1x128xf32>
    %1493 = vector.extract_strided_slice %15 {offsets = [1, 0], sizes = [1, 1], strides = [1, 1]} : vector<8x128xf32> to vector<1x1xf32>
    %1494 = arith.mulf %1477, %1493 : vector<1x1xf32>
    %1495 = arith.addf %1484, %1494 : vector<1x1xf32>
    %1496 = math.tanh %1495 : vector<1x1xf32>
    %1497 = vector.extract_strided_slice %12 {offsets = [1, 0], sizes = [1, 128], strides = [1, 1]} : vector<8x128xf32> to vector<1x128xf32>
    %1498 = vector.broadcast %1477 : vector<1x1xf32> to vector<1x128xf32>
    %1499 = arith.mulf %1498, %1497 : vector<1x128xf32>
    %1500 = arith.addf %1481, %1499 : vector<1x128xf32>
    %1501 = vector.extract_strided_slice %1459 {offsets = [0, 3], sizes = [1, 1], strides = [1, 1]} : vector<1x128xf32> to vector<1x1xf32>
    %1502 = vector.extract_strided_slice %1500 {offsets = [0, 3], sizes = [1, 1], strides = [1, 1]} : vector<1x128xf32> to vector<1x1xf32>
    %1503 = arith.addf %1501, %1502 : vector<1x1xf32>
    %1504 = vector.extract_strided_slice %13 {offsets = [2, 0], sizes = [1, 128], strides = [1, 1]} : vector<8x128xf32> to vector<1x128xf32>
    %1505 = vector.broadcast %1496 : vector<1x1xf32> to vector<1x128xf32>
    %1506 = arith.mulf %1505, %1504 : vector<1x128xf32>
    %1507 = arith.addf %1488, %1506 : vector<1x128xf32>
    %1508 = vector.extract_strided_slice %14 {offsets = [2, 0], sizes = [1, 128], strides = [1, 1]} : vector<8x128xf32> to vector<1x128xf32>
    %1509 = vector.broadcast %1496 : vector<1x1xf32> to vector<1x128xf32>
    %1510 = arith.mulf %1509, %1508 : vector<1x128xf32>
    %1511 = arith.addf %1492, %1510 : vector<1x128xf32>
    %1512 = vector.extract_strided_slice %15 {offsets = [2, 0], sizes = [1, 1], strides = [1, 1]} : vector<8x128xf32> to vector<1x1xf32>
    %1513 = arith.mulf %1496, %1512 : vector<1x1xf32>
    %1514 = arith.addf %1503, %1513 : vector<1x1xf32>
    %1515 = math.tanh %1514 : vector<1x1xf32>
    %1516 = vector.extract_strided_slice %12 {offsets = [2, 0], sizes = [1, 128], strides = [1, 1]} : vector<8x128xf32> to vector<1x128xf32>
    %1517 = vector.broadcast %1496 : vector<1x1xf32> to vector<1x128xf32>
    %1518 = arith.mulf %1517, %1516 : vector<1x128xf32>
    %1519 = arith.addf %1500, %1518 : vector<1x128xf32>
    %1520 = vector.extract_strided_slice %1459 {offsets = [0, 4], sizes = [1, 1], strides = [1, 1]} : vector<1x128xf32> to vector<1x1xf32>
    %1521 = vector.extract_strided_slice %1519 {offsets = [0, 4], sizes = [1, 1], strides = [1, 1]} : vector<1x128xf32> to vector<1x1xf32>
    %1522 = arith.addf %1520, %1521 : vector<1x1xf32>
    %1523 = vector.extract_strided_slice %13 {offsets = [3, 0], sizes = [1, 128], strides = [1, 1]} : vector<8x128xf32> to vector<1x128xf32>
    %1524 = vector.broadcast %1515 : vector<1x1xf32> to vector<1x128xf32>
    %1525 = arith.mulf %1524, %1523 : vector<1x128xf32>
    %1526 = arith.addf %1507, %1525 : vector<1x128xf32>
    %1527 = vector.extract_strided_slice %14 {offsets = [3, 0], sizes = [1, 128], strides = [1, 1]} : vector<8x128xf32> to vector<1x128xf32>
    %1528 = vector.broadcast %1515 : vector<1x1xf32> to vector<1x128xf32>
    %1529 = arith.mulf %1528, %1527 : vector<1x128xf32>
    %1530 = arith.addf %1511, %1529 : vector<1x128xf32>
    %1531 = vector.extract_strided_slice %15 {offsets = [3, 0], sizes = [1, 1], strides = [1, 1]} : vector<8x128xf32> to vector<1x1xf32>
    %1532 = arith.mulf %1515, %1531 : vector<1x1xf32>
    %1533 = arith.addf %1522, %1532 : vector<1x1xf32>
    %1534 = math.tanh %1533 : vector<1x1xf32>
    %1535 = vector.extract_strided_slice %12 {offsets = [3, 0], sizes = [1, 128], strides = [1, 1]} : vector<8x128xf32> to vector<1x128xf32>
    %1536 = vector.broadcast %1515 : vector<1x1xf32> to vector<1x128xf32>
    %1537 = arith.mulf %1536, %1535 : vector<1x128xf32>
    %1538 = arith.addf %1519, %1537 : vector<1x128xf32>
    %1539 = vector.extract_strided_slice %1459 {offsets = [0, 5], sizes = [1, 1], strides = [1, 1]} : vector<1x128xf32> to vector<1x1xf32>
    %1540 = vector.extract_strided_slice %1538 {offsets = [0, 5], sizes = [1, 1], strides = [1, 1]} : vector<1x128xf32> to vector<1x1xf32>
    %1541 = arith.addf %1539, %1540 : vector<1x1xf32>
    %1542 = vector.extract_strided_slice %13 {offsets = [4, 0], sizes = [1, 128], strides = [1, 1]} : vector<8x128xf32> to vector<1x128xf32>
    %1543 = vector.broadcast %1534 : vector<1x1xf32> to vector<1x128xf32>
    %1544 = arith.mulf %1543, %1542 : vector<1x128xf32>
    %1545 = arith.addf %1526, %1544 : vector<1x128xf32>
    %1546 = vector.extract_strided_slice %14 {offsets = [4, 0], sizes = [1, 128], strides = [1, 1]} : vector<8x128xf32> to vector<1x128xf32>
    %1547 = vector.broadcast %1534 : vector<1x1xf32> to vector<1x128xf32>
    %1548 = arith.mulf %1547, %1546 : vector<1x128xf32>
    %1549 = arith.addf %1530, %1548 : vector<1x128xf32>
    %1550 = vector.extract_strided_slice %15 {offsets = [4, 0], sizes = [1, 1], strides = [1, 1]} : vector<8x128xf32> to vector<1x1xf32>
    %1551 = arith.mulf %1534, %1550 : vector<1x1xf32>
    %1552 = arith.addf %1541, %1551 : vector<1x1xf32>
    %1553 = math.tanh %1552 : vector<1x1xf32>
    %1554 = vector.extract_strided_slice %12 {offsets = [4, 0], sizes = [1, 128], strides = [1, 1]} : vector<8x128xf32> to vector<1x128xf32>
    %1555 = vector.broadcast %1534 : vector<1x1xf32> to vector<1x128xf32>
    %1556 = arith.mulf %1555, %1554 : vector<1x128xf32>
    %1557 = arith.addf %1538, %1556 : vector<1x128xf32>
    %1558 = vector.extract_strided_slice %1459 {offsets = [0, 6], sizes = [1, 1], strides = [1, 1]} : vector<1x128xf32> to vector<1x1xf32>
    %1559 = vector.extract_strided_slice %1557 {offsets = [0, 6], sizes = [1, 1], strides = [1, 1]} : vector<1x128xf32> to vector<1x1xf32>
    %1560 = arith.addf %1558, %1559 : vector<1x1xf32>
    %1561 = vector.extract_strided_slice %13 {offsets = [5, 0], sizes = [1, 128], strides = [1, 1]} : vector<8x128xf32> to vector<1x128xf32>
    %1562 = vector.broadcast %1553 : vector<1x1xf32> to vector<1x128xf32>
    %1563 = arith.mulf %1562, %1561 : vector<1x128xf32>
    %1564 = arith.addf %1545, %1563 : vector<1x128xf32>
    %1565 = vector.extract_strided_slice %14 {offsets = [5, 0], sizes = [1, 128], strides = [1, 1]} : vector<8x128xf32> to vector<1x128xf32>
    %1566 = vector.broadcast %1553 : vector<1x1xf32> to vector<1x128xf32>
    %1567 = arith.mulf %1566, %1565 : vector<1x128xf32>
    %1568 = arith.addf %1549, %1567 : vector<1x128xf32>
    %1569 = vector.extract_strided_slice %15 {offsets = [5, 0], sizes = [1, 1], strides = [1, 1]} : vector<8x128xf32> to vector<1x1xf32>
    %1570 = arith.mulf %1553, %1569 : vector<1x1xf32>
    %1571 = arith.addf %1560, %1570 : vector<1x1xf32>
    %1572 = math.tanh %1571 : vector<1x1xf32>
    %1573 = vector.extract_strided_slice %12 {offsets = [5, 0], sizes = [1, 128], strides = [1, 1]} : vector<8x128xf32> to vector<1x128xf32>
    %1574 = vector.broadcast %1553 : vector<1x1xf32> to vector<1x128xf32>
    %1575 = arith.mulf %1574, %1573 : vector<1x128xf32>
    %1576 = arith.addf %1557, %1575 : vector<1x128xf32>
    %1577 = vector.extract_strided_slice %1459 {offsets = [0, 7], sizes = [1, 1], strides = [1, 1]} : vector<1x128xf32> to vector<1x1xf32>
    %1578 = vector.extract_strided_slice %1576 {offsets = [0, 7], sizes = [1, 1], strides = [1, 1]} : vector<1x128xf32> to vector<1x1xf32>
    %1579 = arith.addf %1577, %1578 : vector<1x1xf32>
    %1580 = vector.extract_strided_slice %13 {offsets = [6, 0], sizes = [1, 128], strides = [1, 1]} : vector<8x128xf32> to vector<1x128xf32>
    %1581 = vector.broadcast %1572 : vector<1x1xf32> to vector<1x128xf32>
    %1582 = arith.mulf %1581, %1580 : vector<1x128xf32>
    %1583 = arith.addf %1564, %1582 : vector<1x128xf32>
    %1584 = vector.extract_strided_slice %14 {offsets = [6, 0], sizes = [1, 128], strides = [1, 1]} : vector<8x128xf32> to vector<1x128xf32>
    %1585 = vector.broadcast %1572 : vector<1x1xf32> to vector<1x128xf32>
    %1586 = arith.mulf %1585, %1584 : vector<1x128xf32>
    %1587 = arith.addf %1568, %1586 : vector<1x128xf32>
    %1588 = vector.extract_strided_slice %15 {offsets = [6, 0], sizes = [1, 1], strides = [1, 1]} : vector<8x128xf32> to vector<1x1xf32>
    %1589 = arith.mulf %1572, %1588 : vector<1x1xf32>
    %1590 = arith.addf %1579, %1589 : vector<1x1xf32>
    %1591 = math.tanh %1590 : vector<1x1xf32>
    %1592 = vector.extract_strided_slice %13 {offsets = [7, 0], sizes = [1, 128], strides = [1, 1]} : vector<8x128xf32> to vector<1x128xf32>
    %1593 = vector.broadcast %1591 : vector<1x1xf32> to vector<1x128xf32>
    %1594 = arith.mulf %1593, %1592 : vector<1x128xf32>
    %1595 = arith.addf %1583, %1594 : vector<1x128xf32>
    %1596 = vector.extract_strided_slice %14 {offsets = [7, 0], sizes = [1, 128], strides = [1, 1]} : vector<8x128xf32> to vector<1x128xf32>
    %1597 = vector.broadcast %1591 : vector<1x1xf32> to vector<1x128xf32>
    %1598 = arith.mulf %1597, %1596 : vector<1x128xf32>
    %1599 = arith.addf %1587, %1598 : vector<1x128xf32>
    %1600 = vector.broadcast %1412 : vector<8x1xf32> to vector<8x128xf32>
    %1601 = arith.mulf %1600, %7 : vector<8x128xf32>
    %cst_165 = arith.constant dense<0.000000e+00> : vector<128xf32>
    %1602 = vector.multi_reduction <add>, %1601, %cst_165 [0] : vector<8x128xf32> to vector<128xf32>
    %1603 = vector.shape_cast %1602 : vector<128xf32> to vector<1x128xf32>
    %1604 = arith.addf %1603, %1595 : vector<1x128xf32>
    %1605 = vector.broadcast %1450 : vector<8x1xf32> to vector<8x128xf32>
    %1606 = arith.mulf %1605, %8 : vector<8x128xf32>
    %cst_166 = arith.constant dense<0.000000e+00> : vector<128xf32>
    %1607 = vector.multi_reduction <add>, %1606, %cst_166 [0] : vector<8x128xf32> to vector<128xf32>
    %1608 = vector.shape_cast %1607 : vector<128xf32> to vector<1x128xf32>
    %1609 = arith.addf %1604, %1608 : vector<1x128xf32>
    %1610 = vector.broadcast %1609 : vector<1x128xf32> to vector<8x128xf32>
    %1611 = arith.mulf %1610, %4 : vector<8x128xf32>
    %cst_167 = arith.constant dense<0.000000e+00> : vector<8xf32>
    %1612 = vector.multi_reduction <add>, %1611, %cst_167 [1] : vector<8x128xf32> to vector<8xf32>
    %1613 = vector.shape_cast %1612 : vector<8xf32> to vector<8x1xf32>
    %1614 = vector.broadcast %1412 : vector<8x1xf32> to vector<8x128xf32>
    %1615 = arith.mulf %1614, %9 : vector<8x128xf32>
    %cst_168 = arith.constant dense<0.000000e+00> : vector<128xf32>
    %1616 = vector.multi_reduction <add>, %1615, %cst_168 [0] : vector<8x128xf32> to vector<128xf32>
    %1617 = vector.shape_cast %1616 : vector<128xf32> to vector<1x128xf32>
    %1618 = arith.addf %1617, %1599 : vector<1x128xf32>
    %1619 = vector.broadcast %1450 : vector<8x1xf32> to vector<8x128xf32>
    %1620 = arith.mulf %1619, %10 : vector<8x128xf32>
    %cst_169 = arith.constant dense<0.000000e+00> : vector<128xf32>
    %1621 = vector.multi_reduction <add>, %1620, %cst_169 [0] : vector<8x128xf32> to vector<128xf32>
    %1622 = vector.shape_cast %1621 : vector<128xf32> to vector<1x128xf32>
    %1623 = arith.addf %1618, %1622 : vector<1x128xf32>
    %cst_170 = arith.constant 2.000000e+01 : f32
    %1624 = vector.broadcast %cst_170 : f32 to vector<1x128xf32>
    %1625 = arith.mulf %1624, %1623 : vector<1x128xf32>
    %1626 = arith.addf %1625, %1441 : vector<1x128xf32>
    %1627 = arith.addf %1626, %1609 : vector<1x128xf32>
    %c7_171 = arith.constant 7 : index
    %c0_172 = arith.constant 0 : index
    %1628 = vector.load %arg3[%c7_171, %c0_172] : memref<8x128xf32, #tpu.memory_space<vmem>>, vector<1x128xf32>
    tpu.vector_store %arg3[%c7_171, %c0_172], %1627 {strides = array<i32>} : memref<8x128xf32, #tpu.memory_space<vmem>>, vector<1x128xf32>,
    %c0_173 = arith.constant 0 : index
    %c0_174 = arith.constant 0 : index
    %1629 = vector.load %arg4[%c0_173, %c0_174] : memref<16x128xf32, #tpu.memory_space<vmem>>, vector<8x1xf32>
    tpu.vector_store %arg4[%c0_173, %c0_174], %1613 {strides = array<i32>} : memref<16x128xf32, #tpu.memory_space<vmem>>, vector<8x1xf32>,
    %c8_175 = arith.constant 8 : index
    %c0_176 = arith.constant 0 : index
    %1630 = vector.load %arg4[%c8_175, %c0_176] : memref<16x128xf32, #tpu.memory_space<vmem>>, vector<1x128xf32>
    tpu.vector_store %arg4[%c8_175, %c0_176], %1441 {strides = array<i32>} : memref<16x128xf32, #tpu.memory_space<vmem>>, vector<1x128xf32>,
    return
  }
  func.func @transform_0(%arg0: i32) -> (i32, i32) {
    %c0_i32 = arith.constant 0 : i32
    %c0_i32_0 = arith.constant 0 : i32
    return %arg0, %c0_i32 : i32, i32
  }
  func.func @transform_1(%arg0: i32) -> (i32, i32) {
    %c0_i32 = arith.constant 0 : i32
    %c0_i32_0 = arith.constant 0 : i32
    %c0_i32_1 = arith.constant 0 : i32
    return %c0_i32, %c0_i32_0 : i32, i32
  }
  func.func @transform_2(%arg0: i32) -> (i32, i32) {
    %c0_i32 = arith.constant 0 : i32
    %c0_i32_0 = arith.constant 0 : i32
    return %arg0, %c0_i32 : i32, i32
  }
}

</mosaic_0001>

<bundles_post_ra>
// kernel: tpu_custom_call.1
= control target key start
LH: loop header
LB: loop body
LE: loop exit
PB: predicated region body
PF: predicated region fallthrough
CT: control target
= control target key end

     0   :  { %7 = vsyncpa [#allocation4], 0  ;;  %s3426_s0 = inlined_call_operand.hbm [shape: f32[8,128], index: 0, kind: input, shape index: {}]   ;;  %s3427_s1 = inlined_call_operand.hbm [shape: f32[144,128], index: 1, kind: input, shape index: {}]   ;;  %s3428_s2 = inlined_call_operand.hbm [shape: f32[8,128], index: 2, kind: output, shape index: {}]  }
   0x1   :  { %8 = vsyncpa [#allocation7], 0 }
   0x2   :  { %9 = vsyncpa [#allocation5], 0  ;;  %s2290_s9 = smov [#allocation3]   ;;  %s2291_s11 = smov [#allocation6]  }
   0x3   :  { %s16_s10 = sshll.u32 %s2290_s9, 4  ;;  %s25_s12 = sshll.u32 %s2291_s11, 4  ;;  %s17_s10 = int_to_ptr.vmem [resolvable:$true] %s16_s10  ;;  %s26_s12 = int_to_ptr.vmem [resolvable:$true] %s25_s12 }
   0x4   :  { %s2232_s13 = scalar_lea.vmem %s17_s10, 128  ;;  %p2237_p1 = scmp.lt.s32.totalorder %s17_s10, %s17_s10 }
   0x5   :  { %p2233_p0 = scmp.ne.s32.totalorder %s17_s10, %s2232_s13  ;;  %p2238_p2 = scmp.lt.s32.totalorder %s2232_s13, %s2232_s13 }
   0x7   :  { %p2239_p3 = por %p2238_p2, %p2237_p1 }
   0x9   :  { %p2240_p4 = pnand %p2239_p3, %p2233_p0 }
   0xb   :  { %2243 = shalt.err (!%p2240_p4)
}
   0xc   :  { %19 = dma.hbm_to_vmem [thread:$0]  %s3426_s0, 128, %s17_s10, [#allocation4]  }
   0xd   :  { %s2252_s16 = scalar_lea.vmem %s26_s12, 2304  ;;  %p2257_p6 = scmp.lt.s32.totalorder %s26_s12, %s26_s12 }
   0xe   :  { %p2253_p5 = scmp.ne.s32.totalorder %s26_s12, %s2252_s16  ;;  %p2258_p7 = scmp.lt.s32.totalorder %s2252_s16, %s2252_s16 }
  0x10   :  { %p2259_p8 = por %p2258_p7, %p2257_p6 }
  0x12   :  { %p2260_p9 = pnand %p2259_p8, %p2253_p5 }
  0x14   :  { %2263 = shalt.err (!%p2260_p9)
}
  0x15   :  { %s2292_s17 = smov 128   ;;  %s2293_s18 = smov 8  }
  0x16   :  { %31 = dma.hbm_to_vmem [thread:$0]  %s3427_s1, 2304, %s26_s12, [#allocation7], %s2292_s17, %s2292_s17, %s2293_s18  }
  0x17   :  { %2284 = dma.done.wait [#allocation4], 128  }
  0x18   :  { %2285 = vsyncadd [#allocation4], 4294967168 }
  0x19   :  { %2286 = dma.done.wait [#allocation7], 2304  }
  0x1a   :  { %2287 = vsyncadd [#allocation7], 4294964992  ;;  %v2330_v0 = vld [vmem:[#allocation3] ss:$0 sm:$0xff]  ;;  %v69_v1 = vld [vmem:[#allocation6 + $0x88] sm:$0xff]  ;;  %v3431_v7 = vmov 0  }
  0x1b   :  { %v59_v2 = vld [vmem:[#allocation6 + $0x80] sm:$0xff]  ;;  %v70_v3 = vmul.f32 %v2330_v0, %v69_v1  ;;  %v2334_v5 = vld [vmem:[#allocation6 + $0x18] sm:$0xff]  ;;  %1998 = vset.pattern.permute.xlu0 %v3431_v7  ;;  %1999 = vset.pattern.permute.xlu1 %v3431_v7  ;;  %vm67_vm0 = vcmask 7168   ;;  %v2344_v19 = vld [vmem:[#allocation6 + $0x10] sm:$0xff]  ;;  %s2295_s0 = smov 1   ;;  %v3429_v47 = vmov 1  }
  0x1c   :  { %v64_v4 = vmul.f32 %v2330_v0, %v59_v2  ;;  %v106_v6 = vmul.f32 %v2330_v0, %v2334_v5  ;;  %v2340_v8 = vld [vmem:[#allocation6 + $0x58] sm:$0xff]  ;;  %v2352_v23 = vld [vmem:[#allocation6 + $0x28] sm:$0xff]  ;;  %v2356_v28 = vld [vmem:[#allocation6 + $0x30] sm:$0xff]  ;;  %v3441_v50 = vmov 2   ;;  %s2298_s1 = smov 2   ;;  %v3439_v2 = vmov 3  }
  0x1d   :  { %71 = vadd.xlane.f32.xlu0 %v70_v3  ;;  %v2365_v43 = vld [vmem:[#allocation6 + $0x78] sm:$0xff]  ;;  %v2381_v56 = vld [vmem:[#allocation6 + $0x60] sm:$0xff]  ;;  %s2300_s21 = smov 3   ;;  %s2302_s22 = smov 4  }
  0x1e   :  { %107 = vadd.xlane.f32.xlu1 %v106_v6  ;;  %v169_v46 = vrot.slane %v2365_v43, 1  ;;  %v199_v54 = vrot.slane %v2365_v43, 2  ;;  %v228_v1 = vrot.slane %v2365_v43, 3  ;;  %v2393_v3 = vrot.slane %v2381_v56, 1  ;;  %s2304_s23 = smov 5   ;;  %s2306_s24 = smov 6  }
  0x1f   :  { %s2308_s25 = smov [#allocation8]  }
  0x20   :  { %s1959_s26 = sshll.u32 %s2308_s25, 4  ;;  %s1960_s26 = int_to_ptr.vmem [resolvable:$true] %s1959_s26 }
  0x21   :  { %65 = vadd.xlane.f32.xlu0 %v64_v4  ;;  %s2264_s27 = scalar_lea.vmem %s1960_s26, 128  ;;  %p2269_p11 = scmp.lt.s32.totalorder %s1960_s26, %s1960_s26 }
  0x22   :  { %p2265_p10 = scmp.ne.s32.totalorder %s1960_s26, %s2264_s27  ;;  %p2270_p12 = scmp.lt.s32.totalorder %s2264_s27, %s2264_s27 }
  0x24   :  { %p2271_p13 = por %p2270_p12, %p2269_p11 }
  0x26   :  { %p2272_p0 = pnand %p2271_p13, %p2265_p10 }
  0xa6   :  { %v72_v9 = vpop.xlane.xlu0 %71 }
  0xa7   :  { %v73_v10 = vmul.f32 %v72_v9, %v2340_v8  ;;  %v108_v25 = vpop.xlane.xlu1 %107 }
  0xa9   :  { %v74_v11 = vrot.slane %v73_v10, 4 }
  0xaa   :  { %v66_v12 = vpop.xlane.xlu0 %65 }
  0xab   :  { %v75_v13 = vadd.f32 %v74_v11, %v73_v10  ;;  %68 = vst.msk [vmem:[#allocation2] sm:$0xff] %vm67_vm0, %v66_v12 }
  0xad   :  { %v76_v14 = vrot.slane %v75_v13, 2 }
  0xaf   :  { %v77_v15 = vadd.f32 %v76_v14, %v75_v13 }
  0xb1   :  { %v78_v16 = vrot.slane %v77_v15, 1 }
  0xb2   :  { %v81_v17 = vld [vmem:[#allocation2] sm:$0xff] }
  0xb3   :  { %v79_v18 = vadd.f32 %v78_v16, %v77_v15  ;;  %115 = vperm.xlu0 %1998, %v81_v17   ;;  %v257_v16 = vrot.slane %v2365_v43, 4  ;;  %v3437_v17 = vmov 4  }
  0xb5   :  { %80 = vst [vmem:[#allocation2 + $0x8] sm:$0x1] %v79_v18  ;;  %v2407_v18 = vrot.slane %v2381_v56, 2 }
  0xb7   :  { %2001 = vset.pattern.permute.xlu0 %v3441_v50 }
  0xbc   :  { %v2346_v20 = vld [vmem:[#allocation2 + $0x8] ss:$0 sm:$0xff] }
  0xbd   :  { %v109_v21 = vmul.f32 %v2346_v20, %v2344_v19 }
  0xbf   :  { %110 = vadd.xlane.f32.xlu1 %v109_v21 }
 0x12e   :  { %v2350_v22 = vpop.permute.xlu0 %115 }
 0x12f   :  { %v118_v24 = vmul.f32 %v2350_v22, %v2352_v23 }
 0x131   :  { %v119_v26 = vrot.slane %v118_v24, 4 }
 0x133   :  { %v120_v27 = vadd.f32 %v119_v26, %v118_v24 }
 0x135   :  { %v121_v31 = vrot.slane %v120_v27, 2 }
 0x137   :  { %v122_v34 = vadd.f32 %v121_v31, %v120_v27 }
 0x139   :  { %v123_v37 = vrot.slane %v122_v34, 1 }
 0x13b   :  { %v124_v40 = vadd.f32 %v123_v37, %v122_v34  ;;  %v286_v34 = vrot.slane %v2365_v43, 5 }
 0x148   :  { %v111_v29 = vpop.xlane.xlu1 %110 }
 0x149   :  { %v2358_v30 = vsub.f32 %v108_v25, %v111_v29 }
 0x14b   :  { %v125_v32 = vmul.f32 %v2358_v30, %v2356_v28 }
 0x14d   :  { %v126_v33 = vrot.slane %v125_v32, 4 }
 0x14f   :  { %v127_v35 = vadd.f32 %v126_v33, %v125_v32 }
 0x151   :  { %v128_v36 = vrot.slane %v127_v35, 2 }
 0x153   :  { %v129_v38 = vadd.f32 %v128_v36, %v127_v35  ;;  %v3435_v35 = vmov 5   ;;  %v2421_v36 = vrot.slane %v2381_v56, 3 }
 0x155   :  { %v130_v39 = vrot.slane %v129_v38, 1 }
 0x157   :  { %v131_v41 = vadd.f32 %v130_v39, %v129_v38 }
 0x159   :  { %v2362_v42 = vadd.f32 %v131_v41, %v124_v40 }
 0x15b   :  { %2064 = vtanh.f32 %v2362_v42 }
 0x168   :  { %v2065_v44 = vpop.eup %2064 }
 0x169   :  { %v143_v45 = vmul.f32 %v2065_v44, %v2365_v43 }
 0x16b   :  { %145 = vrot.lane.b32.xlu1 %v143_v45, %s2295_s0 }
 0x16f   :  { %170 = vrot.lane.b32.xlu1 %v169_v46, %s2295_s0 }
 0x173   :  { %136 = vperm.xlu1 %1999, %v2065_v44  }
 0x177   :  { %2000 = vset.pattern.permute.xlu1 %v3429_v47 }
 0x1dd   :  { %v146_v48 = vpop.permute.xlu1 %145 }
 0x1de   :  { %v148_v49 = vadd.f32 %v146_v48, %v2362_v42 }
 0x1e0   :  { %2066 = vtanh.f32 %v148_v49  ;;  %v315_v49 = vrot.slane %v2365_v43, 6 }
 0x1e1   :  { %v2374_v52 = vpop.permute.xlu1 %170 }
 0x1ed   :  { %v2067_v51 = vpop.eup %2066 }
 0x1ee   :  { %v173_v53 = vmul.f32 %v2067_v51, %v2374_v52  ;;  %v2379_v55 = vpop.permute.xlu1 %136 }
 0x1ef   :  { %v150_v57 = vmul.f32 %v2379_v55, %v2381_v56 }
 0x1f0   :  { %175 = vrot.lane.b32.xlu1 %v173_v53, %s2295_s0  ;;  %v2434_v53 = vld [vmem:[#allocation6 + $0x8] sm:$0xff] }
 0x1f1   :  { %v152_v58 = vadd.f32 %v150_v57, %v2362_v42 }
 0x1f4   :  { %200 = vrot.lane.b32.xlu1 %v199_v54, %s2298_s1  ;;  %v95_v54 = vmul.f32 %v2330_v0, %v2434_v53 }
 0x1f8   :  { %155 = vperm.xlu1 %2000, %v2067_v51   ;;  %v3443_v51 = vmov 6  }
 0x262   :  { %v176_v59 = vpop.permute.xlu1 %175 }
 0x263   :  { %v178_v60 = vadd.f32 %v176_v59, %v152_v58 }
 0x265   :  { %2068 = vtanh.f32 %v178_v60 }
 0x266   :  { %v2386_v62 = vpop.permute.xlu1 %200 }
 0x272   :  { %v2069_v61 = vpop.eup %2068 }
 0x273   :  { %188 = vperm.xlu0 %2001, %v2069_v61   ;;  %v203_v63 = vmul.f32 %v2069_v61, %v2386_v62  ;;  %v2395_v4 = vpop.permute.xlu1 %155 }
 0x274   :  { %v183_v6 = vmul.f32 %v2393_v3, %v2395_v4 }
 0x275   :  { %205 = vrot.lane.b32.xlu1 %v203_v63, %s2295_s0 }
 0x276   :  { %v184_v9 = vadd.f32 %v183_v6, %v150_v57  ;;  %v2439_v57 = vrot.slane %v2381_v56, 4 }
 0x277   :  { %2002 = vset.pattern.permute.xlu0 %v3439_v2 }
 0x278   :  { %v185_v10 = vadd.f32 %v184_v9, %v2362_v42 }
 0x279   :  { %229 = vrot.lane.b32.xlu1 %v228_v1, %s2300_s21 }
 0x2e7   :  { %v206_v11 = vpop.permute.xlu1 %205 }
 0x2e8   :  { %v208_v12 = vadd.f32 %v206_v11, %v185_v10  ;;  %v3433_v10 = vmov 7   ;;  %v2452_v11 = vld [vmem:[#allocation6] sm:$0xff] }
 0x2e9   :  { %2006 = vset.pattern.permute.xlu1 %v3433_v10 }
 0x2ea   :  { %2070 = vtanh.f32 %v208_v12  ;;  %v88_v12 = vmul.f32 %v2346_v20, %v2452_v11  ;;  %v2465_v20 = vld [vmem:[#allocation3 + $0x1] ss:$0 sm:$0xff] }
 0x2eb   :  { %v2400_v13 = vpop.permute.xlu1 %229 }
 0x2ee   :  { %v2409_v21 = vpop.permute.xlu0 %188 }
 0x2ef   :  { %v212_v24 = vmul.f32 %v2407_v18, %v2409_v21 }
 0x2f1   :  { %v213_v25 = vadd.f32 %v212_v24, %v184_v9 }
 0x2f3   :  { %v214_v26 = vadd.f32 %v213_v25, %v2362_v42 }
 0x2f7   :  { %v2071_v14 = vpop.eup %2070 }
 0x2f8   :  { %217 = vperm.xlu0 %2002, %v2071_v14   ;;  %v232_v15 = vmul.f32 %v2071_v14, %v2400_v13  ;;  %v2457_v14 = vrot.slane %v2381_v56, 5 }
 0x2fa   :  { %234 = vrot.lane.b32.xlu1 %v232_v15, %s2295_s0  ;;  %3507 = vst [vmem:[#allocation12_spill] sm:$0xff] %v2457_v14 }
 0x2fc   :  { %2003 = vset.pattern.permute.xlu0 %v3437_v17 }
 0x2fe   :  { %258 = vrot.lane.b32.xlu1 %v257_v16, %s2302_s22 }
 0x36c   :  { %v235_v27 = vpop.permute.xlu1 %234 }
 0x36d   :  { %v237_v29 = vadd.f32 %v235_v27, %v214_v26 }
 0x36f   :  { %2072 = vtanh.f32 %v237_v29 }
 0x370   :  { %v2414_v31 = vpop.permute.xlu1 %258 }
 0x373   :  { %v2423_v37 = vpop.permute.xlu0 %217 }
 0x374   :  { %v241_v38 = vmul.f32 %v2421_v36, %v2423_v37 }
 0x376   :  { %v242_v39 = vadd.f32 %v241_v38, %v213_v25 }
 0x378   :  { %v243_v40 = vadd.f32 %v242_v39, %v2362_v42 }
 0x37c   :  { %v2073_v32 = vpop.eup %2072 }
 0x37d   :  { %246 = vperm.xlu0 %2003, %v2073_v32   ;;  %v261_v33 = vmul.f32 %v2073_v32, %v2414_v31  ;;  %v401_v32 = vmul.f32 %v2465_v20, %v2334_v5 }
 0x37f   :  { %263 = vrot.lane.b32.xlu1 %v261_v33, %s2295_s0 }
 0x381   :  { %2004 = vset.pattern.permute.xlu0 %v3435_v35 }
 0x383   :  { %287 = vrot.lane.b32.xlu1 %v286_v34, %s2304_s23 }
 0x3f1   :  { %v264_v41 = vpop.permute.xlu1 %263 }
 0x3f2   :  { %v266_v44 = vadd.f32 %v264_v41, %v243_v40 }
 0x3f4   :  { %2074 = vtanh.f32 %v266_v44 }
 0x3f5   :  { %v2428_v45 = vpop.permute.xlu1 %287 }
 0x3f8   :  { %v2441_v58 = vpop.permute.xlu0 %246 }
 0x3f9   :  { %v270_v59 = vmul.f32 %v2439_v57, %v2441_v58 }
 0x3fb   :  { %v271_v60 = vadd.f32 %v270_v59, %v242_v39  ;;  %v2476_v59 = vld [vmem:[#allocation6 + $0x48] sm:$0xff] }
 0x3fc   :  { %3509 = vst [vmem:[#allocation14_spill] sm:$0xff] %v2476_v59 }
 0x3fd   :  { %v272_v61 = vadd.f32 %v271_v60, %v2362_v42 }
 0x401   :  { %v2075_v46 = vpop.eup %2074 }
 0x402   :  { %275 = vperm.xlu0 %2004, %v2075_v46   ;;  %v290_v48 = vmul.f32 %v2075_v46, %v2428_v45 }
 0x404   :  { %292 = vrot.lane.b32.xlu1 %v290_v48, %s2295_s0 }
 0x406   :  { %2005 = vset.pattern.permute.xlu0 %v3443_v51 }
 0x408   :  { %316 = vrot.lane.b32.xlu1 %v315_v49, %s2306_s24 }
 0x421   :  { %96 = vadd.xlane.f32.xlu0 %v95_v54  ;;  %v2474_v54 = vld [vmem:[#allocation6 + $0x38] sm:$0xff] }
 0x422   :  { %3508 = vst [vmem:[#allocation13_spill] sm:$0xff] %v2474_v54 }
 0x476   :  { %v293_v63 = vpop.permute.xlu1 %292 }
 0x477   :  { %v295_v1 = vadd.f32 %v293_v63, %v272_v61  ;;  %v2480_v61 = vld [vmem:[#allocation6 + $0x50] sm:$0xff]  ;;  %v339_v63 = vmul.f32 %v2350_v22, %v2474_v54 }
 0x478   :  { %3511 = vst [vmem:[#allocation16_spill] sm:$0xff] %v2480_v61 }
 0x479   :  { %2076 = vtanh.f32 %v295_v1  ;;  %v362_v1 = vmul.f32 %v2350_v22, %v2476_v59 }
 0x47a   :  { %v2446_v6 = vpop.permute.xlu1 %316 }
 0x47d   :  { %v2459_v15 = vpop.permute.xlu0 %275 }
 0x47e   :  { %v299_v16 = vmul.f32 %v2457_v14, %v2459_v15 }
 0x480   :  { %v300_v24 = vadd.f32 %v299_v16, %v271_v60  ;;  %v2478_v60 = vld [vmem:[#allocation6 + $0x40] sm:$0xff]  ;;  %v340_v16 = vrot.slane %v339_v63, 4 }
 0x481   :  { %3510 = vst [vmem:[#allocation15_spill] sm:$0xff] %v2478_v60 }
 0x482   :  { %v301_v25 = vadd.f32 %v300_v24, %v2362_v42  ;;  %v363_v24 = vrot.slane %v362_v1, 4 }
 0x486   :  { %v2077_v9 = vpop.eup %2076 }
 0x487   :  { %304 = vperm.xlu0 %2005, %v2077_v9   ;;  %v319_v0 = vmul.f32 %v2077_v9, %v2446_v6  ;;  %v347_v9 = vmul.f32 %v2358_v30, %v2478_v60 }
 0x489   :  { %321 = vrot.lane.b32.xlu1 %v319_v0, %s2295_s0  ;;  %v370_v0 = vmul.f32 %v2358_v30, %v2480_v61  ;;  %v341_v30 = vadd.f32 %v340_v16, %v339_v63 }
 0x48b   :  { %2007 = vset.pattern.permute.xlu0 %v3431_v7  ;;  %v371_v22 = vrot.slane %v370_v0, 4 }
 0x4aa   :  { %v97_v33 = vpop.xlane.xlu0 %96 }
 0x4ad   :  { %89 = vadd.xlane.f32.xlu1 %v88_v12  ;;  %v2490_v12 = vld [vmem:[#allocation6 + $0x68] sm:$0xff] }
 0x4ae   :  { %3512 = vst [vmem:[#allocation17_spill] sm:$0xff] %v2490_v12 }
 0x4fb   :  { %v322_v26 = vpop.permute.xlu1 %321 }
 0x4fc   :  { %v324_v27 = vadd.f32 %v322_v26, %v301_v25  ;;  %v2492_v25 = vld [vmem:[#allocation6 + $0x70] sm:$0xff]  ;;  %v2495_v26 = vrot.slane %v2490_v12, 1 }
 0x4fd   :  { %3513 = vst [vmem:[#allocation18_spill] sm:$0xff] %v2492_v25  ;;  %v141_v63 = vmul.f32 %v2379_v55, %v2492_v25  ;;  %v2528_v16 = vrot.slane %v2492_v25, 4  ;;  %v2538_v35 = vrot.slane %v2492_v25, 5 }
 0x4fe   :  { %2078 = vtanh.f32 %v324_v27  ;;  %3514 = vst [vmem:[#allocation19_spill] sm:$0xff] %v2495_v26  ;;  %v2498_v27 = vrot.slane %v2492_v25, 1 }
 0x4ff   :  { %3521 = vst [vmem:[#allocation26_spill] sm:$0xff] %v2528_v16  ;;  %3523 = vst [vmem:[#allocation28_spill] sm:$0xff] %v2538_v35  ;;  %v284_v51 = vmul.f32 %v2538_v35, %v2459_v15 }
 0x500   :  { %3515 = vst [vmem:[#allocation20_spill] sm:$0xff] %v2498_v27 }
 0x50b   :  { %v2079_v29 = vpop.eup %2078 }
 0x50c   :  { %328 = vperm.xlu1 %2006, %v2079_v29   ;;  %v348_v29 = vrot.slane %v347_v9, 4 }
 0x510   :  { %2008 = vset.pattern.permute.xlu1 %v3429_v47 }
 0x530   :  { %402 = vadd.xlane.f32.xlu1 %v401_v32  ;;  %v2501_v32 = vrot.slane %v2490_v12, 2 }
 0x532   :  { %3516 = vst [vmem:[#allocation21_spill] sm:$0xff] %v2501_v32 }
 0x536   :  { %v90_v34 = vpop.xlane.xlu1 %89 }
 0x537   :  { %v98_v38 = vadd.f32 %v97_v33, %v90_v34  ;;  %v2504_v33 = vrot.slane %v2492_v25, 2  ;;  %v364_v34 = vadd.f32 %v363_v24, %v362_v1  ;;  %v2525_v1 = vrot.slane %v2490_v12, 4 }
 0x539   :  { %v99_v39 = vmul.f32 %v98_v38, %v2340_v8  ;;  %3517 = vst [vmem:[#allocation22_spill] sm:$0xff] %v2504_v33  ;;  %v161_v38 = vmul.f32 %v2495_v26, %v2395_v4  ;;  %3520 = vst [vmem:[#allocation25_spill] sm:$0xff] %v2525_v1 }
 0x53b   :  { %v100_v40 = vrot.slane %v99_v39, 4 }
 0x53d   :  { %v101_v42 = vadd.f32 %v100_v40, %v99_v39  ;;  %v166_v39 = vmul.f32 %v2498_v27, %v2395_v4  ;;  %v2511_v40 = vrot.slane %v2490_v12, 3  ;;  %v197_v4 = vmul.f32 %v2504_v33, %v2409_v21 }
 0x53e   :  { %v2557_v33 = vrot.slane %v2490_v12, 7 }
 0x53f   :  { %v102_v41 = vrot.slane %v101_v42, 2  ;;  %3518 = vst [vmem:[#allocation23_spill] sm:$0xff] %v2511_v40 }
 0x541   :  { %v103_v44 = vadd.f32 %v102_v41, %v101_v42  ;;  %v2514_v42 = vrot.slane %v2492_v25, 3  ;;  %v349_v41 = vadd.f32 %v348_v29, %v347_v9  ;;  %v342_v9 = vrot.slane %v341_v30, 2 }
 0x542   :  { %v167_v29 = vadd.f32 %v166_v39, %v141_v63  ;;  %v255_v39 = vmul.f32 %v2528_v16, %v2441_v58  ;;  %v305_v63 = vpop.permute.xlu0 %304 }
 0x543   :  { %v104_v46 = vrot.slane %v103_v44, 1  ;;  %3519 = vst [vmem:[#allocation24_spill] sm:$0xff] %v2514_v42  ;;  %v226_v47 = vmul.f32 %v2514_v42, %v2423_v37 }
 0x544   :  { %v198_v17 = vadd.f32 %v197_v4, %v167_v29 }
 0x545   :  { %v2470_v48 = vadd.f32 %v104_v46, %v103_v44  ;;  %v372_v44 = vadd.f32 %v371_v22, %v370_v0  ;;  %v139_v46 = vmul.f32 %v2379_v55, %v2490_v12  ;;  %v365_v0 = vrot.slane %v364_v34, 2 }
 0x546   :  { %v222_v22 = vmul.f32 %v2511_v40, %v2423_v37  ;;  %v2535_v55 = vrot.slane %v2490_v12, 5  ;;  %v2548_v37 = vrot.slane %v2492_v25, 6  ;;  %v227_v50 = vadd.f32 %v226_v47, %v198_v17 }
 0x547   :  { %v404_v49 = vmul.f32 %v2470_v48, %v2344_v19  ;;  %v162_v24 = vadd.f32 %v161_v38, %v139_v46  ;;  %v373_v7 = vrot.slane %v372_v44, 2  ;;  %v251_v38 = vmul.f32 %v2525_v1, %v2441_v58 }
 0x548   :  { %3522 = vst [vmem:[#allocation27_spill] sm:$0xff] %v2535_v55  ;;  %v2545_v46 = vrot.slane %v2490_v12, 6  ;;  %3525 = vst [vmem:[#allocation30_spill] sm:$0xff] %v2548_v37  ;;  %v366_v4 = vadd.f32 %v365_v0, %v364_v34  ;;  %v256_v58 = vadd.f32 %v255_v39, %v227_v50  ;;  %v313_v40 = vmul.f32 %v2548_v37, %v305_v63 }
 0x549   :  { %405 = vadd.xlane.f32.xlu0 %v404_v49  ;;  %v193_v49 = vmul.f32 %v2501_v32, %v2409_v21  ;;  %v350_v21 = vrot.slane %v349_v41, 2  ;;  %v374_v29 = vadd.f32 %v373_v7, %v372_v44  ;;  %v2560_v47 = vrot.slane %v2492_v25, 7 }
 0x54a   :  { %3524 = vst [vmem:[#allocation29_spill] sm:$0xff] %v2545_v46  ;;  %v309_v16 = vmul.f32 %v2545_v46, %v305_v63  ;;  %v355_v17 = vlaneseq  ;;  %v367_v7 = vrot.slane %v366_v4, 1  ;;  %v285_v34 = vadd.f32 %v284_v51, %v256_v58  ;;  %v2566_v58 = vld [vmem:[#allocation6 + $0x20] sm:$0xff] }
 0x54b   :  { %v194_v10 = vadd.f32 %v193_v49, %v162_v24  ;;  %v280_v49 = vmul.f32 %v2535_v55, %v2459_v15  ;;  %v343_v24 = vadd.f32 %v342_v9, %v341_v30  ;;  %v351_v42 = vadd.f32 %v350_v21, %v349_v41 }
 0x54c   :  { %v375_v44 = vrot.slane %v374_v29, 1  ;;  %v314_v9 = vadd.f32 %v313_v40, %v285_v34  ;;  %v368_v21 = vadd.f32 %v367_v7, %v366_v4 }
 0x54d   :  { %v223_v2 = vadd.f32 %v222_v22, %v194_v10  ;;  %v344_v30 = vrot.slane %v343_v24, 1  ;;  %v352_v50 = vrot.slane %v351_v42, 1  ;;  %v356_v22 = vshrl.u32 %v355_v17, 7 }
 0x54e   :  { %v376_v37 = vadd.f32 %v375_v44, %v374_v29 }
 0x54f   :  { %v252_v1 = vadd.f32 %v251_v38, %v223_v2  ;;  %v345_v63 = vadd.f32 %v344_v30, %v343_v24  ;;  %v2564_v35 = vsub.s32 0, %v356_v22 }
 0x551   :  { %v281_v10 = vadd.f32 %v280_v49, %v252_v1  ;;  %v353_v49 = vadd.f32 %v352_v50, %v351_v42 }
 0x553   :  { %v310_v15 = vadd.f32 %v309_v16, %v281_v10 }
 0x587   :  { %v329_v2 = vpop.permute.xlu1 %328 }
 0x588   :  { %v333_v41 = vmul.f32 %v2557_v33, %v329_v2  ;;  %v337_v0 = vmul.f32 %v2560_v47, %v329_v2 }
 0x58a   :  { %v334_v38 = vadd.f32 %v333_v41, %v310_v15  ;;  %v338_v39 = vadd.f32 %v337_v0, %v314_v9 }
 0x58c   :  { %v369_v46 = vadd.f32 %v368_v21, %v338_v39  ;;  %v346_v1 = vadd.f32 %v345_v63, %v334_v38 }
 0x58e   :  { %v377_v51 = vadd.f32 %v376_v37, %v369_v46  ;;  %v354_v16 = vadd.f32 %v353_v49, %v346_v1 }
 0x590   :  { %v378_v40 = vmul.f32 20.0, %v377_v51  ;;  %v358_v10 = vrot.slane %v354_v16, %v2564_v35  ;;  %v3526_v51 = vmov 6  }
 0x592   :  { %v359_v34 = vmul.f32 %v358_v10, %v2566_v58  ;;  %v379_v4 = vadd.f32 %v378_v40, %v2470_v48 }
 0x594   :  { %v380_v17 = vadd.f32 %v379_v4, %v354_v16  ;;  %360 = vadd.xlane.f32.xlu1 %v359_v34  ;;  %v383_v16 = vmul.f32 %v2470_v48, %v2452_v11 }
 0x596   :  { %381 = vst [vmem:[#allocation8] sm:$0x1] %v380_v17  ;;  %v3527_v17 = vmov 2  }
 0x5b9   :  { %v403_v29 = vpop.xlane.xlu1 %402 }
 0x5d2   :  { %v406_v24 = vpop.xlane.xlu0 %405 }
 0x5d3   :  { %v2571_v30 = vsub.f32 %v403_v29, %v406_v24 }
 0x5d5   :  { %v415_v42 = vmul.f32 %v2571_v30, %v2356_v28 }
 0x5d7   :  { %v416_v46 = vrot.slane %v415_v42, 4 }
 0x5d9   :  { %v417_v37 = vadd.f32 %v416_v46, %v415_v42 }
 0x5db   :  { %v418_v44 = vrot.slane %v417_v37, 2 }
 0x5dd   :  { %v419_v50 = vadd.f32 %v418_v44, %v417_v37 }
 0x5df   :  { %v420_v0 = vrot.slane %v419_v50, 1 }
 0x5e1   :  { %v421_v38 = vadd.f32 %v420_v0, %v419_v50 }
 0x61d   :  { %v2575_v7 = vpop.xlane.xlu1 %360 }
 0x61e   :  { %v408_v15 = vmul.f32 %v2575_v7, %v2352_v23 }
 0x620   :  { %v409_v2 = vrot.slane %v408_v15, 4 }
 0x622   :  { %v410_v9 = vadd.f32 %v409_v2, %v408_v15  ;;  %v3528_v15 = vmov 3  }
 0x624   :  { %v411_v41 = vrot.slane %v410_v9, 2 }
 0x626   :  { %v412_v22 = vadd.f32 %v411_v41, %v410_v9 }
 0x628   :  { %v413_v21 = vrot.slane %v412_v22, 1 }
 0x62a   :  { %v414_v39 = vadd.f32 %v413_v21, %v412_v22 }
 0x62c   :  { %v2579_v63 = vadd.f32 %v421_v38, %v414_v39  ;;  %v3529_v39 = vmov 4  }
 0x62e   :  { %2080 = vtanh.f32 %v2579_v63 }
 0x63b   :  { %v2081_v1 = vpop.eup %2080 }
 0x63c   :  { %426 = vperm.xlu0 %2007, %v2081_v1   ;;  %v433_v49 = vmul.f32 %v2081_v1, %v2365_v43 }
 0x63e   :  { %435 = vrot.lane.b32.xlu1 %v433_v49, %s2295_s0 }
 0x640   :  { %2013 = vset.pattern.permute.xlu0 %v3526_v51 }
 0x65b   :  { %384 = vadd.xlane.f32.xlu0 %v383_v16 }
 0x6b0   :  { %v436_v40 = vpop.permute.xlu1 %435 }
 0x6b1   :  { %v438_v10 = vadd.f32 %v436_v40, %v2579_v63 }
 0x6b3   :  { %2082 = vtanh.f32 %v438_v10 }
 0x6b7   :  { %v2591_v24 = vpop.permute.xlu0 %426 }
 0x6b8   :  { %v440_v29 = vmul.f32 %v2591_v24, %v2381_v56 }
 0x6ba   :  { %v442_v48 = vadd.f32 %v440_v29, %v2579_v63 }
 0x6c0   :  { %v2083_v34 = vpop.eup %2082 }
 0x6c1   :  { %v452_v4 = vmul.f32 %v2083_v34, %v2374_v52 }
 0x6c3   :  { %454 = vrot.lane.b32.xlu1 %v452_v4, %s2295_s0 }
 0x6c7   :  { %445 = vperm.xlu1 %2008, %v2083_v34  }
 0x6cb   :  { %2009 = vset.pattern.permute.xlu1 %v3527_v17 }
 0x735   :  { %v455_v42 = vpop.permute.xlu1 %454 }
 0x736   :  { %v457_v46 = vadd.f32 %v455_v42, %v442_v48  ;;  %v3530_v48 = vmov 5  }
 0x738   :  { %2084 = vtanh.f32 %v457_v46 }
 0x742   :  { %v2599_v2 = vpop.permute.xlu1 %445 }
 0x743   :  { %v459_v50 = vmul.f32 %v2599_v2, %v2393_v3 }
 0x745   :  { %v2085_v37 = vpop.eup %2084  ;;  %v460_v9 = vadd.f32 %v459_v50, %v440_v29 }
 0x746   :  { %v471_v44 = vmul.f32 %v2085_v37, %v2386_v62 }
 0x747   :  { %v461_v41 = vadd.f32 %v460_v9, %v2579_v63 }
 0x748   :  { %473 = vrot.lane.b32.xlu1 %v471_v44, %s2295_s0 }
 0x74c   :  { %464 = vperm.xlu1 %2009, %v2085_v37  }
 0x750   :  { %2010 = vset.pattern.permute.xlu1 %v3528_v15 }
 0x7ba   :  { %v474_v0 = vpop.permute.xlu1 %473 }
 0x7bb   :  { %v476_v22 = vadd.f32 %v474_v0, %v461_v41 }
 0x7bd   :  { %2086 = vtanh.f32 %v476_v22  ;;  %v3531_v22 = vmov 7  }
 0x7c7   :  { %v2607_v1 = vpop.permute.xlu1 %464 }
 0x7c8   :  { %v478_v49 = vmul.f32 %v2607_v1, %v2407_v18 }
 0x7ca   :  { %v2087_v21 = vpop.eup %2086  ;;  %v479_v16 = vadd.f32 %v478_v49, %v460_v9 }
 0x7cb   :  { %v490_v38 = vmul.f32 %v2087_v21, %v2400_v13 }
 0x7cc   :  { %v480_v40 = vadd.f32 %v479_v16, %v2579_v63 }
 0x7cd   :  { %492 = vrot.lane.b32.xlu1 %v490_v38, %s2295_s0 }
 0x7d1   :  { %483 = vperm.xlu1 %2010, %v2087_v21  }
 0x7d5   :  { %2011 = vset.pattern.permute.xlu1 %v3529_v39 }
 0x83f   :  { %v493_v10 = vpop.permute.xlu1 %492 }
 0x840   :  { %v495_v34 = vadd.f32 %v493_v10, %v480_v40 }
 0x842   :  { %2088 = vtanh.f32 %v495_v34 }
 0x84c   :  { %v2615_v42 = vpop.permute.xlu1 %483 }
 0x84d   :  { %v497_v46 = vmul.f32 %v2615_v42, %v2421_v36 }
 0x84f   :  { %v2089_v4 = vpop.eup %2088  ;;  %v498_v37 = vadd.f32 %v497_v46, %v479_v16  ;;  %v390_v46 = vmul.f32 %v2465_v20, %v2434_v53  ;;  %v385_v20 = vpop.xlane.xlu0 %384 }
 0x850   :  { %v509_v29 = vmul.f32 %v2089_v4, %v2414_v31 }
 0x851   :  { %v499_v44 = vadd.f32 %v498_v37, %v2579_v63 }
 0x852   :  { %511 = vrot.lane.b32.xlu1 %v509_v29, %s2295_s0  ;;  %v3532_v29 = vmov 0  }
 0x856   :  { %502 = vperm.xlu1 %2011, %v2089_v4  }
 0x85a   :  { %2012 = vset.pattern.permute.xlu1 %v3530_v48 }
 0x8c4   :  { %v512_v50 = vpop.permute.xlu1 %511 }
 0x8c5   :  { %v514_v9 = vadd.f32 %v512_v50, %v499_v44 }
 0x8c7   :  { %2090 = vtanh.f32 %v514_v9 }
 0x8d1   :  { %v2623_v21 = vpop.permute.xlu1 %502 }
 0x8d2   :  { %v516_v38 = vmul.f32 %v2623_v21, %v2439_v57 }
 0x8d4   :  { %v2091_v41 = vpop.eup %2090  ;;  %v517_v49 = vadd.f32 %v516_v38, %v498_v37 }
 0x8d5   :  { %v528_v0 = vmul.f32 %v2091_v41, %v2428_v45 }
 0x8d6   :  { %v518_v16 = vadd.f32 %v517_v49, %v2579_v63 }
 0x8d7   :  { %530 = vrot.lane.b32.xlu1 %v528_v0, %s2295_s0 }
 0x8db   :  { %521 = vperm.xlu1 %2012, %v2091_v41  }
 0x8df   :  { %2014 = vset.pattern.permute.xlu1 %v3531_v22 }
 0x949   :  { %v531_v40 = vpop.permute.xlu1 %530 }
 0x94a   :  { %v533_v10 = vadd.f32 %v531_v40, %v518_v16  ;;  %v3533_v16 = vmov 1   ;;  %v2636_v40 = vld [vmem:[#allocation3 + $0x2] ss:$0 sm:$0xff] }
 0x94c   :  { %2092 = vtanh.f32 %v533_v10  ;;  %v625_v10 = vmul.f32 %v2636_v40, %v2334_v5  ;;  %v563_v5 = vmul.f32 %v2575_v7, %v2474_v54 }
 0x956   :  { %v522_v44 = vpop.permute.xlu1 %521 }
 0x957   :  { %v535_v37 = vmul.f32 %v522_v44, %v2457_v14 }
 0x959   :  { %v2093_v34 = vpop.eup %2092  ;;  %v536_v50 = vadd.f32 %v535_v37, %v517_v49 }
 0x95a   :  { %540 = vperm.xlu0 %2013, %v2093_v34   ;;  %v547_v4 = vmul.f32 %v2093_v34, %v2446_v6 }
 0x95b   :  { %v537_v9 = vadd.f32 %v536_v50, %v2579_v63 }
 0x95c   :  { %549 = vrot.lane.b32.xlu1 %v547_v4, %s2295_s0 }
 0x95e   :  { %2015 = vset.pattern.permute.xlu0 %v3532_v29 }
 0x980   :  { %391 = vadd.xlane.f32.xlu1 %v390_v46 }
 0x9ce   :  { %v550_v41 = vpop.permute.xlu1 %549 }
 0x9cf   :  { %v552_v0 = vadd.f32 %v550_v41, %v537_v9 }
 0x9d1   :  { %2094 = vtanh.f32 %v552_v0 }
 0x9de   :  { %v2095_v38 = vpop.eup %2094 }
 0x9df   :  { %556 = vperm.xlu1 %2014, %v2095_v38   ;;  %v586_v38 = vmul.f32 %v2575_v7, %v2476_v59 }
 0x9e3   :  { %2016 = vset.pattern.permute.xlu1 %v3533_v16 }
 0xa03   :  { %626 = vadd.xlane.f32.xlu1 %v625_v10  ;;  %v594_v10 = vmul.f32 %v2571_v30, %v2480_v61  ;;  %v3534_v61 = vld [vmem:[#allocation22_spill] sm:$0xff] }
 0xa09   :  { %v392_v34 = vpop.xlane.xlu1 %391 }
 0xa0a   :  { %v393_v4 = vadd.f32 %v392_v34, %v385_v20  ;;  %v564_v20 = vrot.slane %v563_v5, 4  ;;  %v587_v34 = vrot.slane %v586_v38, 4 }
 0xa0c   :  { %v394_v49 = vmul.f32 %v393_v4, %v2340_v8  ;;  %v571_v8 = vmul.f32 %v2571_v30, %v2478_v60  ;;  %v431_v30 = vmul.f32 %v2591_v24, %v2492_v25  ;;  %v3535_v60 = vld [vmem:[#allocation23_spill] sm:$0xff]  ;;  %v3537_v25 = vld [vmem:[#allocation25_spill] sm:$0xff] }
 0xa0e   :  { %v395_v46 = vrot.slane %v394_v49, 4  ;;  %v572_v4 = vrot.slane %v571_v8, 4 }
 0xa10   :  { %v396_v63 = vadd.f32 %v395_v46, %v394_v49  ;;  %v595_v49 = vrot.slane %v594_v10, 4  ;;  %v565_v46 = vadd.f32 %v564_v20, %v563_v5  ;;  %v469_v5 = vmul.f32 %v2607_v1, %v3534_v61 }
 0xa12   :  { %v397_v37 = vrot.slane %v396_v63, 2  ;;  %v596_v7 = vadd.f32 %v595_v49, %v594_v10 }
 0xa14   :  { %v398_v50 = vadd.f32 %v397_v37, %v396_v63  ;;  %v588_v63 = vadd.f32 %v587_v34, %v586_v38  ;;  %v450_v37 = vmul.f32 %v2599_v2, %v2498_v27  ;;  %v566_v38 = vrot.slane %v565_v46, 2  ;;  %v3538_v27 = vld [vmem:[#allocation26_spill] sm:$0xff] }
 0xa15   :  { %v597_v49 = vrot.slane %v596_v7, 2 }
 0xa16   :  { %v399_v9 = vrot.slane %v398_v50, 1  ;;  %v589_v20 = vrot.slane %v588_v63, 2  ;;  %v567_v61 = vadd.f32 %v566_v38, %v565_v46 }
 0xa18   :  { %v2641_v41 = vadd.f32 %v399_v9, %v398_v50  ;;  %v573_v50 = vadd.f32 %v572_v4, %v571_v8  ;;  %v429_v9 = vmul.f32 %v2591_v24, %v2490_v12  ;;  %v3536_v8 = vld [vmem:[#allocation24_spill] sm:$0xff]  ;;  %v590_v59 = vadd.f32 %v589_v20, %v588_v63 }
 0xa19   :  { %v488_v10 = vmul.f32 %v2615_v42, %v3536_v8  ;;  %v568_v46 = vrot.slane %v567_v61, 1 }
 0xa1a   :  { %v628_v0 = vmul.f32 %v2641_v41, %v2344_v19  ;;  %v448_v19 = vmul.f32 %v2599_v2, %v2495_v26  ;;  %v451_v26 = vadd.f32 %v450_v37, %v431_v30  ;;  %v486_v2 = vmul.f32 %v2615_v42, %v3535_v60  ;;  %v3539_v60 = vld [vmem:[#allocation28_spill] sm:$0xff] }
 0xa1b   :  { %v574_v4 = vrot.slane %v573_v50, 2  ;;  %v524_v30 = vmul.f32 %v522_v44, %v2535_v55  ;;  %v526_v54 = vmul.f32 %v522_v44, %v3539_v60  ;;  %v598_v42 = vadd.f32 %v597_v49, %v596_v7 }
 0xa1c   :  { %629 = vadd.xlane.f32.xlu0 %v628_v0  ;;  %v467_v0 = vmul.f32 %v2607_v1, %v2501_v32  ;;  %v449_v34 = vadd.f32 %v448_v19, %v429_v9  ;;  %v470_v24 = vadd.f32 %v469_v5, %v451_v26  ;;  %v505_v32 = vmul.f32 %v2623_v21, %v3537_v25  ;;  %v541_v19 = vpop.permute.xlu0 %540  ;;  %v3540_v26 = vld [vmem:[#allocation29_spill] sm:$0xff] }
 0xa1d   :  { %v507_v1 = vmul.f32 %v2623_v21, %v3538_v27  ;;  %v575_v8 = vadd.f32 %v574_v4, %v573_v50  ;;  %v543_v5 = vmul.f32 %v541_v19, %v3540_v26  ;;  %v591_v21 = vrot.slane %v590_v59, 1 }
 0xa1e   :  { %v468_v12 = vadd.f32 %v467_v0, %v449_v34  ;;  %v489_v9 = vadd.f32 %v488_v10, %v470_v24  ;;  %v3541_v34 = vld [vmem:[#allocation30_spill] sm:$0xff]  ;;  %v599_v63 = vrot.slane %v598_v42, 1  ;;  %v569_v4 = vadd.f32 %v568_v46, %v567_v61 }
 0xa1f   :  { %v545_v25 = vmul.f32 %v541_v19, %v3541_v34  ;;  %v592_v50 = vadd.f32 %v591_v21, %v590_v59 }
 0xa20   :  { %v487_v37 = vadd.f32 %v486_v2, %v468_v12  ;;  %v508_v0 = vadd.f32 %v507_v1, %v489_v9  ;;  %v576_v12 = vrot.slane %v575_v8, 1  ;;  %v600_v49 = vadd.f32 %v599_v63, %v598_v42 }
 0xa22   :  { %v506_v16 = vadd.f32 %v505_v32, %v487_v37  ;;  %v527_v29 = vadd.f32 %v526_v54, %v508_v0 }
 0xa24   :  { %v525_v14 = vadd.f32 %v524_v30, %v506_v16  ;;  %v546_v2 = vadd.f32 %v545_v25, %v527_v29  ;;  %v577_v16 = vadd.f32 %v576_v12, %v575_v8 }
 0xa26   :  { %v544_v20 = vadd.f32 %v543_v5, %v525_v14 }
 0xa5a   :  { %v557_v38 = vpop.permute.xlu1 %556 }
 0xa5b   :  { %v559_v10 = vmul.f32 %v557_v38, %v2557_v33  ;;  %v561_v44 = vmul.f32 %v557_v38, %v2560_v47 }
 0xa5d   :  { %v560_v32 = vadd.f32 %v559_v10, %v544_v20  ;;  %v562_v7 = vadd.f32 %v561_v44, %v546_v2 }
 0xa5f   :  { %v593_v24 = vadd.f32 %v592_v50, %v562_v7  ;;  %v570_v1 = vadd.f32 %v569_v4, %v560_v32 }
 0xa61   :  { %v601_v54 = vadd.f32 %v600_v49, %v593_v24  ;;  %v578_v19 = vadd.f32 %v577_v16, %v570_v1 }
 0xa63   :  { %v602_v37 = vmul.f32 20.0, %v601_v54  ;;  %v582_v9 = vrot.slane %v578_v19, %v2564_v35 }
 0xa65   :  { %v583_v14 = vmul.f32 %v582_v9, %v2566_v58  ;;  %v603_v25 = vadd.f32 %v602_v37, %v2641_v41 }
 0xa67   :  { %v604_v29 = vadd.f32 %v603_v25, %v578_v19  ;;  %584 = vadd.xlane.f32.xlu1 %v583_v14 }
 0xa69   :  { %605 = vst [vmem:[#allocation8 + $0x1] sm:$0x1] %v604_v29 }
 0xa8c   :  { %v627_v30 = vpop.xlane.xlu1 %626 }
 0xaa5   :  { %v630_v59 = vpop.xlane.xlu0 %629 }
 0xaa6   :  { %v2682_v0 = vsub.f32 %v627_v30, %v630_v59 }
 0xaa8   :  { %v639_v61 = vmul.f32 %v2682_v0, %v2356_v28 }
 0xaaa   :  { %v640_v8 = vrot.slane %v639_v61, 4 }
 0xaac   :  { %v641_v42 = vadd.f32 %v640_v8, %v639_v61 }
 0xaae   :  { %v642_v21 = vrot.slane %v641_v42, 2 }
 0xab0   :  { %v643_v38 = vadd.f32 %v642_v21, %v641_v42 }
 0xab2   :  { %v644_v2 = vrot.slane %v643_v38, 1 }
 0xab4   :  { %v645_v50 = vadd.f32 %v644_v2, %v643_v38 }
 0xaf0   :  { %v2686_v5 = vpop.xlane.xlu1 %584 }
 0xaf1   :  { %v632_v46 = vmul.f32 %v2686_v5, %v2352_v23 }
 0xaf3   :  { %v633_v63 = vrot.slane %v632_v46, 4 }
 0xaf5   :  { %v634_v12 = vadd.f32 %v633_v63, %v632_v46 }
 0xaf7   :  { %v635_v20 = vrot.slane %v634_v12, 2 }
 0xaf9   :  { %v636_v10 = vadd.f32 %v635_v20, %v634_v12 }
 0xafb   :  { %v637_v44 = vrot.slane %v636_v10, 1 }
 0xafd   :  { %v638_v32 = vadd.f32 %v637_v44, %v636_v10 }
 0xaff   :  { %v2690_v7 = vadd.f32 %v645_v50, %v638_v32 }
 0xb01   :  { %2096 = vtanh.f32 %v2690_v7 }
 0xb0e   :  { %v2097_v28 = vpop.eup %2096 }
 0xb0f   :  { %650 = vperm.xlu0 %2015, %v2097_v28   ;;  %v657_v4 = vmul.f32 %v2097_v28, %v2365_v43 }
 0xb11   :  { %659 = vrot.lane.b32.xlu1 %v657_v4, %s2295_s0 }
 0xb13   :  { %2021 = vset.pattern.permute.xlu0 %v3526_v51 }
 0xb83   :  { %v660_v23 = vpop.permute.xlu1 %659 }
 0xb84   :  { %v662_v49 = vadd.f32 %v660_v23, %v2690_v7 }
 0xb86   :  { %2098 = vtanh.f32 %v662_v49 }
 0xb8a   :  { %v2700_v16 = vpop.permute.xlu0 %650 }
 0xb8b   :  { %v664_v43 = vmul.f32 %v2700_v16, %v2381_v56 }
 0xb8d   :  { %v666_v54 = vadd.f32 %v664_v43, %v2690_v7 }
 0xb93   :  { %v2099_v24 = vpop.eup %2098 }
 0xb94   :  { %v676_v1 = vmul.f32 %v2099_v24, %v2374_v52 }
 0xb96   :  { %678 = vrot.lane.b32.xlu1 %v676_v1, %s2295_s0  ;;  %v607_v1 = vmul.f32 %v2641_v41, %v2452_v11  ;;  %v614_v11 = vmul.f32 %v2636_v40, %v2434_v53  ;;  %v3542_v41 = vmov 0   ;;  %v2750_v53 = vld [vmem:[#allocation3 + $0x3] ss:$0 sm:$0xff] }
 0xb97   :  { %v2752_v40 = vld [vmem:[#allocation6 + $0x18] sm:$0xff] }
 0xb98   :  { %3545 = vst [vmem:[#allocation28_spill] sm:$0xff] %v2752_v40 }
 0xb9a   :  { %669 = vperm.xlu1 %2016, %v2099_v24  }
 0xb9e   :  { %2017 = vset.pattern.permute.xlu1 %v3527_v17 }
 0xc08   :  { %v679_v19 = vpop.permute.xlu1 %678 }
 0xc09   :  { %v681_v37 = vadd.f32 %v679_v19, %v666_v54 }
 0xc0b   :  { %2100 = vtanh.f32 %v681_v37 }
 0xc15   :  { %v2708_v25 = vpop.permute.xlu1 %669 }
 0xc16   :  { %v683_v29 = vmul.f32 %v2708_v25, %v2393_v3 }
 0xc18   :  { %v2101_v9 = vpop.eup %2100  ;;  %v684_v59 = vadd.f32 %v683_v29, %v664_v43 }
 0xc19   :  { %v695_v14 = vmul.f32 %v2101_v9, %v2386_v62 }
 0xc1a   :  { %v685_v56 = vadd.f32 %v684_v59, %v2690_v7 }
 0xc1b   :  { %697 = vrot.lane.b32.xlu1 %v695_v14, %s2295_s0 }
 0xc1f   :  { %688 = vperm.xlu1 %2017, %v2101_v9  }
 0xc23   :  { %2018 = vset.pattern.permute.xlu1 %v3528_v15 }
 0xc8d   :  { %v698_v30 = vpop.permute.xlu1 %697 }
 0xc8e   :  { %v700_v61 = vadd.f32 %v698_v30, %v685_v56  ;;  %v3543_v30 = vld [vmem:[#allocation12_spill] sm:$0xff] }
 0xc90   :  { %2102 = vtanh.f32 %v700_v61 }
 0xc9a   :  { %v2716_v21 = vpop.permute.xlu1 %688 }
 0xc9b   :  { %v702_v46 = vmul.f32 %v2716_v21, %v2407_v18 }
 0xc9d   :  { %v2103_v8 = vpop.eup %2102  ;;  %v703_v63 = vadd.f32 %v702_v46, %v684_v59 }
 0xc9e   :  { %v714_v42 = vmul.f32 %v2103_v8, %v2400_v13 }
 0xc9f   :  { %v704_v38 = vadd.f32 %v703_v63, %v2690_v7 }
 0xca0   :  { %716 = vrot.lane.b32.xlu1 %v714_v42, %s2295_s0 }
 0xca4   :  { %707 = vperm.xlu1 %2018, %v2103_v8  }
 0xca8   :  { %2019 = vset.pattern.permute.xlu1 %v3529_v39 }
 0xd12   :  { %v717_v12 = vpop.permute.xlu1 %716 }
 0xd13   :  { %v719_v20 = vadd.f32 %v717_v12, %v704_v38  ;;  %v3544_v12 = vmov 1  }
 0xd15   :  { %2104 = vtanh.f32 %v719_v20  ;;  %v849_v20 = vmul.f32 %v2752_v40, %v2750_v53 }
 0xd1f   :  { %v2724_v44 = vpop.permute.xlu1 %707 }
 0xd20   :  { %v721_v50 = vmul.f32 %v2724_v44, %v2421_v36 }
 0xd22   :  { %v2105_v2 = vpop.eup %2104  ;;  %v722_v32 = vadd.f32 %v721_v50, %v703_v63 }
 0xd23   :  { %v733_v10 = vmul.f32 %v2105_v2, %v2414_v31 }
 0xd24   :  { %v723_v28 = vadd.f32 %v722_v32, %v2690_v7 }
 0xd25   :  { %735 = vrot.lane.b32.xlu1 %v733_v10, %s2295_s0 }
 0xd29   :  { %726 = vperm.xlu1 %2019, %v2105_v2  }
 0xd2d   :  { %2020 = vset.pattern.permute.xlu1 %v3530_v48 }
 0xd97   :  { %v736_v4 = vpop.permute.xlu1 %735 }
 0xd98   :  { %v738_v23 = vadd.f32 %v736_v4, %v723_v28 }
 0xd9a   :  { %2106 = vtanh.f32 %v738_v23 }
 0xda4   :  { %v2734_v43 = vpop.permute.xlu1 %726 }
 0xda5   :  { %v740_v54 = vmul.f32 %v2734_v43, %v2439_v57 }
 0xda7   :  { %v2107_v49 = vpop.eup %2106  ;;  %v741_v19 = vadd.f32 %v740_v54, %v722_v32  ;;  %v2756_v32 = vld [vmem:[#allocation6 + $0x58] sm:$0xff]  ;;  %v2761_v54 = vld [vmem:[#allocation6 + $0x10] sm:$0xff] }
 0xda8   :  { %v752_v24 = vmul.f32 %v2107_v49, %v2428_v45  ;;  %3546 = vst [vmem:[#allocation29_spill] sm:$0xff] %v2756_v32  ;;  %3547 = vst [vmem:[#allocation30_spill] sm:$0xff] %v2761_v54 }
 0xda9   :  { %v742_v37 = vadd.f32 %v741_v19, %v2690_v7 }
 0xdaa   :  { %754 = vrot.lane.b32.xlu1 %v752_v24, %s2295_s0 }
 0xdae   :  { %745 = vperm.xlu1 %2020, %v2107_v49  }
 0xdb2   :  { %2022 = vset.pattern.permute.xlu1 %v3531_v22 }
 0xdd2   :  { %608 = vadd.xlane.f32.xlu1 %v607_v1 }
 0xe1c   :  { %v755_v9 = vpop.permute.xlu1 %754 }
 0xe1d   :  { %v757_v14 = vadd.f32 %v755_v9, %v742_v37  ;;  %v3548_v37 = vld [vmem:[#allocation13_spill] sm:$0xff] }
 0xe1e   :  { %v787_v9 = vmul.f32 %v2686_v5, %v3548_v37 }
 0xe1f   :  { %2108 = vtanh.f32 %v757_v14  ;;  %v3549_v14 = vld [vmem:[#allocation14_spill] sm:$0xff] }
 0xe29   :  { %v2744_v56 = vpop.permute.xlu1 %745 }
 0xe2a   :  { %v759_v61 = vmul.f32 %v2744_v56, %v3543_v30 }
 0xe2c   :  { %v2109_v29 = vpop.eup %2108  ;;  %v760_v8 = vadd.f32 %v759_v61, %v741_v19  ;;  %v3551_v61 = vld [vmem:[#allocation16_spill] sm:$0xff] }
 0xe2d   :  { %v771_v59 = vmul.f32 %v2109_v29, %v2446_v6 }
 0xe2e   :  { %v761_v42 = vadd.f32 %v760_v8, %v2690_v7  ;;  %v818_v8 = vmul.f32 %v2682_v0, %v3551_v61 }
 0xe2f   :  { %773 = vrot.lane.b32.xlu0 %v771_v59, %s2295_s0  ;;  %v3550_v59 = vld [vmem:[#allocation15_spill] sm:$0xff] }
 0xe4e   :  { %615 = vadd.xlane.f32.xlu0 %v614_v11  ;;  %v795_v11 = vmul.f32 %v2682_v0, %v3550_v59 }
 0xe5b   :  { %v609_v2 = vpop.xlane.xlu1 %608 }
 0xe64   :  { %764 = vperm.xlu0 %2021, %v2109_v29   ;;  %v810_v29 = vmul.f32 %v2686_v5, %v3549_v14  ;;  %v3557_v14 = vld [vmem:[#allocation22_spill] sm:$0xff] }
 0xe68   :  { %2023 = vset.pattern.permute.xlu0 %v3542_v41 }
 0xea1   :  { %v774_v46 = vpop.permute.xlu0 %773 }
 0xea2   :  { %v776_v63 = vadd.f32 %v774_v46, %v761_v42  ;;  %v788_v42 = vrot.slane %v787_v9, 4  ;;  %v811_v46 = vrot.slane %v810_v29, 4 }
 0xea4   :  { %2110 = vtanh.f32 %v776_v63  ;;  %v796_v63 = vrot.slane %v795_v11, 4 }
 0xeb1   :  { %v2111_v38 = vpop.eup %2110 }
 0xeb2   :  { %780 = vperm.xlu1 %2022, %v2111_v38   ;;  %v819_v38 = vrot.slane %v818_v8, 4 }
 0xeb4   :  { %v820_v5 = vadd.f32 %v819_v38, %v818_v8 }
 0xeb6   :  { %2024 = vset.pattern.permute.xlu1 %v3544_v12  ;;  %v821_v38 = vrot.slane %v820_v5, 2 }
 0xed6   :  { %850 = vadd.xlane.f32.xlu1 %v849_v20  ;;  %v789_v20 = vadd.f32 %v788_v42, %v787_v9  ;;  %v693_v9 = vmul.f32 %v2716_v21, %v3557_v14 }
 0xed7   :  { %v616_v10 = vpop.xlane.xlu0 %615 }
 0xed8   :  { %v617_v50 = vadd.f32 %v616_v10, %v609_v2  ;;  %v812_v2 = vadd.f32 %v811_v46, %v810_v29  ;;  %v3552_v10 = vld [vmem:[#allocation19_spill] sm:$0xff]  ;;  %v790_v29 = vrot.slane %v789_v20, 2 }
 0xed9   :  { %v3558_v46 = vld [vmem:[#allocation23_spill] sm:$0xff] }
 0xeda   :  { %v618_v7 = vmul.f32 %v2756_v32, %v617_v50  ;;  %v672_v50 = vmul.f32 %v2708_v25, %v3552_v10  ;;  %v813_v59 = vrot.slane %v812_v2, 2  ;;  %v791_v14 = vadd.f32 %v790_v29, %v789_v20 }
 0xedc   :  { %v619_v28 = vrot.slane %v618_v7, 4 }
 0xede   :  { %v620_v4 = vadd.f32 %v619_v28, %v618_v7  ;;  %v3553_v7 = vld [vmem:[#allocation20_spill] sm:$0xff] }
 0xedf   :  { %v674_v28 = vmul.f32 %v2708_v25, %v3553_v7  ;;  %v710_v25 = vmul.f32 %v2724_v44, %v3558_v46  ;;  %v814_v7 = vadd.f32 %v813_v59, %v812_v2  ;;  %v792_v2 = vrot.slane %v791_v14, 1 }
 0xee0   :  { %v621_v23 = vrot.slane %v620_v4, 2 }
 0xee1   :  { %v815_v29 = vrot.slane %v814_v7, 1 }
 0xee2   :  { %v622_v49 = vadd.f32 %v621_v23, %v620_v4  ;;  %v797_v4 = vadd.f32 %v796_v63, %v795_v11  ;;  %v3554_v23 = vld [vmem:[#allocation17_spill] sm:$0xff]  ;;  %v3559_v11 = vld [vmem:[#allocation24_spill] sm:$0xff] }
 0xee3   :  { %v712_v8 = vmul.f32 %v2724_v44, %v3559_v11  ;;  %v750_v44 = vmul.f32 %v2744_v56, %v3539_v60 }
 0xee4   :  { %v623_v24 = vrot.slane %v622_v49, 1  ;;  %v798_v63 = vrot.slane %v797_v4, 2 }
 0xee6   :  { %v2759_v1 = vadd.f32 %v623_v24, %v622_v49  ;;  %v653_v49 = vmul.f32 %v2700_v16, %v3554_v23  ;;  %v3555_v24 = vld [vmem:[#allocation18_spill] sm:$0xff]  ;;  %v799_v11 = vadd.f32 %v798_v63, %v797_v4  ;;  %v793_v4 = vadd.f32 %v792_v2, %v791_v14 }
 0xee7   :  { %v655_v0 = vmul.f32 %v2700_v16, %v3555_v24  ;;  %v3560_v24 = vld [vmem:[#allocation25_spill] sm:$0xff] }
 0xee8   :  { %v852_v19 = vmul.f32 %v2761_v54, %v2759_v1  ;;  %v673_v61 = vadd.f32 %v672_v50, %v653_v49  ;;  %v765_v50 = vpop.permute.xlu0 %764 }
 0xee9   :  { %v675_v42 = vadd.f32 %v674_v28, %v655_v0  ;;  %v748_v0 = vmul.f32 %v2744_v56, %v2535_v55 }
 0xeea   :  { %853 = vadd.xlane.f32.xlu0 %v852_v19  ;;  %v3556_v19 = vld [vmem:[#allocation21_spill] sm:$0xff] }
 0xeeb   :  { %v691_v37 = vmul.f32 %v2716_v21, %v3556_v19  ;;  %v694_v16 = vadd.f32 %v693_v9, %v675_v42  ;;  %v729_v19 = vmul.f32 %v2734_v43, %v3560_v24  ;;  %v731_v21 = vmul.f32 %v2734_v43, %v3538_v27 }
 0xeec   :  { %v767_v42 = vmul.f32 %v765_v50, %v3540_v26  ;;  %v769_v24 = vmul.f32 %v765_v50, %v3541_v34 }
 0xeed   :  { %v692_v23 = vadd.f32 %v691_v37, %v673_v61  ;;  %v713_v49 = vadd.f32 %v712_v8, %v694_v16  ;;  %v822_v37 = vadd.f32 %v821_v38, %v820_v5  ;;  %v800_v8 = vrot.slane %v799_v11, 1 }
 0xeee   :  { %v816_v5 = vadd.f32 %v815_v29, %v814_v7 }
 0xeef   :  { %v711_v28 = vadd.f32 %v710_v25, %v692_v23  ;;  %v732_v61 = vadd.f32 %v731_v21, %v713_v49  ;;  %v823_v59 = vrot.slane %v822_v37, 1 }
 0xef1   :  { %v730_v9 = vadd.f32 %v729_v19, %v711_v28  ;;  %v751_v20 = vadd.f32 %v750_v44, %v732_v61  ;;  %v824_v38 = vadd.f32 %v823_v59, %v822_v37  ;;  %v801_v28 = vadd.f32 %v800_v8, %v799_v11  ;;  %v2806_v37 = vld [vmem:[#allocation6 + $0x30] sm:$0xff] }
 0xef3   :  { %v749_v43 = vadd.f32 %v748_v0, %v730_v9  ;;  %v770_v16 = vadd.f32 %v769_v24, %v751_v20 }
 0xef5   :  { %v768_v23 = vadd.f32 %v767_v42, %v749_v43 }
 0xf2d   :  { %v781_v25 = vpop.permute.xlu1 %780 }
 0xf2e   :  { %v783_v55 = vmul.f32 %v781_v25, %v2557_v33  ;;  %v785_v56 = vmul.f32 %v781_v25, %v2560_v47 }
 0xf30   :  { %v784_v19 = vadd.f32 %v783_v55, %v768_v23  ;;  %v786_v63 = vadd.f32 %v785_v56, %v770_v16 }
 0xf32   :  { %v794_v21 = vadd.f32 %v793_v4, %v784_v19  ;;  %v817_v50 = vadd.f32 %v816_v5, %v786_v63 }
 0xf34   :  { %v825_v49 = vadd.f32 %v824_v38, %v817_v50  ;;  %v802_v0 = vadd.f32 %v801_v28, %v794_v21  ;;  %v2819_v50 = vld [vmem:[#allocation6 + $0x78] sm:$0xff] }
 0xf36   :  { %v826_v44 = vmul.f32 20.0, %v825_v49  ;;  %v806_v9 = vrot.slane %v802_v0, %v2564_v35  ;;  %v2824_v49 = vld [vmem:[#allocation6] sm:$0xff] }
 0xf38   :  { %v807_v61 = vmul.f32 %v806_v9, %v2566_v58  ;;  %v827_v24 = vadd.f32 %v826_v44, %v2759_v1  ;;  %v2812_v58 = vld [vmem:[#allocation6 + $0x28] sm:$0xff] }
 0xf3a   :  { %v828_v42 = vadd.f32 %v827_v24, %v802_v0  ;;  %808 = vadd.xlane.f32.xlu1 %v807_v61  ;;  %v831_v0 = vmul.f32 %v2824_v49, %v2759_v1 }
 0xf3c   :  { %829 = vst [vmem:[#allocation8 + $0x2] sm:$0x1] %v828_v42 }
 0xf5f   :  { %v851_v7 = vpop.xlane.xlu1 %850 }
 0xf73   :  { %v854_v14 = vpop.xlane.xlu0 %853 }
 0xf74   :  { %v2804_v55 = vsub.f32 %v851_v7, %v854_v14  ;;  %v2834_v14 = vld [vmem:[#allocation6 + $0x60] sm:$0xff] }
 0xf76   :  { %v863_v11 = vmul.f32 %v2806_v37, %v2804_v55 }
 0xf78   :  { %v864_v43 = vrot.slane %v863_v11, 4 }
 0xf7a   :  { %v865_v20 = vadd.f32 %v864_v43, %v863_v11 }
 0xf7c   :  { %v866_v29 = vrot.slane %v865_v20, 2 }
 0xf7e   :  { %v867_v8 = vadd.f32 %v866_v29, %v865_v20 }
 0xf80   :  { %v868_v56 = vrot.slane %v867_v8, 1 }
 0xf82   :  { %v869_v19 = vadd.f32 %v868_v56, %v867_v8 }
 0xfc3   :  { %v2810_v2 = vpop.xlane.xlu1 %808 }
 0xfc4   :  { %v856_v59 = vmul.f32 %v2812_v58, %v2810_v2 }
 0xfc6   :  { %v857_v25 = vrot.slane %v856_v59, 4 }
 0xfc8   :  { %v858_v23 = vadd.f32 %v857_v25, %v856_v59 }
 0xfca   :  { %v859_v16 = vrot.slane %v858_v23, 2 }
 0xfcc   :  { %v860_v4 = vadd.f32 %v859_v16, %v858_v23 }
 0xfce   :  { %v861_v5 = vrot.slane %v860_v4, 1 }
 0xfd0   :  { %v862_v63 = vadd.f32 %v861_v5, %v860_v4 }
 0xfd2   :  { %v2816_v38 = vadd.f32 %v869_v19, %v862_v63 }
 0xfd4   :  { %2112 = vtanh.f32 %v2816_v38 }
 0xfe1   :  { %v2113_v21 = vpop.eup %2112 }
 0xfe2   :  { %874 = vperm.xlu0 %2023, %v2113_v21   ;;  %v881_v28 = vmul.f32 %v2819_v50, %v2113_v21 }
 0xfe4   :  { %883 = vrot.lane.b32.xlu1 %v881_v28, %s2295_s0 }
 0xfe6   :  { %2029 = vset.pattern.permute.xlu0 %v3526_v51 }
0x1001   :  { %832 = vadd.xlane.f32.xlu0 %v831_v0 }
0x1056   :  { %v884_v44 = vpop.permute.xlu1 %883 }
0x1057   :  { %v886_v9 = vadd.f32 %v884_v44, %v2816_v38 }
0x1059   :  { %2114 = vtanh.f32 %v886_v9 }
0x105d   :  { %v2832_v42 = vpop.permute.xlu0 %874 }
0x105e   :  { %v888_v1 = vmul.f32 %v2834_v14, %v2832_v42 }
0x1060   :  { %v890_v7 = vadd.f32 %v888_v1, %v2816_v38 }
0x1066   :  { %v2115_v61 = vpop.eup %2114 }
0x1067   :  { %v900_v24 = vmul.f32 %v2115_v61, %v2374_v52 }
0x1069   :  { %902 = vrot.lane.b32.xlu1 %v900_v24, %s2295_s0 }
0x106d   :  { %893 = vperm.xlu1 %2024, %v2115_v61  }
0x1071   :  { %2025 = vset.pattern.permute.xlu1 %v3527_v17 }
0x10db   :  { %v903_v11 = vpop.permute.xlu1 %902 }
0x10dc   :  { %v905_v43 = vadd.f32 %v903_v11, %v890_v7 }
0x10de   :  { %2116 = vtanh.f32 %v905_v43 }
0x10e8   :  { %v2842_v59 = vpop.permute.xlu1 %893 }
0x10e9   :  { %v907_v25 = vmul.f32 %v2842_v59, %v2393_v3 }
0x10eb   :  { %v2117_v20 = vpop.eup %2116  ;;  %v908_v8 = vadd.f32 %v907_v25, %v888_v1 }
0x10ec   :  { %v919_v29 = vmul.f32 %v2117_v20, %v2386_v62 }
0x10ed   :  { %v909_v23 = vadd.f32 %v908_v8, %v2816_v38 }
0x10ee   :  { %921 = vrot.lane.b32.xlu1 %v919_v29, %s2295_s0 }
0x10f2   :  { %912 = vperm.xlu1 %2025, %v2117_v20  }
0x10f6   :  { %2026 = vset.pattern.permute.xlu1 %v3528_v15 }
0x1160   :  { %v922_v16 = vpop.permute.xlu1 %921 }
0x1161   :  { %v924_v56 = vadd.f32 %v922_v16, %v909_v23 }
0x1163   :  { %2118 = vtanh.f32 %v924_v56 }
0x116d   :  { %v2850_v19 = vpop.permute.xlu1 %912 }
0x116e   :  { %v926_v63 = vmul.f32 %v2850_v19, %v2407_v18 }
0x1170   :  { %v2119_v4 = vpop.eup %2118  ;;  %v927_v21 = vadd.f32 %v926_v63, %v908_v8 }
0x1171   :  { %v938_v5 = vmul.f32 %v2119_v4, %v2400_v13 }
0x1172   :  { %v928_v28 = vadd.f32 %v927_v21, %v2816_v38 }
0x1173   :  { %940 = vrot.lane.b32.xlu1 %v938_v5, %s2295_s0 }
0x1177   :  { %931 = vperm.xlu1 %2026, %v2119_v4  }
0x117b   :  { %2027 = vset.pattern.permute.xlu1 %v3529_v39 }
0x11e5   :  { %v941_v0 = vpop.permute.xlu1 %940 }
0x11e6   :  { %v943_v44 = vadd.f32 %v941_v0, %v928_v28  ;;  %v2874_v28 = vld [vmem:[#allocation6 + $0x8] sm:$0xff] }
0x11e7   :  { %3561 = vst [vmem:[#allocation13_spill] sm:$0xff] %v2874_v28  ;;  %v838_v0 = vmul.f32 %v2874_v28, %v2750_v53 }
0x11e8   :  { %2120 = vtanh.f32 %v943_v44 }
0x11f2   :  { %v2858_v24 = vpop.permute.xlu1 %931 }
0x11f3   :  { %v945_v1 = vmul.f32 %v2858_v24, %v2421_v36 }
0x11f5   :  { %v2121_v9 = vpop.eup %2120  ;;  %v946_v7 = vadd.f32 %v945_v1, %v927_v21 }
0x11f6   :  { %v957_v61 = vmul.f32 %v2121_v9, %v2414_v31 }
0x11f7   :  { %v947_v11 = vadd.f32 %v946_v7, %v2816_v38 }
0x11f8   :  { %959 = vrot.lane.b32.xlu1 %v957_v61, %s2295_s0 }
0x11fc   :  { %950 = vperm.xlu1 %2027, %v2121_v9  }
0x1200   :  { %2028 = vset.pattern.permute.xlu1 %v3530_v48 }
0x126a   :  { %v960_v43 = vpop.permute.xlu1 %959 }
0x126b   :  { %v962_v20 = vadd.f32 %v960_v43, %v947_v11 }
0x126d   :  { %2122 = vtanh.f32 %v962_v20  ;;  %v2884_v20 = vld [vmem:[#allocation3 + $0x4] ss:$0 sm:$0xff] }
0x126e   :  { %v1073_v53 = vmul.f32 %v2752_v40, %v2884_v20 }
0x1277   :  { %v2866_v8 = vpop.permute.xlu1 %950 }
0x1278   :  { %v964_v23 = vmul.f32 %v2866_v8, %v2439_v57 }
0x127a   :  { %v2123_v29 = vpop.eup %2122  ;;  %v965_v16 = vadd.f32 %v964_v23, %v946_v7 }
0x127b   :  { %v976_v25 = vmul.f32 %v2123_v29, %v2428_v45 }
0x127c   :  { %v966_v56 = vadd.f32 %v965_v16, %v2816_v38 }
0x127d   :  { %978 = vrot.lane.b32.xlu1 %v976_v25, %s2295_s0 }
0x1281   :  { %969 = vperm.xlu1 %2028, %v2123_v29   ;;  %v833_v29 = vpop.xlane.xlu0 %832 }
0x1285   :  { %2030 = vset.pattern.permute.xlu1 %v3531_v22 }
0x12ef   :  { %v979_v4 = vpop.permute.xlu1 %978 }
0x12f0   :  { %v981_v5 = vadd.f32 %v979_v4, %v966_v56 }
0x12f2   :  { %2124 = vtanh.f32 %v981_v5 }
0x12fc   :  { %v2878_v44 = vpop.permute.xlu1 %969 }
0x12fd   :  { %v983_v9 = vmul.f32 %v2878_v44, %v3543_v30 }
0x12ff   :  { %v2125_v63 = vpop.eup %2124  ;;  %v984_v61 = vadd.f32 %v983_v9, %v965_v16  ;;  %v2893_v9 = vld [vmem:[#allocation6 + $0x38] sm:$0xff] }
0x1300   :  { %988 = vperm.xlu0 %2029, %v2125_v63   ;;  %v995_v21 = vmul.f32 %v2125_v63, %v2446_v6  ;;  %3562 = vst [vmem:[#allocation14_spill] sm:$0xff] %v2893_v9 }
0x1301   :  { %v985_v1 = vadd.f32 %v984_v61, %v2816_v38  ;;  %v1011_v61 = vmul.f32 %v2893_v9, %v2810_v2 }
0x1302   :  { %997 = vrot.lane.b32.xlu1 %v995_v21, %s2295_s0 }
0x1304   :  { %2031 = vset.pattern.permute.xlu0 %v3542_v41 }
0x1326   :  { %839 = vadd.xlane.f32.xlu1 %v838_v0 }
0x1374   :  { %v998_v7 = vpop.permute.xlu1 %997 }
0x1375   :  { %v1000_v11 = vadd.f32 %v998_v7, %v985_v1  ;;  %v2897_v1 = vld [vmem:[#allocation6 + $0x48] sm:$0xff] }
0x1376   :  { %3563 = vst [vmem:[#allocation15_spill] sm:$0xff] %v2897_v1  ;;  %v1034_v7 = vmul.f32 %v2897_v1, %v2810_v2  ;;  %v3566_v2 = vld [vmem:[#allocation20_spill] sm:$0xff] }
0x1377   :  { %2126 = vtanh.f32 %v1000_v11  ;;  %v2901_v11 = vld [vmem:[#allocation6 + $0x40] sm:$0xff] }
0x1378   :  { %3564 = vst [vmem:[#allocation16_spill] sm:$0xff] %v2901_v11 }
0x1384   :  { %v2127_v43 = vpop.eup %2126 }
0x1385   :  { %1004 = vperm.xlu1 %2030, %v2127_v43   ;;  %v1019_v43 = vmul.f32 %v2901_v11, %v2804_v55  ;;  %v2913_v11 = vld [vmem:[#allocation6 + $0x68] sm:$0xff] }
0x1386   :  { %3567 = vst [vmem:[#allocation18_spill] sm:$0xff] %v2913_v11  ;;  %v877_v9 = vmul.f32 %v2913_v11, %v2832_v42 }
0x1389   :  { %2032 = vset.pattern.permute.xlu1 %v3544_v12 }
0x13a9   :  { %1074 = vadd.xlane.f32.xlu1 %v1073_v53  ;;  %v2905_v53 = vld [vmem:[#allocation6 + $0x50] sm:$0xff] }
0x13aa   :  { %3565 = vst [vmem:[#allocation17_spill] sm:$0xff] %v2905_v53 }
0x13af   :  { %v840_v25 = vpop.xlane.xlu1 %839 }
0x13b0   :  { %v841_v23 = vadd.f32 %v840_v25, %v833_v29  ;;  %v1042_v29 = vmul.f32 %v2905_v53, %v2804_v55  ;;  %v1012_v25 = vrot.slane %v1011_v61, 4  ;;  %v2917_v55 = vld [vmem:[#allocation6 + $0x70] sm:$0xff] }
0x13b1   :  { %3568 = vst [vmem:[#allocation31_spill] sm:$0xff] %v2917_v55  ;;  %v879_v53 = vmul.f32 %v2917_v55, %v2832_v42  ;;  %v3572_v55 = vld [vmem:[#allocation25_spill] sm:$0xff] }
0x13b2   :  { %v842_v16 = vmul.f32 %v2756_v32, %v841_v23  ;;  %v1035_v23 = vrot.slane %v1034_v7, 4 }
0x13b4   :  { %v843_v56 = vrot.slane %v842_v16, 4 }
0x13b6   :  { %v844_v38 = vadd.f32 %v843_v56, %v842_v16  ;;  %v1020_v16 = vrot.slane %v1019_v43, 4  ;;  %v1043_v56 = vrot.slane %v1042_v29, 4 }
0x13b8   :  { %v845_v4 = vrot.slane %v844_v38, 2  ;;  %v1044_v1 = vadd.f32 %v1043_v56, %v1042_v29  ;;  %v3571_v56 = vld [vmem:[#allocation24_spill] sm:$0xff] }
0x13b9   :  { %v936_v11 = vmul.f32 %v2858_v24, %v3571_v56 }
0x13ba   :  { %v846_v5 = vadd.f32 %v845_v4, %v844_v38  ;;  %v1013_v38 = vadd.f32 %v1012_v25, %v1011_v61  ;;  %v1036_v4 = vadd.f32 %v1035_v23, %v1034_v7  ;;  %v3569_v61 = vld [vmem:[#allocation21_spill] sm:$0xff]  ;;  %v3570_v25 = vld [vmem:[#allocation22_spill] sm:$0xff] }
0x13bb   :  { %v915_v7 = vmul.f32 %v2850_v19, %v3569_v61  ;;  %v917_v23 = vmul.f32 %v2850_v19, %v3570_v25  ;;  %v953_v61 = vmul.f32 %v2866_v8, %v3572_v55  ;;  %v955_v19 = vmul.f32 %v2866_v8, %v3538_v27 }
0x13bc   :  { %v847_v63 = vrot.slane %v846_v5, 1 }
0x13be   :  { %v2889_v21 = vadd.f32 %v847_v63, %v846_v5  ;;  %v896_v5 = vmul.f32 %v2842_v59, %v3552_v10  ;;  %v898_v63 = vmul.f32 %v2842_v59, %v3566_v2  ;;  %v1014_v10 = vrot.slane %v1013_v38, 2 }
0x13bf   :  { %v1037_v59 = vrot.slane %v1036_v4, 2 }
0x13c0   :  { %v1076_v0 = vmul.f32 %v2761_v54, %v2889_v21  ;;  %v899_v29 = vadd.f32 %v898_v63, %v879_v53  ;;  %v1045_v54 = vrot.slane %v1044_v1, 2  ;;  %v1015_v25 = vadd.f32 %v1014_v10, %v1013_v38  ;;  %v3573_v63 = vld [vmem:[#allocation27_spill] sm:$0xff] }
0x13c1   :  { %v1038_v40 = vadd.f32 %v1037_v59, %v1036_v4 }
0x13c2   :  { %1077 = vadd.xlane.f32.xlu0 %v1076_v0  ;;  %v1021_v0 = vadd.f32 %v1020_v16, %v1019_v43  ;;  %v897_v43 = vadd.f32 %v896_v5, %v877_v9  ;;  %v934_v16 = vmul.f32 %v2858_v24, %v3558_v46  ;;  %v918_v42 = vadd.f32 %v917_v23, %v899_v29  ;;  %v989_v9 = vpop.permute.xlu0 %988 }
0x13c3   :  { %v972_v46 = vmul.f32 %v2878_v44, %v3573_v63  ;;  %v974_v24 = vmul.f32 %v2878_v44, %v3539_v60  ;;  %v991_v29 = vmul.f32 %v989_v9, %v3540_v26  ;;  %v993_v55 = vmul.f32 %v989_v9, %v3541_v34 }
0x13c4   :  { %v1022_v2 = vrot.slane %v1021_v0, 2  ;;  %v916_v32 = vadd.f32 %v915_v7, %v897_v43  ;;  %v937_v5 = vadd.f32 %v936_v11, %v918_v42  ;;  %v1046_v7 = vadd.f32 %v1045_v54, %v1044_v1 }
0x13c5   :  { %v1016_v38 = vrot.slane %v1015_v25, 1  ;;  %v1039_v4 = vrot.slane %v1038_v40, 1 }
0x13c6   :  { %v935_v53 = vadd.f32 %v934_v16, %v916_v32  ;;  %v1023_v56 = vadd.f32 %v1022_v2, %v1021_v0  ;;  %v956_v43 = vadd.f32 %v955_v19, %v937_v5  ;;  %v1047_v32 = vrot.slane %v1046_v7, 1 }
0x13c7   :  { %v1017_v54 = vadd.f32 %v1016_v38, %v1015_v25  ;;  %v1040_v1 = vadd.f32 %v1039_v4, %v1038_v40 }
0x13c8   :  { %v954_v23 = vadd.f32 %v953_v61, %v935_v53  ;;  %v975_v10 = vadd.f32 %v974_v24, %v956_v43  ;;  %v1024_v59 = vrot.slane %v1023_v56, 1  ;;  %v1048_v61 = vadd.f32 %v1047_v32, %v1046_v7  ;;  %v2942_v43 = vld [vmem:[#allocation6 + $0x20] sm:$0xff] }
0x13ca   :  { %v973_v8 = vadd.f32 %v972_v46, %v954_v23  ;;  %v994_v42 = vadd.f32 %v993_v55, %v975_v10  ;;  %v1025_v46 = vadd.f32 %v1024_v59, %v1023_v56 }
0x13cc   :  { %v992_v16 = vadd.f32 %v991_v29, %v973_v8 }
0x1400   :  { %v1005_v11 = vpop.permute.xlu1 %1004 }
0x1401   :  { %v1007_v63 = vmul.f32 %v1005_v11, %v2557_v33  ;;  %v1009_v44 = vmul.f32 %v1005_v11, %v2560_v47 }
0x1403   :  { %v1008_v2 = vadd.f32 %v1007_v63, %v992_v16  ;;  %v1010_v0 = vadd.f32 %v1009_v44, %v994_v42 }
0x1405   :  { %v1018_v19 = vadd.f32 %v1017_v54, %v1008_v2  ;;  %v1041_v9 = vadd.f32 %v1040_v1, %v1010_v0 }
0x1407   :  { %v1049_v53 = vadd.f32 %v1048_v61, %v1041_v9  ;;  %v1026_v5 = vadd.f32 %v1025_v46, %v1018_v19 }
0x1409   :  { %v1050_v24 = vmul.f32 20.0, %v1049_v53  ;;  %v1030_v23 = vrot.slane %v1026_v5, %v2564_v35 }
0x140b   :  { %v1031_v55 = vmul.f32 %v2942_v43, %v1030_v23  ;;  %v1051_v29 = vadd.f32 %v1050_v24, %v2889_v21 }
0x140d   :  { %v1052_v8 = vadd.f32 %v1051_v29, %v1026_v5  ;;  %1032 = vadd.xlane.f32.xlu1 %v1031_v55 }
0x140f   :  { %1053 = vst [vmem:[#allocation8 + $0x3] sm:$0x1] %v1052_v8 }
0x1432   :  { %v1075_v25 = vpop.xlane.xlu1 %1074 }
0x144b   :  { %v1078_v40 = vpop.xlane.xlu0 %1077 }
0x144c   :  { %v2946_v63 = vsub.f32 %v1075_v25, %v1078_v40 }
0x144e   :  { %v1087_v56 = vmul.f32 %v2806_v37, %v2946_v63 }
0x1450   :  { %v1088_v7 = vrot.slane %v1087_v56, 4 }
0x1452   :  { %v1089_v10 = vadd.f32 %v1088_v7, %v1087_v56 }
0x1454   :  { %v1090_v4 = vrot.slane %v1089_v10, 2 }
0x1456   :  { %v1091_v59 = vadd.f32 %v1090_v4, %v1089_v10 }
0x1458   :  { %v1092_v44 = vrot.slane %v1091_v59, 1 }
0x145a   :  { %v1093_v2 = vadd.f32 %v1092_v44, %v1091_v59 }
0x1496   :  { %v2950_v38 = vpop.xlane.xlu1 %1032 }
0x1497   :  { %v1080_v32 = vmul.f32 %v2812_v58, %v2950_v38 }
0x1499   :  { %v1081_v11 = vrot.slane %v1080_v32, 4 }
0x149b   :  { %v1082_v16 = vadd.f32 %v1081_v11, %v1080_v32 }
0x149d   :  { %v1083_v42 = vrot.slane %v1082_v16, 2 }
0x149f   :  { %v1084_v54 = vadd.f32 %v1083_v42, %v1082_v16 }
0x14a1   :  { %v1085_v1 = vrot.slane %v1084_v54, 1 }
0x14a3   :  { %v1086_v0 = vadd.f32 %v1085_v1, %v1084_v54 }
0x14a5   :  { %v2954_v61 = vadd.f32 %v1093_v2, %v1086_v0 }
0x14a7   :  { %2128 = vtanh.f32 %v2954_v61 }
0x14b4   :  { %v2129_v19 = vpop.eup %2128 }
0x14b5   :  { %1098 = vperm.xlu0 %2031, %v2129_v19   ;;  %v1105_v9 = vmul.f32 %v2819_v50, %v2129_v19 }
0x14b7   :  { %1107 = vrot.lane.b32.xlu1 %v1105_v9, %s2295_s0 }
0x14b9   :  { %2037 = vset.pattern.permute.xlu0 %v3526_v51 }
0x1529   :  { %v1108_v46 = vpop.permute.xlu1 %1107 }
0x152a   :  { %v1110_v53 = vadd.f32 %v1108_v46, %v2954_v61 }
0x152c   :  { %2130 = vtanh.f32 %v1110_v53 }
0x1530   :  { %v2964_v23 = vpop.permute.xlu0 %1098 }
0x1531   :  { %v1112_v55 = vmul.f32 %v2834_v14, %v2964_v23 }
0x1533   :  { %v1114_v29 = vadd.f32 %v1112_v55, %v2954_v61 }
0x1539   :  { %v2131_v5 = vpop.eup %2130 }
0x153a   :  { %v1124_v24 = vmul.f32 %v2131_v5, %v2374_v52 }
0x153c   :  { %1126 = vrot.lane.b32.xlu1 %v1124_v24, %s2295_s0 }
0x1540   :  { %1117 = vperm.xlu1 %2032, %v2131_v5  }
0x1544   :  { %2033 = vset.pattern.permute.xlu1 %v3527_v17 }
0x15ae   :  { %v1127_v8 = vpop.permute.xlu1 %1126 }
0x15af   :  { %v1129_v40 = vadd.f32 %v1127_v8, %v1114_v29 }
0x15b1   :  { %2132 = vtanh.f32 %v1129_v40 }
0x15bb   :  { %v2972_v7 = vpop.permute.xlu1 %1117 }
0x15bc   :  { %v1131_v10 = vmul.f32 %v2972_v7, %v2393_v3 }
0x15be   :  { %v2133_v25 = vpop.eup %2132  ;;  %v1132_v4 = vadd.f32 %v1131_v10, %v1112_v55 }
0x15bf   :  { %v1143_v56 = vmul.f32 %v2133_v25, %v2386_v62 }
0x15c0   :  { %v1133_v32 = vadd.f32 %v1132_v4, %v2954_v61 }
0x15c1   :  { %1145 = vrot.lane.b32.xlu1 %v1143_v56, %s2295_s0  ;;  %v1055_v56 = vmul.f32 %v2824_v49, %v2889_v21  ;;  %v1062_v21 = vmul.f32 %v2874_v28, %v2884_v20  ;;  %v3574_v20 = vld [vmem:[#allocation28_spill] sm:$0xff] }
0x15c5   :  { %1136 = vperm.xlu1 %2033, %v2133_v25  }
0x15c9   :  { %2034 = vset.pattern.permute.xlu1 %v3528_v15 }
0x1633   :  { %v1146_v11 = vpop.permute.xlu1 %1145 }
0x1634   :  { %v1148_v59 = vadd.f32 %v1146_v11, %v1133_v32 }
0x1636   :  { %2134 = vtanh.f32 %v1148_v59 }
0x1640   :  { %v2980_v44 = vpop.permute.xlu1 %1136 }
0x1641   :  { %v1150_v54 = vmul.f32 %v2980_v44, %v2407_v18 }
0x1643   :  { %v2135_v16 = vpop.eup %2134  ;;  %v1151_v1 = vadd.f32 %v1150_v54, %v1132_v4 }
0x1644   :  { %v1162_v42 = vmul.f32 %v2135_v16, %v2400_v13 }
0x1645   :  { %v1152_v2 = vadd.f32 %v1151_v1, %v2954_v61 }
0x1646   :  { %1164 = vrot.lane.b32.xlu1 %v1162_v42, %s2295_s0 }
0x164a   :  { %1155 = vperm.xlu1 %2034, %v2135_v16  }
0x164e   :  { %2035 = vset.pattern.permute.xlu1 %v3529_v39 }
0x16b8   :  { %v1165_v0 = vpop.permute.xlu1 %1164 }
0x16b9   :  { %v1167_v19 = vadd.f32 %v1165_v0, %v1152_v2 }
0x16bb   :  { %2136 = vtanh.f32 %v1167_v19 }
0x16c5   :  { %v2988_v53 = vpop.permute.xlu1 %1155 }
0x16c6   :  { %v1169_v5 = vmul.f32 %v2988_v53, %v2421_v36 }
0x16c8   :  { %v2137_v9 = vpop.eup %2136  ;;  %v1170_v24 = vadd.f32 %v1169_v5, %v1151_v1 }
0x16c9   :  { %v1181_v46 = vmul.f32 %v2137_v9, %v2414_v31 }
0x16ca   :  { %v1171_v55 = vadd.f32 %v1170_v24, %v2954_v61 }
0x16cb   :  { %1183 = vrot.lane.b32.xlu1 %v1181_v46, %s2295_s0 }
0x16cf   :  { %1174 = vperm.xlu1 %2035, %v2137_v9  }
0x16d3   :  { %2036 = vset.pattern.permute.xlu1 %v3530_v48 }
0x173d   :  { %v1184_v29 = vpop.permute.xlu1 %1183 }
0x173e   :  { %v1186_v8 = vadd.f32 %v1184_v29, %v1171_v55 }
0x1740   :  { %2138 = vtanh.f32 %v1186_v8 }
0x174a   :  { %v2998_v10 = vpop.permute.xlu1 %1174 }
0x174b   :  { %v1188_v4 = vmul.f32 %v2998_v10, %v2439_v57 }
0x174d   :  { %v2139_v40 = vpop.eup %2138  ;;  %v1189_v32 = vadd.f32 %v1188_v4, %v1170_v24  ;;  %v3011_v24 = vld [vmem:[#allocation3 + $0x5] ss:$0 sm:$0xff] }
0x174e   :  { %v1200_v25 = vmul.f32 %v2139_v40, %v2428_v45  ;;  %v1297_v55 = vmul.f32 %v3574_v20, %v3011_v24 }
0x174f   :  { %v1190_v11 = vadd.f32 %v1189_v32, %v2954_v61 }
0x1750   :  { %1202 = vrot.lane.b32.xlu1 %v1200_v25, %s2295_s0  ;;  %v3575_v25 = vld [vmem:[#allocation29_spill] sm:$0xff] }
0x1754   :  { %1193 = vperm.xlu1 %2036, %v2139_v40  }
0x1758   :  { %2038 = vset.pattern.permute.xlu1 %v3531_v22 }
0x1778   :  { %1056 = vadd.xlane.f32.xlu1 %v1055_v56 }
0x17c2   :  { %v1203_v59 = vpop.permute.xlu1 %1202 }
0x17c3   :  { %v1205_v16 = vadd.f32 %v1203_v59, %v1190_v11 }
0x17c5   :  { %2140 = vtanh.f32 %v1205_v16 }
0x17cf   :  { %v1194_v1 = vpop.permute.xlu1 %1193 }
0x17d0   :  { %v1207_v2 = vmul.f32 %v1194_v1, %v3543_v30  ;;  %v1198_v30 = vmul.f32 %v1194_v1, %v3539_v60 }
0x17d2   :  { %v2141_v42 = vpop.eup %2140  ;;  %v1208_v0 = vadd.f32 %v1207_v2, %v1189_v32 }
0x17d3   :  { %v1219_v54 = vmul.f32 %v2141_v42, %v2446_v6 }
0x17d4   :  { %v1209_v19 = vadd.f32 %v1208_v0, %v2954_v61  ;;  %v3578_v0 = vld [vmem:[#allocation15_spill] sm:$0xff] }
0x17d5   :  { %1221 = vrot.lane.b32.xlu0 %v1219_v54, %s2295_s0 }
0x17f4   :  { %1063 = vadd.xlane.f32.xlu0 %v1062_v21  ;;  %v3577_v21 = vld [vmem:[#allocation14_spill] sm:$0xff] }
0x17f5   :  { %v1235_v2 = vmul.f32 %v3577_v21, %v2950_v38  ;;  %v3586_v21 = vld [vmem:[#allocation22_spill] sm:$0xff] }
0x1801   :  { %v1057_v29 = vpop.xlane.xlu1 %1056 }
0x180a   :  { %1212 = vperm.xlu0 %2037, %v2141_v42   ;;  %v3576_v42 = vld [vmem:[#allocation30_spill] sm:$0xff] }
0x180e   :  { %2039 = vset.pattern.permute.xlu0 %v3542_v41 }
0x1847   :  { %v1222_v9 = vpop.permute.xlu0 %1221 }
0x1848   :  { %v1224_v46 = vadd.f32 %v1222_v9, %v1209_v19  ;;  %v1258_v19 = vmul.f32 %v3578_v0, %v2950_v38  ;;  %v3579_v9 = vld [vmem:[#allocation16_spill] sm:$0xff] }
0x184a   :  { %2142 = vtanh.f32 %v1224_v46  ;;  %v1243_v46 = vmul.f32 %v3579_v9, %v2946_v63  ;;  %v3584_v9 = vld [vmem:[#allocation31_spill] sm:$0xff] }
0x1857   :  { %v2143_v5 = vpop.eup %2142 }
0x1858   :  { %1228 = vperm.xlu1 %2038, %v2143_v5   ;;  %v3580_v5 = vld [vmem:[#allocation17_spill] sm:$0xff] }
0x1859   :  { %v1266_v20 = vmul.f32 %v3580_v5, %v2946_v63  ;;  %v1103_v63 = vmul.f32 %v3584_v9, %v2964_v23  ;;  %v3585_v5 = vld [vmem:[#allocation21_spill] sm:$0xff] }
0x185a   :  { %v1139_v0 = vmul.f32 %v2980_v44, %v3585_v5  ;;  %v3589_v9 = vld [vmem:[#allocation25_spill] sm:$0xff] }
0x185b   :  { %v1177_v5 = vmul.f32 %v2998_v10, %v3589_v9 }
0x185c   :  { %2040 = vset.pattern.permute.xlu1 %v3544_v12  ;;  %v3587_v12 = vld [vmem:[#allocation23_spill] sm:$0xff] }
0x187c   :  { %1298 = vadd.xlane.f32.xlu1 %v1297_v55  ;;  %v1236_v55 = vrot.slane %v1235_v2, 4 }
0x187d   :  { %v1064_v8 = vpop.xlane.xlu0 %1063 }
0x187e   :  { %v1065_v40 = vadd.f32 %v1064_v8, %v1057_v29  ;;  %v1259_v29 = vrot.slane %v1258_v19, 4  ;;  %v1244_v8 = vrot.slane %v1243_v46, 4 }
0x1880   :  { %v1066_v56 = vmul.f32 %v3575_v25, %v1065_v40  ;;  %v1267_v40 = vrot.slane %v1266_v20, 4  ;;  %v1237_v25 = vadd.f32 %v1236_v55, %v1235_v2  ;;  %v1141_v2 = vmul.f32 %v2980_v44, %v3586_v21 }
0x1881   :  { %v1179_v44 = vmul.f32 %v2998_v10, %v3538_v27 }
0x1882   :  { %v1067_v4 = vrot.slane %v1066_v56, 4  ;;  %v1268_v38 = vadd.f32 %v1267_v40, %v1266_v20 }
0x1884   :  { %v1068_v61 = vadd.f32 %v1067_v4, %v1066_v56  ;;  %v1260_v56 = vadd.f32 %v1259_v29, %v1258_v19  ;;  %v3581_v4 = vld [vmem:[#allocation19_spill] sm:$0xff]  ;;  %v1238_v19 = vrot.slane %v1237_v25, 2  ;;  %v1269_v40 = vrot.slane %v1268_v38, 2 }
0x1885   :  { %v1213_v21 = vpop.permute.xlu0 %1212 }
0x1886   :  { %v1069_v32 = vrot.slane %v1068_v61, 2  ;;  %v1261_v55 = vrot.slane %v1260_v56, 2 }
0x1888   :  { %v1070_v11 = vadd.f32 %v1069_v32, %v1068_v61  ;;  %v1120_v61 = vmul.f32 %v2972_v7, %v3581_v4  ;;  %v3582_v32 = vld [vmem:[#allocation20_spill] sm:$0xff] }
0x188a   :  { %v1071_v59 = vrot.slane %v1070_v11, 1 }
0x188c   :  { %v3016_v16 = vadd.f32 %v1071_v59, %v1070_v11  ;;  %v1122_v11 = vmul.f32 %v2972_v7, %v3582_v32  ;;  %v1245_v59 = vadd.f32 %v1244_v8, %v1243_v46  ;;  %v1158_v7 = vmul.f32 %v2988_v53, %v3587_v12  ;;  %v3588_v46 = vld [vmem:[#allocation24_spill] sm:$0xff] }
0x188d   :  { %v1160_v20 = vmul.f32 %v2988_v53, %v3588_v46  ;;  %v1239_v32 = vadd.f32 %v1238_v19, %v1237_v25  ;;  %v1270_v46 = vadd.f32 %v1269_v40, %v1268_v38 }
0x188e   :  { %v1300_v54 = vmul.f32 %v3576_v42, %v3016_v16  ;;  %v3583_v42 = vld [vmem:[#allocation18_spill] sm:$0xff]  ;;  %v1123_v4 = vadd.f32 %v1122_v11, %v1103_v63  ;;  %v1246_v8 = vrot.slane %v1245_v59, 2  ;;  %v3590_v63 = vld [vmem:[#allocation27_spill] sm:$0xff] }
0x188f   :  { %v1196_v12 = vmul.f32 %v1194_v1, %v3590_v63  ;;  %v1240_v10 = vrot.slane %v1239_v32, 1 }
0x1890   :  { %1301 = vadd.xlane.f32.xlu0 %v1300_v54  ;;  %v1101_v54 = vmul.f32 %v3583_v42, %v2964_v23  ;;  %v1142_v23 = vadd.f32 %v1141_v2, %v1123_v4  ;;  %v1247_v53 = vadd.f32 %v1246_v8, %v1245_v59  ;;  %v1215_v4 = vmul.f32 %v1213_v21, %v3540_v26 }
0x1891   :  { %v1217_v2 = vmul.f32 %v1213_v21, %v3541_v34  ;;  %v1241_v59 = vadd.f32 %v1240_v10, %v1239_v32 }
0x1892   :  { %v1121_v29 = vadd.f32 %v1120_v61, %v1101_v54  ;;  %v1262_v61 = vadd.f32 %v1261_v55, %v1260_v56  ;;  %v1161_v54 = vadd.f32 %v1160_v20, %v1142_v23  ;;  %v1248_v25 = vrot.slane %v1247_v53, 1 }
0x1893   :  { %v1271_v56 = vrot.slane %v1270_v46, 1 }
0x1894   :  { %v1140_v42 = vadd.f32 %v1139_v0, %v1121_v29  ;;  %v1180_v0 = vadd.f32 %v1179_v44, %v1161_v54  ;;  %v1263_v27 = vrot.slane %v1262_v61, 1  ;;  %v1249_v8 = vadd.f32 %v1248_v25, %v1247_v53 }
0x1895   :  { %v1272_v40 = vadd.f32 %v1271_v56, %v1270_v46 }
0x1896   :  { %v1159_v11 = vadd.f32 %v1158_v7, %v1140_v42  ;;  %v1199_v9 = vadd.f32 %v1198_v30, %v1180_v0 }
0x1898   :  { %v1178_v28 = vadd.f32 %v1177_v5, %v1159_v11  ;;  %v1218_v55 = vadd.f32 %v1217_v2, %v1199_v9  ;;  %v1264_v5 = vadd.f32 %v1263_v27, %v1262_v61 }
0x189a   :  { %v1197_v29 = vadd.f32 %v1196_v12, %v1178_v28 }
0x189c   :  { %v1216_v19 = vadd.f32 %v1215_v4, %v1197_v29 }
0x18d3   :  { %v1229_v42 = vpop.permute.xlu1 %1228 }
0x18d4   :  { %v1231_v7 = vmul.f32 %v1229_v42, %v2557_v33  ;;  %v1233_v1 = vmul.f32 %v1229_v42, %v2560_v47 }
0x18d6   :  { %v1232_v38 = vadd.f32 %v1231_v7, %v1216_v19  ;;  %v1234_v20 = vadd.f32 %v1233_v1, %v1218_v55 }
0x18d8   :  { %v1242_v21 = vadd.f32 %v1241_v59, %v1232_v38  ;;  %v1265_v12 = vadd.f32 %v1264_v5, %v1234_v20 }
0x18da   :  { %v1250_v30 = vadd.f32 %v1249_v8, %v1242_v21  ;;  %v1273_v28 = vadd.f32 %v1272_v40, %v1265_v12 }
0x18dc   :  { %v1274_v23 = vmul.f32 20.0, %v1273_v28  ;;  %v1254_v44 = vrot.slane %v1250_v30, %v2564_v35 }
0x18de   :  { %v1275_v11 = vadd.f32 %v1274_v23, %v3016_v16  ;;  %v1255_v9 = vmul.f32 %v2942_v43, %v1254_v44 }
0x18e0   :  { %v1276_v54 = vadd.f32 %v1275_v11, %v1250_v30  ;;  %1256 = vadd.xlane.f32.xlu1 %v1255_v9 }
0x18e2   :  { %1277 = vst [vmem:[#allocation8 + $0x4] sm:$0x1] %v1276_v54 }
0x1905   :  { %v1299_v27 = vpop.xlane.xlu1 %1298 }
0x1919   :  { %v1302_v32 = vpop.xlane.xlu0 %1301 }
0x191a   :  { %v3057_v61 = vsub.f32 %v1299_v27, %v1302_v32 }
0x191c   :  { %v1311_v46 = vmul.f32 %v2806_v37, %v3057_v61 }
0x191e   :  { %v1312_v53 = vrot.slane %v1311_v46, 4 }
0x1920   :  { %v1313_v0 = vadd.f32 %v1312_v53, %v1311_v46 }
0x1922   :  { %v1314_v2 = vrot.slane %v1313_v0, 2 }
0x1924   :  { %v1315_v25 = vadd.f32 %v1314_v2, %v1313_v0 }
0x1926   :  { %v1316_v19 = vrot.slane %v1315_v25, 1 }
0x1928   :  { %v1317_v1 = vadd.f32 %v1316_v19, %v1315_v25 }
0x1969   :  { %v3061_v4 = vpop.xlane.xlu1 %1256 }
0x196a   :  { %v1304_v29 = vmul.f32 %v2812_v58, %v3061_v4  ;;  %v1279_v58 = vmul.f32 %v2824_v49, %v3016_v16 }
0x196c   :  { %v1305_v10 = vrot.slane %v1304_v29, 4 }
0x196e   :  { %v1306_v56 = vadd.f32 %v1305_v10, %v1304_v29 }
0x1970   :  { %v1307_v42 = vrot.slane %v1306_v56, 2 }
0x1972   :  { %v1308_v55 = vadd.f32 %v1307_v42, %v1306_v56 }
0x1974   :  { %v1309_v7 = vrot.slane %v1308_v55, 1 }
0x1976   :  { %v1310_v59 = vadd.f32 %v1309_v7, %v1308_v55 }
0x1978   :  { %v3065_v5 = vadd.f32 %v1317_v1, %v1310_v59 }
0x197a   :  { %2144 = vtanh.f32 %v3065_v5 }
0x1987   :  { %v2145_v37 = vpop.eup %2144 }
0x1988   :  { %1322 = vperm.xlu0 %2039, %v2145_v37   ;;  %v1329_v38 = vmul.f32 %v2819_v50, %v2145_v37 }
0x198a   :  { %1331 = vrot.lane.b32.xlu1 %v1329_v38, %s2295_s0 }
0x198c   :  { %2045 = vset.pattern.permute.xlu0 %v3526_v51 }
0x19a7   :  { %1280 = vadd.xlane.f32.xlu0 %v1279_v58 }
0x19fc   :  { %v1332_v20 = vpop.permute.xlu1 %1331 }
0x19fd   :  { %v1334_v8 = vadd.f32 %v1332_v20, %v3065_v5 }
0x19ff   :  { %2146 = vtanh.f32 %v1334_v8 }
0x1a03   :  { %v3077_v50 = vpop.permute.xlu0 %1322 }
0x1a04   :  { %v1336_v12 = vmul.f32 %v2834_v14, %v3077_v50 }
0x1a06   :  { %v1338_v49 = vadd.f32 %v1336_v12, %v3065_v5 }
0x1a0c   :  { %v2147_v40 = vpop.eup %2146 }
0x1a0d   :  { %v1348_v21 = vmul.f32 %v2147_v40, %v2374_v52 }
0x1a0f   :  { %1350 = vrot.lane.b32.xlu1 %v1348_v21, %s2295_s0 }
0x1a13   :  { %1341 = vperm.xlu1 %2040, %v2147_v40  }
0x1a17   :  { %2041 = vset.pattern.permute.xlu1 %v3527_v17 }
0x1a81   :  { %v1351_v16 = vpop.permute.xlu1 %1350 }
0x1a82   :  { %v1353_v30 = vadd.f32 %v1351_v16, %v1338_v49 }
0x1a84   :  { %2148 = vtanh.f32 %v1353_v30 }
0x1a8e   :  { %v3085_v44 = vpop.permute.xlu1 %1341 }
0x1a8f   :  { %v1355_v11 = vmul.f32 %v3085_v44, %v2393_v3 }
0x1a91   :  { %v2149_v28 = vpop.eup %2148  ;;  %v1356_v9 = vadd.f32 %v1355_v11, %v1336_v12 }
0x1a92   :  { %v1367_v23 = vmul.f32 %v2149_v28, %v2386_v62 }
0x1a93   :  { %v1357_v14 = vadd.f32 %v1356_v9, %v3065_v5 }
0x1a94   :  { %1369 = vrot.lane.b32.xlu1 %v1367_v23, %s2295_s0 }
0x1a98   :  { %1360 = vperm.xlu1 %2041, %v2149_v28   ;;  %v3591_v28 = vld [vmem:[#allocation13_spill] sm:$0xff] }
0x1a99   :  { %v1286_v23 = vmul.f32 %v3591_v28, %v3011_v24 }
0x1a9c   :  { %2042 = vset.pattern.permute.xlu1 %v3528_v15 }
0x1b06   :  { %v1370_v54 = vpop.permute.xlu1 %1369 }
0x1b07   :  { %v1372_v32 = vadd.f32 %v1370_v54, %v1357_v14 }
0x1b09   :  { %2150 = vtanh.f32 %v1372_v32 }
0x1b13   :  { %v3093_v53 = vpop.permute.xlu1 %1360 }
0x1b14   :  { %v1374_v0 = vmul.f32 %v3093_v53, %v2407_v18 }
0x1b16   :  { %v2151_v27 = vpop.eup %2150  ;;  %v1375_v2 = vadd.f32 %v1374_v0, %v1356_v9  ;;  %v3592_v9 = vld [vmem:[#allocation12_spill] sm:$0xff] }
0x1b17   :  { %v1386_v46 = vmul.f32 %v2151_v27, %v2400_v13 }
0x1b18   :  { %v1376_v29 = vadd.f32 %v1375_v2, %v3065_v5 }
0x1b19   :  { %1388 = vrot.lane.b32.xlu1 %v1386_v46, %s2295_s0 }
0x1b1d   :  { %1379 = vperm.xlu1 %2042, %v2151_v27  }
0x1b21   :  { %2043 = vset.pattern.permute.xlu1 %v3529_v39 }
0x1b8b   :  { %v1389_v10 = vpop.permute.xlu1 %1388 }
0x1b8c   :  { %v1391_v25 = vadd.f32 %v1389_v10, %v1376_v29  ;;  %v3125_v29 = vld [vmem:[#allocation3 + $0x6] ss:$0 sm:$0xff] }
0x1b8d   :  { %v3127_v10 = vld [vmem:[#allocation6 + $0x18] sm:$0xff] }
0x1b8e   :  { %2152 = vtanh.f32 %v1391_v25  ;;  %v1521_v24 = vmul.f32 %v3127_v10, %v3125_v29  ;;  %v1281_v25 = vpop.xlane.xlu0 %1280 }
0x1b98   :  { %v3101_v19 = vpop.permute.xlu1 %1379 }
0x1b99   :  { %v1393_v55 = vmul.f32 %v3101_v19, %v2421_v36 }
0x1b9b   :  { %v2153_v56 = vpop.eup %2152  ;;  %v1394_v7 = vadd.f32 %v1393_v55, %v1375_v2  ;;  %v3593_v2 = vmov 1   ;;  %v3131_v55 = vld [vmem:[#allocation6 + $0x58] sm:$0xff] }
0x1b9c   :  { %v1405_v42 = vmul.f32 %v2153_v56, %v2414_v31  ;;  %3594 = vst [vmem:[#allocation28_spill] sm:$0xff] %v3131_v55 }
0x1b9d   :  { %v1395_v1 = vadd.f32 %v1394_v7, %v3065_v5 }
0x1b9e   :  { %1407 = vrot.lane.b32.xlu1 %v1405_v42, %s2295_s0 }
0x1ba2   :  { %1398 = vperm.xlu1 %2043, %v2153_v56  }
0x1ba6   :  { %2044 = vset.pattern.permute.xlu1 %v3530_v48 }
0x1c10   :  { %v1408_v59 = vpop.permute.xlu1 %1407 }
0x1c11   :  { %v1410_v37 = vadd.f32 %v1408_v59, %v1395_v1 }
0x1c13   :  { %2154 = vtanh.f32 %v1410_v37 }
0x1c1d   :  { %v3109_v20 = vpop.permute.xlu1 %1398 }
0x1c1e   :  { %v1412_v8 = vmul.f32 %v3109_v20, %v2439_v57 }
0x1c20   :  { %v2155_v38 = vpop.eup %2154  ;;  %v1413_v40 = vadd.f32 %v1412_v8, %v1394_v7  ;;  %v3136_v8 = vld [vmem:[#allocation6 + $0x10] sm:$0xff] }
0x1c21   :  { %v1424_v58 = vmul.f32 %v2155_v38, %v2428_v45 }
0x1c22   :  { %v1414_v21 = vadd.f32 %v1413_v40, %v3065_v5 }
0x1c23   :  { %1426 = vrot.lane.b32.xlu1 %v1424_v58, %s2295_s0 }
0x1c27   :  { %1417 = vperm.xlu1 %2044, %v2155_v38  }
0x1c2b   :  { %2046 = vset.pattern.permute.xlu1 %v3531_v22 }
0x1c95   :  { %v1427_v12 = vpop.permute.xlu1 %1426 }
0x1c96   :  { %v1429_v49 = vadd.f32 %v1427_v12, %v1414_v21  ;;  %v3595_v21 = vld [vmem:[#allocation14_spill] sm:$0xff] }
0x1c97   :  { %v1459_v12 = vmul.f32 %v3595_v21, %v3061_v4  ;;  %v3604_v21 = vld [vmem:[#allocation22_spill] sm:$0xff] }
0x1c98   :  { %2156 = vtanh.f32 %v1429_v49  ;;  %v3596_v49 = vld [vmem:[#allocation15_spill] sm:$0xff] }
0x1ca2   :  { %v3119_v11 = vpop.permute.xlu1 %1417 }
0x1ca3   :  { %v1431_v14 = vmul.f32 %v3119_v11, %v3592_v9 }
0x1ca5   :  { %v2157_v16 = vpop.eup %2156  ;;  %v1432_v54 = vadd.f32 %v1431_v14, %v1413_v40 }
0x1ca6   :  { %1436 = vperm.xlu0 %2045, %v2157_v16   ;;  %v1443_v30 = vmul.f32 %v2157_v16, %v2446_v6  ;;  %v1482_v16 = vmul.f32 %v3596_v49, %v3061_v4 }
0x1ca7   :  { %v1433_v32 = vadd.f32 %v1432_v54, %v3065_v5  ;;  %v1460_v54 = vrot.slane %v1459_v12, 4 }
0x1ca8   :  { %1445 = vrot.lane.b32.xlu1 %v1443_v30, %s2295_s0  ;;  %v3597_v30 = vld [vmem:[#allocation16_spill] sm:$0xff] }
0x1ca9   :  { %v1467_v28 = vmul.f32 %v3597_v30, %v3057_v61 }
0x1caa   :  { %2047 = vset.pattern.permute.xlu0 %v3542_v41 }
0x1ccc   :  { %1287 = vadd.xlane.f32.xlu1 %v1286_v23  ;;  %v3598_v23 = vld [vmem:[#allocation17_spill] sm:$0xff] }
0x1ccd   :  { %v1490_v14 = vmul.f32 %v3598_v23, %v3057_v61 }
0x1d1a   :  { %v1446_v27 = vpop.permute.xlu1 %1445 }
0x1d1b   :  { %v1448_v46 = vadd.f32 %v1446_v27, %v1433_v32  ;;  %v1483_v32 = vrot.slane %v1482_v16, 4  ;;  %v1468_v27 = vrot.slane %v1467_v28, 4 }
0x1d1d   :  { %2158 = vtanh.f32 %v1448_v46  ;;  %v1491_v46 = vrot.slane %v1490_v14, 4 }
0x1d1f   :  { %v1492_v4 = vadd.f32 %v1491_v46, %v1490_v14 }
0x1d2a   :  { %v2159_v0 = vpop.eup %2158 }
0x1d2b   :  { %1452 = vperm.xlu1 %2046, %v2159_v0   ;;  %v1461_v0 = vadd.f32 %v1460_v54, %v1459_v12  ;;  %v1365_v12 = vmul.f32 %v3093_v53, %v3604_v21  ;;  %v3605_v54 = vld [vmem:[#allocation23_spill] sm:$0xff] }
0x1d2d   :  { %v1462_v49 = vrot.slane %v1461_v0, 2 }
0x1d2f   :  { %2048 = vset.pattern.permute.xlu1 %v3593_v2  ;;  %v1463_v21 = vadd.f32 %v1462_v49, %v1461_v0 }
0x1d4f   :  { %1522 = vadd.xlane.f32.xlu1 %v1521_v24  ;;  %v1484_v24 = vadd.f32 %v1483_v32, %v1482_v16 }
0x1d51   :  { %v1485_v16 = vrot.slane %v1484_v24, 2 }
0x1d55   :  { %v1288_v56 = vpop.xlane.xlu1 %1287 }
0x1d56   :  { %v1289_v42 = vadd.f32 %v1288_v56, %v1281_v25  ;;  %v3599_v25 = vld [vmem:[#allocation19_spill] sm:$0xff] }
0x1d57   :  { %v1344_v56 = vmul.f32 %v3085_v44, %v3599_v25 }
0x1d58   :  { %v1290_v5 = vmul.f32 %v3131_v55, %v1289_v42  ;;  %v3600_v42 = vld [vmem:[#allocation20_spill] sm:$0xff] }
0x1d5a   :  { %v1291_v7 = vrot.slane %v1290_v5, 4 }
0x1d5c   :  { %v1292_v1 = vadd.f32 %v1291_v7, %v1290_v5  ;;  %v1346_v5 = vmul.f32 %v3085_v44, %v3600_v42  ;;  %v1469_v7 = vadd.f32 %v1468_v27, %v1467_v28  ;;  %v1382_v44 = vmul.f32 %v3101_v19, %v3605_v54  ;;  %v3606_v28 = vld [vmem:[#allocation24_spill] sm:$0xff] }
0x1d5d   :  { %v1384_v14 = vmul.f32 %v3101_v19, %v3606_v28  ;;  %v1493_v27 = vrot.slane %v1492_v4, 2  ;;  %v1486_v42 = vadd.f32 %v1485_v16, %v1484_v24  ;;  %v1422_v19 = vmul.f32 %v3119_v11, %v3539_v60 }
0x1d5e   :  { %v1293_v59 = vrot.slane %v1292_v1, 2  ;;  %v1470_v32 = vrot.slane %v1469_v7, 2 }
0x1d5f   :  { %v1487_v0 = vrot.slane %v1486_v42, 1 }
0x1d60   :  { %v1294_v37 = vadd.f32 %v1293_v59, %v1292_v1  ;;  %v3601_v1 = vld [vmem:[#allocation18_spill] sm:$0xff]  ;;  %v1471_v28 = vadd.f32 %v1470_v32, %v1469_v7 }
0x1d61   :  { %v1325_v59 = vmul.f32 %v3601_v1, %v3077_v50  ;;  %v3607_v1 = vld [vmem:[#allocation25_spill] sm:$0xff] }
0x1d62   :  { %v1295_v38 = vrot.slane %v1294_v37, 1  ;;  %v1472_v16 = vrot.slane %v1471_v28, 1 }
0x1d63   :  { %v1345_v30 = vadd.f32 %v1344_v56, %v1325_v59  ;;  %v1437_v56 = vpop.permute.xlu0 %1436 }
0x1d64   :  { %v3134_v58 = vadd.f32 %v1295_v38, %v1294_v37  ;;  %v3602_v37 = vld [vmem:[#allocation31_spill] sm:$0xff]  ;;  %v3603_v38 = vld [vmem:[#allocation21_spill] sm:$0xff] }
0x1d65   :  { %v1327_v61 = vmul.f32 %v3602_v37, %v3077_v50  ;;  %v1401_v37 = vmul.f32 %v3109_v20, %v3607_v1  ;;  %v1441_v1 = vmul.f32 %v1437_v56, %v3541_v34 }
0x1d66   :  { %v1524_v40 = vmul.f32 %v3136_v8, %v3134_v58 }
0x1d67   :  { %v1347_v23 = vadd.f32 %v1346_v5, %v1327_v61  ;;  %v1420_v61 = vmul.f32 %v3119_v11, %v3590_v63 }
0x1d68   :  { %1525 = vadd.xlane.f32.xlu0 %v1524_v40  ;;  %v1363_v40 = vmul.f32 %v3093_v53, %v3603_v38  ;;  %v3608_v38 = vld [vmem:[#allocation26_spill] sm:$0xff] }
0x1d69   :  { %v1366_v50 = vadd.f32 %v1365_v12, %v1347_v23  ;;  %v1403_v53 = vmul.f32 %v3109_v20, %v3608_v38  ;;  %v1439_v23 = vmul.f32 %v1437_v56, %v3540_v26  ;;  %v1464_v20 = vrot.slane %v1463_v21, 1 }
0x1d6a   :  { %v1364_v46 = vadd.f32 %v1363_v40, %v1345_v30  ;;  %v1494_v40 = vadd.f32 %v1493_v27, %v1492_v4  ;;  %v1488_v4 = vadd.f32 %v1487_v0, %v1486_v42 }
0x1d6b   :  { %v1385_v59 = vadd.f32 %v1384_v14, %v1366_v50  ;;  %v1465_v7 = vadd.f32 %v1464_v20, %v1463_v21 }
0x1d6c   :  { %v1383_v5 = vadd.f32 %v1382_v44, %v1364_v46  ;;  %v1495_v44 = vrot.slane %v1494_v40, 1 }
0x1d6d   :  { %v1404_v30 = vadd.f32 %v1403_v53, %v1385_v59 }
0x1d6e   :  { %v1402_v12 = vadd.f32 %v1401_v37, %v1383_v5  ;;  %v1473_v37 = vadd.f32 %v1472_v16, %v1471_v28  ;;  %v1496_v53 = vadd.f32 %v1495_v44, %v1494_v40  ;;  %v3181_v28 = vld [vmem:[#allocation6 + $0x30] sm:$0xff]  ;;  %v3187_v16 = vld [vmem:[#allocation6 + $0x28] sm:$0xff] }
0x1d6f   :  { %v1423_v49 = vadd.f32 %v1422_v19, %v1404_v30 }
0x1d70   :  { %v1421_v24 = vadd.f32 %v1420_v61, %v1402_v12 }
0x1d71   :  { %v1442_v50 = vadd.f32 %v1441_v1, %v1423_v49 }
0x1d72   :  { %v1440_v46 = vadd.f32 %v1439_v23, %v1421_v24 }
0x1da6   :  { %v1453_v14 = vpop.permute.xlu1 %1452 }
0x1da7   :  { %v1455_v63 = vmul.f32 %v1453_v14, %v2557_v33  ;;  %v1457_v11 = vmul.f32 %v1453_v14, %v2560_v47 }
0x1da9   :  { %v1456_v32 = vadd.f32 %v1455_v63, %v1440_v46  ;;  %v1458_v27 = vadd.f32 %v1457_v11, %v1442_v50 }
0x1dab   :  { %v1466_v56 = vadd.f32 %v1465_v7, %v1456_v32  ;;  %v1489_v5 = vadd.f32 %v1488_v4, %v1458_v27 }
0x1dad   :  { %v1474_v59 = vadd.f32 %v1473_v37, %v1466_v56  ;;  %v1497_v61 = vadd.f32 %v1496_v53, %v1489_v5  ;;  %v3194_v56 = vld [vmem:[#allocation6 + $0x78] sm:$0xff] }
0x1daf   :  { %v1498_v19 = vmul.f32 20.0, %v1497_v61  ;;  %v1478_v12 = vrot.slane %v1474_v59, %v2564_v35 }
0x1db1   :  { %v1499_v30 = vadd.f32 %v1498_v19, %v3134_v58  ;;  %v1479_v1 = vmul.f32 %v2942_v43, %v1478_v12 }
0x1db3   :  { %v1500_v23 = vadd.f32 %v1499_v30, %v1474_v59  ;;  %1480 = vadd.xlane.f32.xlu1 %v1479_v1  ;;  %v3205_v1 = vld [vmem:[#allocation6 + $0x60] sm:$0xff] }
0x1db5   :  { %1501 = vst [vmem:[#allocation8 + $0x5] sm:$0x1] %v1500_v23 }
0x1dd8   :  { %v1523_v42 = vpop.xlane.xlu1 %1522 }
0x1df1   :  { %v1526_v21 = vpop.xlane.xlu0 %1525 }
0x1df2   :  { %v3179_v63 = vsub.f32 %v1523_v42, %v1526_v21 }
0x1df4   :  { %v1535_v40 = vmul.f32 %v3181_v28, %v3179_v63 }
0x1df6   :  { %v1536_v20 = vrot.slane %v1535_v40, 4 }
0x1df8   :  { %v1537_v0 = vadd.f32 %v1536_v20, %v1535_v40 }
0x1dfa   :  { %v1538_v49 = vrot.slane %v1537_v0, 2 }
0x1dfc   :  { %v1539_v14 = vadd.f32 %v1538_v49, %v1537_v0 }
0x1dfe   :  { %v1540_v11 = vrot.slane %v1539_v14, 1 }
0x1e00   :  { %v1541_v32 = vadd.f32 %v1540_v11, %v1539_v14 }
0x1e3c   :  { %v3185_v24 = vpop.xlane.xlu1 %1480 }
0x1e3d   :  { %v1528_v43 = vmul.f32 %v3187_v16, %v3185_v24 }
0x1e3f   :  { %v1529_v44 = vrot.slane %v1528_v43, 4 }
0x1e41   :  { %v1530_v46 = vadd.f32 %v1529_v44, %v1528_v43 }
0x1e43   :  { %v1531_v50 = vrot.slane %v1530_v46, 2 }
0x1e45   :  { %v1532_v7 = vadd.f32 %v1531_v50, %v1530_v46 }
0x1e47   :  { %v1533_v4 = vrot.slane %v1532_v7, 1 }
0x1e49   :  { %v1534_v27 = vadd.f32 %v1533_v4, %v1532_v7 }
0x1e4b   :  { %v3191_v37 = vadd.f32 %v1541_v32, %v1534_v27 }
0x1e4d   :  { %2160 = vtanh.f32 %v3191_v37 }
0x1e5a   :  { %v2161_v53 = vpop.eup %2160 }
0x1e5b   :  { %1546 = vperm.xlu0 %2047, %v2161_v53   ;;  %v1553_v5 = vmul.f32 %v3194_v56, %v2161_v53 }
0x1e5d   :  { %1555 = vrot.lane.b32.xlu1 %v1553_v5, %s2295_s0 }
0x1e5f   :  { %2053 = vset.pattern.permute.xlu0 %v3526_v51 }
0x1ecf   :  { %v1556_v59 = vpop.permute.xlu1 %1555 }
0x1ed0   :  { %v1558_v61 = vadd.f32 %v1556_v59, %v3191_v37 }
0x1ed2   :  { %2162 = vtanh.f32 %v1558_v61 }
0x1ed6   :  { %v3203_v30 = vpop.permute.xlu0 %1546 }
0x1ed7   :  { %v1560_v23 = vmul.f32 %v3205_v1, %v3203_v30 }
0x1ed9   :  { %v1562_v21 = vadd.f32 %v1560_v23, %v3191_v37 }
0x1edf   :  { %v2163_v19 = vpop.eup %2162 }
0x1ee0   :  { %v1572_v12 = vmul.f32 %v2163_v19, %v2374_v52 }
0x1ee2   :  { %1574 = vrot.lane.b32.xlu1 %v1572_v12, %s2295_s0 }
0x1ee6   :  { %1565 = vperm.xlu1 %2048, %v2163_v19  }
0x1eea   :  { %2049 = vset.pattern.permute.xlu1 %v3527_v17 }
0x1f54   :  { %v1575_v42 = vpop.permute.xlu1 %1574 }
0x1f55   :  { %v1577_v40 = vadd.f32 %v1575_v42, %v1562_v21 }
0x1f57   :  { %2164 = vtanh.f32 %v1577_v40 }
0x1f61   :  { %v3213_v49 = vpop.permute.xlu1 %1565 }
0x1f62   :  { %v1579_v43 = vmul.f32 %v3213_v49, %v2393_v3 }
0x1f64   :  { %v2165_v20 = vpop.eup %2164  ;;  %v1580_v44 = vadd.f32 %v1579_v43, %v1560_v23 }
0x1f65   :  { %v1591_v0 = vmul.f32 %v2165_v20, %v2386_v62 }
0x1f66   :  { %v1581_v14 = vadd.f32 %v1580_v44, %v3191_v37 }
0x1f67   :  { %1593 = vrot.lane.b32.xlu1 %v1591_v0, %s2295_s0 }
0x1f6b   :  { %1584 = vperm.xlu1 %2049, %v2165_v20  }
0x1f6f   :  { %2050 = vset.pattern.permute.xlu1 %v3528_v15 }
0x1fd9   :  { %v1594_v46 = vpop.permute.xlu1 %1593 }
0x1fda   :  { %v1596_v50 = vadd.f32 %v1594_v46, %v1581_v14 }
0x1fdc   :  { %2166 = vtanh.f32 %v1596_v50 }
0x1fe6   :  { %v3221_v4 = vpop.permute.xlu1 %1584 }
0x1fe7   :  { %v1598_v32 = vmul.f32 %v3221_v4, %v2407_v18 }
0x1fe9   :  { %v2167_v11 = vpop.eup %2166  ;;  %v1599_v27 = vadd.f32 %v1598_v32, %v1580_v44  ;;  %v3237_v44 = vld [vmem:[#allocation6] sm:$0xff] }
0x1fea   :  { %v1610_v7 = vmul.f32 %v2167_v11, %v2400_v13  ;;  %v1503_v14 = vmul.f32 %v3237_v44, %v3134_v58 }
0x1feb   :  { %v1600_v53 = vadd.f32 %v1599_v27, %v3191_v37 }
0x1fec   :  { %1612 = vrot.lane.b32.xlu1 %v1610_v7, %s2295_s0 }
0x1ff0   :  { %1603 = vperm.xlu1 %2050, %v2167_v11  }
0x1ff4   :  { %2051 = vset.pattern.permute.xlu1 %v3529_v39 }
0x205e   :  { %v1613_v5 = vpop.permute.xlu1 %1612 }
0x205f   :  { %v1615_v59 = vadd.f32 %v1613_v5, %v1600_v53 }
0x2061   :  { %2168 = vtanh.f32 %v1615_v59  ;;  %v3248_v59 = vld [vmem:[#allocation6 + $0x8] sm:$0xff] }
0x2062   :  { %v1510_v58 = vmul.f32 %v3248_v59, %v3125_v29  ;;  %v3259_v29 = vld [vmem:[#allocation3 + $0x7] ss:$0 sm:$0xff] }
0x206b   :  { %v3229_v12 = vpop.permute.xlu1 %1603 }
0x206c   :  { %v1617_v23 = vmul.f32 %v3229_v12, %v2421_v36 }
0x206e   :  { %v2169_v61 = vpop.eup %2168  ;;  %v1618_v21 = vadd.f32 %v1617_v23, %v1599_v27 }
0x206f   :  { %v1629_v19 = vmul.f32 %v2169_v61, %v2414_v31 }
0x2070   :  { %v1619_v42 = vadd.f32 %v1618_v21, %v3191_v37 }
0x2071   :  { %1631 = vrot.lane.b32.xlu1 %v1629_v19, %s2295_s0 }
0x2075   :  { %1622 = vperm.xlu1 %2051, %v2169_v61  }
0x2079   :  { %2052 = vset.pattern.permute.xlu1 %v3530_v48 }
0x20e3   :  { %v1632_v40 = vpop.permute.xlu1 %1631 }
0x20e4   :  { %v1634_v20 = vadd.f32 %v1632_v40, %v1619_v42 }
0x20e6   :  { %2170 = vtanh.f32 %v1634_v20 }
0x20f0   :  { %v3241_v46 = vpop.permute.xlu1 %1622 }
0x20f1   :  { %v1636_v50 = vmul.f32 %v3241_v46, %v2439_v57 }
0x20f3   :  { %v2171_v0 = vpop.eup %2170  ;;  %v1637_v11 = vadd.f32 %v1636_v50, %v1618_v21 }
0x20f4   :  { %v1648_v43 = vmul.f32 %v2171_v0, %v2428_v45 }
0x20f5   :  { %v1638_v7 = vadd.f32 %v1637_v11, %v3191_v37 }
0x20f6   :  { %1650 = vrot.lane.b32.xlu1 %v1648_v43, %s2295_s0 }
0x20fa   :  { %1641 = vperm.xlu1 %2052, %v2171_v0  }
0x20fe   :  { %2054 = vset.pattern.permute.xlu1 %v3531_v22 }
0x211e   :  { %1504 = vadd.xlane.f32.xlu1 %v1503_v14 }
0x2168   :  { %v1651_v32 = vpop.permute.xlu1 %1650 }
0x2169   :  { %v1653_v27 = vadd.f32 %v1651_v32, %v1638_v7 }
0x216b   :  { %2172 = vtanh.f32 %v1653_v27 }
0x2175   :  { %v3253_v61 = vpop.permute.xlu1 %1641 }
0x2176   :  { %v1655_v19 = vmul.f32 %v3253_v61, %v3592_v9 }
0x2178   :  { %v2173_v53 = vpop.eup %2172  ;;  %v1656_v23 = vadd.f32 %v1655_v19, %v1637_v11 }
0x2179   :  { %v1667_v5 = vmul.f32 %v2173_v53, %v2446_v6 }
0x217a   :  { %v1657_v21 = vadd.f32 %v1656_v23, %v3191_v37  ;;  %v3276_v23 = vld [vmem:[#allocation6 + $0x40] sm:$0xff] }
0x217b   :  { %1669 = vrot.lane.b32.xlu0 %v1667_v5, %s2295_s0  ;;  %v3268_v5 = vld [vmem:[#allocation6 + $0x38] sm:$0xff] }
0x219a   :  { %1511 = vadd.xlane.f32.xlu0 %v1510_v58  ;;  %v3272_v58 = vld [vmem:[#allocation6 + $0x48] sm:$0xff] }
0x219b   :  { %3609 = vst [vmem:[#allocation29_spill] sm:$0xff] %v3272_v58  ;;  %v1706_v19 = vmul.f32 %v3272_v58, %v3185_v24 }
0x21a7   :  { %v1505_v0 = vpop.xlane.xlu1 %1504 }
0x21b0   :  { %1660 = vperm.xlu0 %2053, %v2173_v53  }
0x21b4   :  { %2055 = vset.pattern.permute.xlu0 %v3542_v41  ;;  %v1745_v41 = vmul.f32 %v3127_v10, %v3259_v29  ;;  %v1683_v10 = vmul.f32 %v3268_v5, %v3185_v24  ;;  %v3611_v24 = vld [vmem:[#allocation20_spill] sm:$0xff] }
0x21ed   :  { %v1670_v42 = vpop.permute.xlu0 %1669 }
0x21ee   :  { %v1672_v40 = vadd.f32 %v1670_v42, %v1657_v21  ;;  %v1691_v21 = vmul.f32 %v3276_v23, %v3179_v63  ;;  %v3280_v42 = vld [vmem:[#allocation6 + $0x50] sm:$0xff] }
0x21ef   :  { %3610 = vst [vmem:[#allocation30_spill] sm:$0xff] %v3280_v42 }
0x21f0   :  { %2174 = vtanh.f32 %v1672_v40  ;;  %v1684_v40 = vrot.slane %v1683_v10, 4 }
0x21fd   :  { %v2175_v20 = vpop.eup %2174 }
0x21fe   :  { %1676 = vperm.xlu1 %2054, %v2175_v20   ;;  %v1707_v20 = vrot.slane %v1706_v19, 4 }
0x2202   :  { %2056 = vset.pattern.permute.xlu1 %v3593_v2 }
0x2222   :  { %1746 = vadd.xlane.f32.xlu1 %v1745_v41  ;;  %v1692_v41 = vrot.slane %v1691_v21, 4 }
0x2223   :  { %v1512_v43 = vpop.xlane.xlu0 %1511 }
0x2224   :  { %v1513_v14 = vadd.f32 %v1512_v43, %v1505_v0  ;;  %v1685_v43 = vadd.f32 %v1684_v40, %v1683_v10  ;;  %v3614_v10 = vld [vmem:[#allocation21_spill] sm:$0xff]  ;;  %v3615_v40 = vld [vmem:[#allocation22_spill] sm:$0xff] }
0x2226   :  { %v1514_v50 = vmul.f32 %v3131_v55, %v1513_v14  ;;  %v1708_v14 = vadd.f32 %v1707_v20, %v1706_v19  ;;  %v1587_v19 = vmul.f32 %v3221_v4, %v3614_v10  ;;  %v1589_v20 = vmul.f32 %v3221_v4, %v3615_v40 }
0x2227   :  { %v1686_v55 = vrot.slane %v1685_v43, 2  ;;  %v1627_v4 = vmul.f32 %v3241_v46, %v3608_v38 }
0x2228   :  { %v1515_v11 = vrot.slane %v1514_v50, 4 }
0x2229   :  { %v1687_v40 = vadd.f32 %v1686_v55, %v1685_v43 }
0x222a   :  { %v1516_v37 = vadd.f32 %v1515_v11, %v1514_v50  ;;  %v1568_v50 = vmul.f32 %v3213_v49, %v3599_v25  ;;  %v1570_v11 = vmul.f32 %v3213_v49, %v3611_v24  ;;  %v1709_v49 = vrot.slane %v1708_v14, 2 }
0x222c   :  { %v1517_v7 = vrot.slane %v1516_v37, 2  ;;  %v1710_v25 = vadd.f32 %v1709_v49, %v1708_v14 }
0x222e   :  { %v1518_v32 = vadd.f32 %v1517_v7, %v1516_v37  ;;  %v1693_v37 = vadd.f32 %v1692_v41, %v1691_v21  ;;  %v1606_v41 = vmul.f32 %v3229_v12, %v3605_v54  ;;  %v1711_v55 = vrot.slane %v1710_v25, 1 }
0x2230   :  { %v1519_v27 = vrot.slane %v1518_v32, 1 }
0x2232   :  { %v3264_v53 = vadd.f32 %v1519_v27, %v1518_v32  ;;  %v3288_v32 = vld [vmem:[#allocation6 + $0x68] sm:$0xff] }
0x2233   :  { %3612 = vst [vmem:[#allocation13_spill] sm:$0xff] %v3288_v32  ;;  %v1549_v27 = vmul.f32 %v3288_v32, %v3203_v30 }
0x2234   :  { %v1748_v2 = vmul.f32 %v3136_v8, %v3264_v53  ;;  %v1714_v8 = vmul.f32 %v3280_v42, %v3179_v63  ;;  %v3292_v63 = vld [vmem:[#allocation6 + $0x70] sm:$0xff]  ;;  %v1694_v42 = vrot.slane %v1693_v37, 2 }
0x2235   :  { %3613 = vst [vmem:[#allocation12_spill] sm:$0xff] %v3292_v63  ;;  %v1569_v21 = vadd.f32 %v1568_v50, %v1549_v27  ;;  %v1661_v50 = vpop.permute.xlu0 %1660 }
0x2236   :  { %1749 = vadd.xlane.f32.xlu0 %v1748_v2  ;;  %v1715_v0 = vrot.slane %v1714_v8, 4  ;;  %v1551_v2 = vmul.f32 %v3292_v63, %v3203_v30  ;;  %v3617_v63 = vld [vmem:[#allocation25_spill] sm:$0xff] }
0x2237   :  { %v1588_v32 = vadd.f32 %v1587_v19, %v1569_v21  ;;  %v1625_v10 = vmul.f32 %v3241_v46, %v3617_v63  ;;  %v1665_v63 = vmul.f32 %v1661_v50, %v3541_v34  ;;  %v1688_v46 = vrot.slane %v1687_v40, 1 }
0x2238   :  { %v1716_v7 = vadd.f32 %v1715_v0, %v1714_v8  ;;  %v1571_v8 = vadd.f32 %v1570_v11, %v1551_v2  ;;  %v3616_v0 = vld [vmem:[#allocation24_spill] sm:$0xff]  ;;  %v3618_v2 = vld [vmem:[#allocation27_spill] sm:$0xff] }
0x2239   :  { %v1608_v24 = vmul.f32 %v3229_v12, %v3616_v0  ;;  %v1607_v11 = vadd.f32 %v1606_v41, %v1588_v32  ;;  %v1644_v54 = vmul.f32 %v3253_v61, %v3618_v2  ;;  %v1646_v12 = vmul.f32 %v3253_v61, %v3539_v60 }
0x223a   :  { %v1717_v58 = vrot.slane %v1716_v7, 2  ;;  %v1590_v30 = vadd.f32 %v1589_v20, %v1571_v8  ;;  %v1695_v0 = vadd.f32 %v1694_v42, %v1693_v37  ;;  %v1663_v8 = vmul.f32 %v1661_v50, %v3540_v26 }
0x223b   :  { %v1626_v20 = vadd.f32 %v1625_v10, %v1607_v11  ;;  %v1712_v42 = vadd.f32 %v1711_v55, %v1710_v25 }
0x223c   :  { %v1609_v27 = vadd.f32 %v1608_v24, %v1590_v30  ;;  %v1718_v19 = vadd.f32 %v1717_v58, %v1716_v7  ;;  %v1696_v32 = vrot.slane %v1695_v0, 1  ;;  %v1689_v58 = vadd.f32 %v1688_v46, %v1687_v40 }
0x223d   :  { %v1645_v43 = vadd.f32 %v1644_v54, %v1626_v20 }
0x223e   :  { %v1628_v21 = vadd.f32 %v1627_v4, %v1609_v27  ;;  %v1719_v24 = vrot.slane %v1718_v19, 1  ;;  %v1697_v10 = vadd.f32 %v1696_v32, %v1695_v0 }
0x223f   :  { %v1664_v41 = vadd.f32 %v1663_v8, %v1645_v43 }
0x2240   :  { %v1647_v14 = vadd.f32 %v1646_v12, %v1628_v21  ;;  %v1720_v4 = vadd.f32 %v1719_v24, %v1718_v19 }
0x2242   :  { %v1666_v30 = vadd.f32 %v1665_v63, %v1647_v14  ;;  %v3318_v63 = vld [vmem:[#allocation6 + $0x20] sm:$0xff] }
0x2279   :  { %v1677_v49 = vpop.permute.xlu1 %1676 }
0x227a   :  { %v1679_v38 = vmul.f32 %v1677_v49, %v2557_v33  ;;  %v1681_v61 = vmul.f32 %v1677_v49, %v2560_v47 }
0x227c   :  { %v1680_v37 = vadd.f32 %v1679_v38, %v1664_v41  ;;  %v1682_v7 = vadd.f32 %v1681_v61, %v1666_v30 }
0x227e   :  { %v1690_v50 = vadd.f32 %v1689_v58, %v1680_v37  ;;  %v1713_v11 = vadd.f32 %v1712_v42, %v1682_v7 }
0x2280   :  { %v1698_v27 = vadd.f32 %v1697_v10, %v1690_v50  ;;  %v1721_v54 = vadd.f32 %v1720_v4, %v1713_v11 }
0x2282   :  { %v1722_v12 = vmul.f32 20.0, %v1721_v54  ;;  %v1702_v20 = vrot.slane %v1698_v27, %v2564_v35 }
0x2284   :  { %v1723_v21 = vadd.f32 %v1722_v12, %v3264_v53  ;;  %v1703_v8 = vmul.f32 %v3318_v63, %v1702_v20 }
0x2286   :  { %v1724_v43 = vadd.f32 %v1723_v21, %v1698_v27  ;;  %1704 = vadd.xlane.f32.xlu1 %v1703_v8 }
0x2288   :  { %1725 = vst [vmem:[#allocation8 + $0x6] sm:$0x1] %v1724_v43 }
0x22ab   :  { %v1747_v38 = vpop.xlane.xlu1 %1746 }
0x22bf   :  { %v1750_v25 = vpop.xlane.xlu0 %1749 }
0x22c0   :  { %v3321_v40 = vsub.f32 %v1747_v38, %v1750_v25 }
0x22c2   :  { %v1759_v0 = vmul.f32 %v3181_v28, %v3321_v40 }
0x22c4   :  { %v1760_v19 = vrot.slane %v1759_v0, 4 }
0x22c6   :  { %v1761_v46 = vadd.f32 %v1760_v19, %v1759_v0 }
0x22c8   :  { %v1762_v14 = vrot.slane %v1761_v46, 2 }
0x22ca   :  { %v1763_v49 = vadd.f32 %v1762_v14, %v1761_v46 }
0x22cc   :  { %v1764_v61 = vrot.slane %v1763_v49, 1 }
0x22ce   :  { %v1765_v37 = vadd.f32 %v1764_v61, %v1763_v49 }
0x230f   :  { %v3325_v55 = vpop.xlane.xlu1 %1704 }
0x2310   :  { %v1752_v32 = vmul.f32 %v3187_v16, %v3325_v55 }
0x2312   :  { %v1753_v24 = vrot.slane %v1752_v32, 4 }
0x2314   :  { %v1754_v41 = vadd.f32 %v1753_v24, %v1752_v32 }
0x2316   :  { %v1755_v30 = vrot.slane %v1754_v41, 2 }
0x2318   :  { %v1756_v58 = vadd.f32 %v1755_v30, %v1754_v41 }
0x231a   :  { %v1757_v42 = vrot.slane %v1756_v58, 1 }
0x231c   :  { %v1758_v7 = vadd.f32 %v1757_v42, %v1756_v58 }
0x231e   :  { %v3329_v10 = vadd.f32 %v1765_v37, %v1758_v7 }
0x2320   :  { %2176 = vtanh.f32 %v3329_v10 }
0x232d   :  { %v2177_v28 = vpop.eup %2176 }
0x232e   :  { %1770 = vperm.xlu0 %2055, %v2177_v28   ;;  %v1777_v4 = vmul.f32 %v3194_v56, %v2177_v28 }
0x2330   :  { %1779 = vrot.lane.b32.xlu1 %v1777_v4, %s2295_s0 }
0x2332   :  { %2061 = vset.pattern.permute.xlu0 %v3526_v51 }
0x23a2   :  { %v1780_v16 = vpop.permute.xlu1 %1779 }
0x23a3   :  { %v1782_v50 = vadd.f32 %v1780_v16, %v3329_v10  ;;  %v1734_v16 = vmul.f32 %v3248_v59, %v3259_v29  ;;  %v1915_v59 = vmul.f32 %v3276_v23, %v3321_v40 }
0x23a5   :  { %2178 = vtanh.f32 %v1782_v50 }
0x23a9   :  { %v3339_v54 = vpop.permute.xlu0 %1770 }
0x23aa   :  { %v1784_v56 = vmul.f32 %v3205_v1, %v3339_v54 }
0x23ac   :  { %v1786_v12 = vadd.f32 %v1784_v56, %v3329_v10 }
0x23b2   :  { %v2179_v11 = vpop.eup %2178 }
0x23b3   :  { %v1796_v27 = vmul.f32 %v2179_v11, %v2374_v52 }
0x23b5   :  { %1798 = vrot.lane.b32.xlu1 %v1796_v27, %s2295_s0 }
0x23b9   :  { %1789 = vperm.xlu1 %2056, %v2179_v11  }
0x23bd   :  { %2057 = vset.pattern.permute.xlu1 %v3527_v17 }
0x2427   :  { %v1799_v51 = vpop.permute.xlu1 %1798 }
0x2428   :  { %v1801_v20 = vadd.f32 %v1799_v51, %v1786_v12 }
0x242a   :  { %2180 = vtanh.f32 %v1801_v20 }
0x2434   :  { %v3347_v52 = vpop.permute.xlu1 %1789 }
0x2435   :  { %v1803_v17 = vmul.f32 %v3347_v52, %v2393_v3 }
0x2437   :  { %v2181_v21 = vpop.eup %2180  ;;  %v1804_v43 = vadd.f32 %v1803_v17, %v1784_v56  ;;  %v3620_v17 = vld [vmem:[#allocation13_spill] sm:$0xff] }
0x2438   :  { %v1815_v8 = vmul.f32 %v2181_v21, %v2386_v62 }
0x2439   :  { %v1805_v1 = vadd.f32 %v1804_v43, %v3329_v10 }
0x243a   :  { %1817 = vrot.lane.b32.xlu1 %v1815_v8, %s2295_s0 }
0x243e   :  { %1808 = vperm.xlu1 %2057, %v2181_v21   ;;  %v3619_v21 = vld [vmem:[#allocation19_spill] sm:$0xff] }
0x2442   :  { %2058 = vset.pattern.permute.xlu1 %v3528_v15 }
0x24ac   :  { %v1818_v25 = vpop.permute.xlu1 %1817 }
0x24ad   :  { %v1820_v38 = vadd.f32 %v1818_v25, %v1805_v1  ;;  %v3621_v1 = vld [vmem:[#allocation21_spill] sm:$0xff] }
0x24af   :  { %2182 = vtanh.f32 %v1820_v38  ;;  %v3622_v38 = vld [vmem:[#allocation23_spill] sm:$0xff] }
0x24b9   :  { %v3355_v62 = vpop.permute.xlu1 %1808 }
0x24ba   :  { %v1822_v15 = vmul.f32 %v3355_v62, %v2407_v18 }
0x24bc   :  { %v2183_v0 = vpop.eup %2182  ;;  %v1823_v3 = vadd.f32 %v1822_v15, %v1804_v43  ;;  %v1773_v43 = vmul.f32 %v3620_v17, %v3339_v54 }
0x24bd   :  { %v1834_v19 = vmul.f32 %v2183_v0, %v2400_v13 }
0x24be   :  { %v1824_v46 = vadd.f32 %v1823_v3, %v3329_v10 }
0x24bf   :  { %1836 = vrot.lane.b32.xlu1 %v1834_v19, %s2295_s0  ;;  %v3623_v19 = vld [vmem:[#allocation25_spill] sm:$0xff] }
0x24c3   :  { %1827 = vperm.xlu1 %2058, %v2183_v0  }
0x24c7   :  { %2059 = vset.pattern.permute.xlu1 %v3529_v39 }
0x2531   :  { %v1837_v14 = vpop.permute.xlu1 %1836 }
0x2532   :  { %v1839_v32 = vadd.f32 %v1837_v14, %v1824_v46 }
0x2534   :  { %2184 = vtanh.f32 %v1839_v32 }
0x253e   :  { %v3363_v13 = vpop.permute.xlu1 %1827 }
0x253f   :  { %v1841_v39 = vmul.f32 %v3363_v13, %v2421_v36 }
0x2541   :  { %v2185_v24 = vpop.eup %2184  ;;  %v1842_v18 = vadd.f32 %v1841_v39, %v1823_v3 }
0x2542   :  { %v1853_v49 = vmul.f32 %v2185_v24, %v2414_v31 }
0x2543   :  { %v1843_v41 = vadd.f32 %v1842_v18, %v3329_v10 }
0x2544   :  { %1855 = vrot.lane.b32.xlu1 %v1853_v49, %s2295_s0 }
0x2548   :  { %1846 = vperm.xlu1 %2059, %v2185_v24  }
0x254c   :  { %2060 = vset.pattern.permute.xlu1 %v3530_v48 }
0x25b6   :  { %v1856_v30 = vpop.permute.xlu1 %1855 }
0x25b7   :  { %v1858_v61 = vadd.f32 %v1856_v30, %v1843_v41 }
0x25b9   :  { %2186 = vtanh.f32 %v1858_v61 }
0x25c3   :  { %v3371_v31 = vpop.permute.xlu1 %1846 }
0x25c4   :  { %v1860_v48 = vmul.f32 %v3371_v31, %v2439_v57  ;;  %v1849_v15 = vmul.f32 %v3371_v31, %v3623_v19 }
0x25c6   :  { %v2187_v58 = vpop.eup %2186  ;;  %v1861_v36 = vadd.f32 %v1860_v48, %v1842_v18 }
0x25c7   :  { %v1872_v42 = vmul.f32 %v2187_v58, %v2428_v45 }
0x25c8   :  { %v1862_v37 = vadd.f32 %v1861_v36, %v3329_v10 }
0x25c9   :  { %1874 = vrot.lane.b32.xlu1 %v1872_v42, %s2295_s0 }
0x25cd   :  { %1865 = vperm.xlu1 %2060, %v2187_v58  }
0x25d1   :  { %2062 = vset.pattern.permute.xlu1 %v3531_v22 }
0x263b   :  { %v1875_v7 = vpop.permute.xlu1 %1874 }
0x263c   :  { %v1877_v28 = vadd.f32 %v1875_v7, %v1862_v37 }
0x263e   :  { %2188 = vtanh.f32 %v1877_v28 }
0x2648   :  { %v1866_v50 = vpop.permute.xlu1 %1865 }
0x2649   :  { %v1879_v57 = vmul.f32 %v1866_v50, %v3592_v9  ;;  %v1916_v9 = vrot.slane %v1915_v59, 4  ;;  %v1868_v32 = vmul.f32 %v1866_v50, %v3618_v2 }
0x264b   :  { %v2189_v4 = vpop.eup %2188  ;;  %v1880_v11 = vadd.f32 %v1879_v57, %v1861_v36  ;;  %v1917_v8 = vadd.f32 %v1916_v9, %v1915_v59  ;;  %v3629_v59 = vld [vmem:[#allocation24_spill] sm:$0xff] }
0x264c   :  { %1884 = vperm.xlu0 %2061, %v2189_v4   ;;  %v1891_v45 = vmul.f32 %v2189_v4, %v2446_v6  ;;  %v1727_v6 = vmul.f32 %v3237_v44, %v3264_v53  ;;  %v1811_v44 = vmul.f32 %v3355_v62, %v3621_v1 }
0x264d   :  { %v1881_v27 = vadd.f32 %v1880_v11, %v3329_v10  ;;  %v1792_v10 = vmul.f32 %v3347_v52, %v3619_v21  ;;  %v1918_v0 = vrot.slane %v1917_v8, 2 }
0x264e   :  { %1893 = vrot.lane.b32.xlu1 %v1891_v45, %s2295_s0  ;;  %v3624_v45 = vld [vmem:[#allocation29_spill] sm:$0xff] }
0x264f   :  { %v1793_v25 = vadd.f32 %v1792_v10, %v1773_v43  ;;  %v1919_v24 = vadd.f32 %v1918_v0, %v1917_v8 }
0x2650   :  { %2063 = vset.pattern.permute.xlu0 %v3531_v22  ;;  %v1907_v22 = vmul.f32 %v3268_v5, %v3325_v55  ;;  %v1830_v5 = vmul.f32 %v3363_v13, %v3622_v38 }
0x2651   :  { %v1812_v23 = vadd.f32 %v1811_v44, %v1793_v25  ;;  %v1920_v42 = vrot.slane %v1919_v24, 1 }
0x2652   :  { %v1908_v29 = vrot.slane %v1907_v22, 4 }
0x2653   :  { %v1831_v14 = vadd.f32 %v1830_v5, %v1812_v23  ;;  %v1921_v7 = vadd.f32 %v1920_v42, %v1919_v24  ;;  %v3631_v23 = vld [vmem:[#allocation28_spill] sm:$0xff] }
0x2654   :  { %v1909_v20 = vadd.f32 %v1908_v29, %v1907_v22  ;;  %v3628_v22 = vld [vmem:[#allocation22_spill] sm:$0xff]  ;;  %v1832_v29 = vmul.f32 %v3363_v13, %v3629_v59 }
0x2655   :  { %v1850_v49 = vadd.f32 %v1849_v15, %v1831_v14 }
0x2656   :  { %v1910_v53 = vrot.slane %v1909_v20, 2 }
0x2657   :  { %v1869_v41 = vadd.f32 %v1868_v32, %v1850_v49 }
0x2658   :  { %v1911_v46 = vadd.f32 %v1910_v53, %v1909_v20 }
0x265a   :  { %v1912_v18 = vrot.slane %v1911_v46, 1 }
0x265c   :  { %v1913_v48 = vadd.f32 %v1912_v18, %v1911_v46 }
0x266b   :  { %1735 = vadd.xlane.f32.xlu0 %v1734_v16  ;;  %v3625_v16 = vld [vmem:[#allocation30_spill] sm:$0xff] }
0x266c   :  { %v1938_v57 = vmul.f32 %v3625_v16, %v3321_v40  ;;  %v3630_v40 = vld [vmem:[#allocation26_spill] sm:$0xff] }
0x266d   :  { %v1851_v21 = vmul.f32 %v3371_v31, %v3630_v40 }
0x26c0   :  { %v1894_v56 = vpop.permute.xlu1 %1893 }
0x26c1   :  { %v1896_v12 = vadd.f32 %v1894_v56, %v1881_v27  ;;  %v3626_v27 = vld [vmem:[#allocation20_spill] sm:$0xff]  ;;  %v1939_v56 = vrot.slane %v1938_v57, 4 }
0x26c3   :  { %2190 = vtanh.f32 %v1896_v12 }
0x26c7   :  { %v1885_v3 = vpop.permute.xlu0 %1884 }
0x26c8   :  { %v1887_v39 = vmul.f32 %v1885_v3, %v3540_v26  ;;  %v1930_v26 = vmul.f32 %v3624_v45, %v3325_v55  ;;  %v1940_v55 = vadd.f32 %v1939_v56, %v1938_v57 }
0x26ca   :  { %v1888_v61 = vadd.f32 %v1887_v39, %v1869_v41  ;;  %v1931_v11 = vrot.slane %v1930_v26, 4  ;;  %v1941_v8 = vrot.slane %v1940_v55, 2 }
0x26cc   :  { %v1932_v12 = vadd.f32 %v1931_v11, %v1930_v26  ;;  %v1942_v13 = vadd.f32 %v1941_v8, %v1940_v55 }
0x26ce   :  { %v1933_v9 = vrot.slane %v1932_v12, 2  ;;  %v1943_v19 = vrot.slane %v1942_v13, 1 }
0x26d0   :  { %v2191_v51 = vpop.eup %2190  ;;  %v1934_v17 = vadd.f32 %v1933_v9, %v1932_v12  ;;  %v1944_v14 = vadd.f32 %v1943_v19, %v1942_v13 }
0x26d1   :  { %1900 = vperm.xlu1 %2062, %v2191_v51   ;;  %v3627_v51 = vld [vmem:[#allocation12_spill] sm:$0xff] }
0x26d2   :  { %v1935_v25 = vrot.slane %v1934_v17, 1 }
0x26d4   :  { %v1936_v15 = vadd.f32 %v1935_v25, %v1934_v17 }
0x26f4   :  { %v1736_v1 = vpop.xlane.xlu0 %1735 }
0x26f5   :  { %1728 = vadd.xlane.f32.xlu1 %v1727_v6  ;;  %v1775_v6 = vmul.f32 %v3627_v51, %v3339_v54  ;;  %v1889_v54 = vmul.f32 %v1885_v3, %v3541_v34 }
0x274c   :  { %v1901_v30 = vpop.permute.xlu1 %1900 }
0x274d   :  { %v1903_v58 = vmul.f32 %v1901_v30, %v2557_v33  ;;  %v1794_v33 = vmul.f32 %v3347_v52, %v3626_v27  ;;  %v1870_v52 = vmul.f32 %v1866_v50, %v3539_v60  ;;  %v1905_v44 = vmul.f32 %v1901_v30, %v2560_v47 }
0x274f   :  { %v1904_v36 = vadd.f32 %v1903_v58, %v1888_v61 }
0x2751   :  { %v1914_v37 = vadd.f32 %v1913_v48, %v1904_v36 }
0x2753   :  { %v1922_v28 = vadd.f32 %v1921_v7, %v1914_v37 }
0x2755   :  { %v1926_v4 = vrot.slane %v1922_v28, %v2564_v35  ;;  %v1813_v35 = vmul.f32 %v3355_v62, %v3628_v22 }
0x2757   :  { %v1927_v2 = vmul.f32 %v3318_v63, %v1926_v4  ;;  %v1795_v63 = vadd.f32 %v1794_v33, %v1775_v6 }
0x2759   :  { %1928 = vadd.xlane.f32.xlu0 %v1927_v2  ;;  %v1814_v20 = vadd.f32 %v1813_v35, %v1795_v63 }
0x275b   :  { %v1833_v10 = vadd.f32 %v1832_v29, %v1814_v20 }
0x275d   :  { %v1852_v43 = vadd.f32 %v1851_v21, %v1833_v10 }
0x275f   :  { %v1871_v62 = vadd.f32 %v1870_v52, %v1852_v43 }
0x2761   :  { %v1890_v38 = vadd.f32 %v1889_v54, %v1871_v62 }
0x2763   :  { %v1906_v0 = vadd.f32 %v1905_v44, %v1890_v38 }
0x2765   :  { %v1937_v50 = vadd.f32 %v1936_v15, %v1906_v0 }
0x2767   :  { %v1945_v34 = vadd.f32 %v1944_v14, %v1937_v50 }
0x2769   :  { %v1946_v49 = vmul.f32 20.0, %v1945_v34 }
0x277e   :  { %v1729_v53 = vpop.xlane.xlu1 %1728 }
0x277f   :  { %v1737_v5 = vadd.f32 %v1736_v1, %v1729_v53 }
0x2781   :  { %v1738_v31 = vmul.f32 %v3631_v23, %v1737_v5 }
0x2783   :  { %v1739_v60 = vrot.slane %v1738_v31, 4 }
0x2785   :  { %v1740_v46 = vadd.f32 %v1739_v60, %v1738_v31 }
0x2787   :  { %v1741_v32 = vrot.slane %v1740_v46, 2 }
0x2789   :  { %v1742_v3 = vadd.f32 %v1741_v32, %v1740_v46 }
0x278b   :  { %v1743_v24 = vrot.slane %v1742_v3, 1 }
0x278d   :  { %v1744_v47 = vadd.f32 %v1743_v24, %v1742_v3 }
0x278f   :  { %v1947_v39 = vadd.f32 %v1946_v49, %v1744_v47  ;;  %1952 = vst [vmem:[#allocation2 + $0x8] sm:$0x1] %v1744_v47 }
0x2791   :  { %v1948_v18 = vadd.f32 %v1947_v39, %v1922_v28 }
0x2793   :  { %1949 = vst [vmem:[#allocation8 + $0x7] sm:$0x1] %v1948_v18 }
0x2794   :  { %2275 = shalt.err (!%p2272_p0)
}
0x2795   :  { %1962 = dma.vmem_to_hbm [thread:$0]  %s1960_s26, 128, %s3428_s2, [#allocation5]  }
0x27e2   :  { %v1929_v41 = vpop.xlane.xlu0 %1928 }
0x27e3   :  { %1951 = vst.msk [vmem:[#allocation2] sm:$0xff] %vm67_vm0, %v1929_v41 }
0x27e4   :  { %2288 = dma.done.wait [#allocation5], 128  }
0x27e5   :  { %2289 = vsyncadd [#allocation5], 4294967168 }
0x27e6   :  { %1966 = vsyncpa [#allocation4], 1 }
0x27e7   :  { %1967 = vsyncpa [#allocation7], 1 }
0x27e8   :  { %1968 = vsyncpa [#allocation5], 1 }

</bundles_post_ra>
